<compile_context>
chip_gen: v7x
topology: tpu7x:2x2x1
jax: 0.10.0
libtpu: 0.0.40
codegen_flags: <defaults>
</compile_context>

<pallas_src>
import jax
import jax.numpy as jnp
from jax import lax
from jax.experimental import pallas as pl
from jax.experimental.pallas import tpu as pltpu

BN_EPS = 1e-5


def _round_up(x, m):
    return ((x + m - 1) // m) * m


def moe_router_sig_kernel(x_ref, w1_ref, bn1_ref, w2_ref, bn2_ref, w3_ref,
                          b3_ref, out_ref):
    n = x_ref.shape[0]            # full batch resident (BN over batch axis)
    out_dim = out_ref.shape[1]
    inv_n = 1.0 / n               # static Python scalar

    x = x_ref[...].astype(jnp.bfloat16)

    # --- Linear(in_dim, 512) [bias cancelled by BN] + BN(512) + ReLU --------
    h1 = jnp.dot(x, w1_ref[...], preferred_element_type=jnp.float32)
    mu1 = jnp.sum(h1, axis=0, keepdims=True) * inv_n
    var1 = jnp.sum(h1 * h1, axis=0, keepdims=True) * inv_n - mu1 * mu1
    scale1 = bn1_ref[0:1, :] * lax.rsqrt(var1 + BN_EPS)
    shift1 = bn1_ref[1:2, :] - mu1 * scale1
    a1 = jnp.maximum(h1 * scale1 + shift1, 0.0).astype(jnp.bfloat16)

    # --- Linear(512, hidden_p) [bias cancelled by BN] + BN + Tanh -----------
    # Padded hidden lanes are identically zero pre-BN, normalize to 0, and hit
    # zeroed w3 rows, so they contribute nothing downstream.
    h2 = jnp.dot(a1, w2_ref[...], preferred_element_type=jnp.float32)
    mu2 = jnp.sum(h2, axis=0, keepdims=True) * inv_n
    var2 = jnp.sum(h2 * h2, axis=0, keepdims=True) * inv_n - mu2 * mu2
    scale2 = bn2_ref[0:1, :] * lax.rsqrt(var2 + BN_EPS)
    shift2 = bn2_ref[1:2, :] - mu2 * scale2
    a2 = jnp.tanh(h2 * scale2 + shift2).astype(jnp.bfloat16)

    # --- Linear(hidden_p, out_p) + Sigmoid, narrow (N, out_dim) store -------
    h3 = jnp.dot(a2, w3_ref[...], preferred_element_type=jnp.float32)
    logits = h3[:, :out_dim] + b3_ref[...]
    out_ref[...] = jax.nn.sigmoid(logits).astype(out_ref.dtype)


def pack_params(params):
    """One-time packing/padding of module parameters (off the per-call path).

    Returns (w1_bf16, bn1_pack, w2p_bf16, bn2_pack, w3p_bf16, b3_f32).
    Linear biases b1/b2 are dropped: training-mode BN cancels them exactly.
    """
    (w1, b1, g1, be1, w2, b2, g2, be2, w3, b3) = params
    del b1, b2
    hidden = w2.shape[1]
    out_dim = w3.shape[1]
    hp = _round_up(hidden, 128)        # lane-align the hidden layer
    op = _round_up(out_dim, 128)       # lane-align the layer-3 MXU output

    w1b = w1.astype(jnp.bfloat16)
    w2p = jnp.pad(w2, ((0, 0), (0, hp - hidden))).astype(jnp.bfloat16)
    w3p = jnp.pad(w3, ((0, hp - hidden), (0, op - out_dim))).astype(jnp.bfloat16)

    bn1_pack = jnp.concatenate([g1, be1], axis=0)                  # (2, 512)
    g2p = jnp.pad(g2, ((0, 0), (0, hp - hidden)), constant_values=1.0)
    be2p = jnp.pad(be2, ((0, 0), (0, hp - hidden)))
    bn2_pack = jnp.concatenate([g2p, be2p], axis=0)                # (2, hp)

    return (w1b, bn1_pack, w2p, bn2_pack, w3p, b3.astype(jnp.float32))


def moe_router_sig(x, packed):
    """Forward pass.  x: (N, in_dim) float32; packed: output of pack_params."""
    (w1b, bn1_pack, w2p, bn2_pack, w3p, b3) = packed
    n = x.shape[0]
    out_dim = b3.shape[1]

    full = lambda shape: pl.BlockSpec(shape, lambda i: (0,) * len(shape))

    return pl.pallas_call(
        moe_router_sig_kernel,
        out_shape=jax.ShapeDtypeStruct((n, out_dim), jnp.float32),
        grid=(1,),
        in_specs=[
            full(x.shape),
            full(w1b.shape),
            full(bn1_pack.shape),
            full(w2p.shape),
            full(bn2_pack.shape),
            full(w3p.shape),
            full(b3.shape),
        ],
        out_specs=full((n, out_dim)),
        compiler_params=pltpu.CompilerParams(
            dimension_semantics=("arbitrary",),
            # 32 MiB is within the default scoped limit on v6e/v7x and leaves
            # headroom on v7x's 64 MiB physical VMEM.
            vmem_limit_bytes=32 * 1024 * 1024),
    )(x, w1b, bn1_pack, w2p, bn2_pack, w3p, b3)


def init_params(key, in_dim, hidden_dim=100, out_dim=2):
    """Deterministic synthetic init matching the PyTorch module's shapes.

    Linear weights: xavier_uniform ('xav' mode).
    Linear biases:  default torch Linear init, U(-1/sqrt(fan_in), 1/sqrt(fan_in)).
    BatchNorm:      weight=1, bias=0 (default; untouched by init_weights).
    Weights are returned transposed to (in_features, out_features).
    """
    def xavier(k, fan_in, fan_out):
        a = (6.0 / (fan_in + fan_out)) ** 0.5
        w = jax.random.uniform(k, (fan_out, fan_in), jnp.float32, -a, a)
        return w.T

    def linear_bias(k, fan_in, fan_out):
        bound = 1.0 / (fan_in ** 0.5)
        return jax.random.uniform(k, (1, fan_out), jnp.float32, -bound, bound)

    ks = jax.random.split(key, 6)
    w1 = xavier(ks[0], in_dim, 512)
    b1 = linear_bias(ks[1], in_dim, 512)
    g1 = jnp.ones((1, 512), jnp.float32)
    be1 = jnp.zeros((1, 512), jnp.float32)

    w2 = xavier(ks[2], 512, hidden_dim)
    b2 = linear_bias(ks[3], 512, hidden_dim)
    g2 = jnp.ones((1, hidden_dim), jnp.float32)
    be2 = jnp.zeros((1, hidden_dim), jnp.float32)

    w3 = xavier(ks[4], hidden_dim, out_dim)
    b3 = linear_bias(ks[5], hidden_dim, out_dim)

    return (w1, b1, g1, be1, w2, b2, g2, be2, w3, b3)


def reference_forward(x, params):
    """Pure-JAX f32 reference (keeps the linear biases; BN cancels them)."""
    (w1, b1, g1, be1, w2, b2, g2, be2, w3, b3) = params

    def bn(h, g, b):
        mu = jnp.mean(h, axis=0, keepdims=True)
        var = jnp.mean((h - mu) ** 2, axis=0, keepdims=True)
        return (h - mu) / jnp.sqrt(var + BN_EPS) * g + b

    h = jnp.maximum(bn(x @ w1 + b1, g1, be1), 0.0)
    h = jnp.tanh(bn(h @ w2 + b2, g2, be2))
    return jax.nn.sigmoid(h @ w3 + b3)


if __name__ == "__main__":
    key = jax.random.PRNGKey(0)
    k_x, k_p = jax.random.split(key)

    batch, in_dim, hidden_dim, out_dim = 256, 32, 100, 2
    x = jax.random.normal(k_x, (batch, in_dim), jnp.float32)
    params = init_params(k_p, in_dim, hidden_dim, out_dim)

    # One-time packing/padding (NOT on the per-call path).
    packed = jax.block_until_ready(pack_params(params))

    fwd = jax.jit(moe_router_sig)
    out = jax.block_until_ready(fwd(x, packed))

    ref = reference_forward(x, params)
    assert out.shape == (batch, out_dim), out.shape
    err = float(jnp.max(jnp.abs(out - ref)))
    # bf16 MXU operands -> relaxed tolerance vs the f32 reference.
    assert err < 5e-3, f"max abs err {err}"

    print("KERNEL_OK")
</pallas_src>

<mosaic_0001>
module attributes {stable_mosaic.version = 11 : i64} {
  func.func @moe_router_sig_kernel(%arg0: i32, %arg1: memref<256x32xf32, #tpu.memory_space<vmem>>, %arg2: memref<32x512xbf16, #tpu.memory_space<vmem>>, %arg3: memref<2x512xf32, #tpu.memory_space<vmem>>, %arg4: memref<512x128xbf16, #tpu.memory_space<vmem>>, %arg5: memref<2x128xf32, #tpu.memory_space<vmem>>, %arg6: memref<128x128xbf16, #tpu.memory_space<vmem>>, %arg7: memref<1x2xf32, #tpu.memory_space<vmem>>, %arg8: memref<256x2xf32, #tpu.memory_space<vmem>>) attributes {dimension_semantics = [#tpu.dimension_semantics<arbitrary>], iteration_bounds = array<i64: 1>, scalar_prefetch = 0 : i64, scratch_operands = 0 : i64, tpu.core_type = #tpu.core_type<tc>, window_params = [{pipeline_mode = #tpu.pipeline_mode<synchronous>, transform_indices = @transform_0, window_bounds = array<i64: 256, 32>}, {pipeline_mode = #tpu.pipeline_mode<synchronous>, transform_indices = @transform_1, window_bounds = array<i64: 32, 512>}, {pipeline_mode = #tpu.pipeline_mode<synchronous>, transform_indices = @transform_2, window_bounds = array<i64: 2, 512>}, {pipeline_mode = #tpu.pipeline_mode<synchronous>, transform_indices = @transform_3, window_bounds = array<i64: 512, 128>}, {pipeline_mode = #tpu.pipeline_mode<synchronous>, transform_indices = @transform_4, window_bounds = array<i64: 2, 128>}, {pipeline_mode = #tpu.pipeline_mode<synchronous>, transform_indices = @transform_5, window_bounds = array<i64: 128, 128>}, {pipeline_mode = #tpu.pipeline_mode<synchronous>, transform_indices = @transform_6, window_bounds = array<i64: 1, 2>}, {pipeline_mode = #tpu.pipeline_mode<synchronous>, transform_indices = @transform_7, window_bounds = array<i64: 256, 2>}]} {
    %c0 = arith.constant 0 : index
    %c0_0 = arith.constant 0 : index
    %0 = vector.load %arg1[%c0, %c0_0] : memref<256x32xf32, #tpu.memory_space<vmem>>, vector<256x32xf32>
    %1 = arith.truncf %0 : vector<256x32xf32> to vector<256x32xbf16>
    %c0_1 = arith.constant 0 : index
    %c0_2 = arith.constant 0 : index
    %2 = vector.load %arg2[%c0_1, %c0_2] : memref<32x512xbf16, #tpu.memory_space<vmem>>, vector<32x512xbf16>
    %cst = arith.constant dense<0.000000e+00> : vector<256x512xf32>
    %3 = tpu.matmul %1, %2, %cst {dimension_numbers = #tpu.dot_dimension_numbers<[1], [0], [0], [1], [0, 0, 1, 1], [], []>} : vector<256x32xbf16>, vector<32x512xbf16>, vector<256x512xf32> -> vector<256x512xf32>
    %cst_3 = arith.constant dense<0.000000e+00> : vector<512xf32>
    %4 = vector.multi_reduction <add>, %3, %cst_3 [0] : vector<256x512xf32> to vector<512xf32>
    %5 = vector.shape_cast %4 : vector<512xf32> to vector<1x512xf32>
    %cst_4 = arith.constant 3.906250e-03 : f32
    %6 = vector.broadcast %cst_4 : f32 to vector<1x512xf32>
    %7 = arith.mulf %5, %6 : vector<1x512xf32>
    %8 = arith.mulf %3, %3 : vector<256x512xf32>
    %cst_5 = arith.constant dense<0.000000e+00> : vector<512xf32>
    %9 = vector.multi_reduction <add>, %8, %cst_5 [0] : vector<256x512xf32> to vector<512xf32>
    %10 = vector.shape_cast %9 : vector<512xf32> to vector<1x512xf32>
    %cst_6 = arith.constant 3.906250e-03 : f32
    %11 = vector.broadcast %cst_6 : f32 to vector<1x512xf32>
    %12 = arith.mulf %10, %11 : vector<1x512xf32>
    %13 = arith.mulf %7, %7 : vector<1x512xf32>
    %14 = arith.subf %12, %13 : vector<1x512xf32>
    %c0_7 = arith.constant 0 : index
    %c0_8 = arith.constant 0 : index
    %15 = vector.load %arg3[%c0_7, %c0_8] : memref<2x512xf32, #tpu.memory_space<vmem>>, vector<1x512xf32>
    %cst_9 = arith.constant 9.99999974E-6 : f32
    %16 = vector.broadcast %cst_9 : f32 to vector<1x512xf32>
    %17 = arith.addf %14, %16 : vector<1x512xf32>
    %18 = math.rsqrt %17 : vector<1x512xf32>
    %19 = arith.mulf %15, %18 : vector<1x512xf32>
    %c1 = arith.constant 1 : index
    %c0_10 = arith.constant 0 : index
    %20 = vector.load %arg3[%c1, %c0_10] : memref<2x512xf32, #tpu.memory_space<vmem>>, vector<1x512xf32>
    %21 = arith.mulf %7, %19 : vector<1x512xf32>
    %22 = arith.subf %20, %21 : vector<1x512xf32>
    %23 = vector.broadcast %19 : vector<1x512xf32> to vector<256x512xf32>
    %24 = arith.mulf %3, %23 : vector<256x512xf32>
    %25 = vector.broadcast %22 : vector<1x512xf32> to vector<256x512xf32>
    %26 = arith.addf %24, %25 : vector<256x512xf32>
    %cst_11 = arith.constant 0.000000e+00 : f32
    %27 = vector.broadcast %cst_11 : f32 to vector<256x512xf32>
    %28 = arith.maximumf %26, %27 : vector<256x512xf32>
    %29 = arith.truncf %28 : vector<256x512xf32> to vector<256x512xbf16>
    %c0_12 = arith.constant 0 : index
    %c0_13 = arith.constant 0 : index
    %30 = vector.load %arg4[%c0_12, %c0_13] : memref<512x128xbf16, #tpu.memory_space<vmem>>, vector<512x128xbf16>
    %cst_14 = arith.constant dense<0.000000e+00> : vector<256x128xf32>
    %31 = tpu.matmul %29, %30, %cst_14 {dimension_numbers = #tpu.dot_dimension_numbers<[1], [0], [0], [1], [0, 0, 1, 1], [], []>} : vector<256x512xbf16>, vector<512x128xbf16>, vector<256x128xf32> -> vector<256x128xf32>
    %cst_15 = arith.constant dense<0.000000e+00> : vector<128xf32>
    %32 = vector.multi_reduction <add>, %31, %cst_15 [0] : vector<256x128xf32> to vector<128xf32>
    %33 = vector.shape_cast %32 : vector<128xf32> to vector<1x128xf32>
    %cst_16 = arith.constant 3.906250e-03 : f32
    %34 = vector.broadcast %cst_16 : f32 to vector<1x128xf32>
    %35 = arith.mulf %33, %34 : vector<1x128xf32>
    %36 = arith.mulf %31, %31 : vector<256x128xf32>
    %cst_17 = arith.constant dense<0.000000e+00> : vector<128xf32>
    %37 = vector.multi_reduction <add>, %36, %cst_17 [0] : vector<256x128xf32> to vector<128xf32>
    %38 = vector.shape_cast %37 : vector<128xf32> to vector<1x128xf32>
    %cst_18 = arith.constant 3.906250e-03 : f32
    %39 = vector.broadcast %cst_18 : f32 to vector<1x128xf32>
    %40 = arith.mulf %38, %39 : vector<1x128xf32>
    %41 = arith.mulf %35, %35 : vector<1x128xf32>
    %42 = arith.subf %40, %41 : vector<1x128xf32>
    %c0_19 = arith.constant 0 : index
    %c0_20 = arith.constant 0 : index
    %43 = vector.load %arg5[%c0_19, %c0_20] : memref<2x128xf32, #tpu.memory_space<vmem>>, vector<1x128xf32>
    %cst_21 = arith.constant 9.99999974E-6 : f32
    %44 = vector.broadcast %cst_21 : f32 to vector<1x128xf32>
    %45 = arith.addf %42, %44 : vector<1x128xf32>
    %46 = math.rsqrt %45 : vector<1x128xf32>
    %47 = arith.mulf %43, %46 : vector<1x128xf32>
    %c1_22 = arith.constant 1 : index
    %c0_23 = arith.constant 0 : index
    %48 = vector.load %arg5[%c1_22, %c0_23] : memref<2x128xf32, #tpu.memory_space<vmem>>, vector<1x128xf32>
    %49 = arith.mulf %35, %47 : vector<1x128xf32>
    %50 = arith.subf %48, %49 : vector<1x128xf32>
    %51 = vector.broadcast %47 : vector<1x128xf32> to vector<256x128xf32>
    %52 = arith.mulf %31, %51 : vector<256x128xf32>
    %53 = vector.broadcast %50 : vector<1x128xf32> to vector<256x128xf32>
    %54 = arith.addf %52, %53 : vector<256x128xf32>
    %55 = math.tanh %54 : vector<256x128xf32>
    %56 = arith.truncf %55 : vector<256x128xf32> to vector<256x128xbf16>
    %c0_24 = arith.constant 0 : index
    %c0_25 = arith.constant 0 : index
    %57 = vector.load %arg6[%c0_24, %c0_25] : memref<128x128xbf16, #tpu.memory_space<vmem>>, vector<128x128xbf16>
    %cst_26 = arith.constant dense<0.000000e+00> : vector<256x128xf32>
    %58 = tpu.matmul %56, %57, %cst_26 {dimension_numbers = #tpu.dot_dimension_numbers<[1], [0], [0], [1], [0, 0, 1, 1], [], []>} : vector<256x128xbf16>, vector<128x128xbf16>, vector<256x128xf32> -> vector<256x128xf32>
    %59 = vector.extract_strided_slice %58 {offsets = [0, 0], sizes = [256, 2], strides = [1, 1]} : vector<256x128xf32> to vector<256x2xf32>
    %c0_27 = arith.constant 0 : index
    %c0_28 = arith.constant 0 : index
    %60 = vector.load %arg7[%c0_27, %c0_28] : memref<1x2xf32, #tpu.memory_space<vmem>>, vector<1x2xf32>
    %61 = vector.broadcast %60 : vector<1x2xf32> to vector<256x2xf32>
    %62 = arith.addf %59, %61 : vector<256x2xf32>
    %63 = arith.negf %62 : vector<256x2xf32>
    %64 = math.exp %63 : vector<256x2xf32>
    %cst_29 = arith.constant 1.000000e+00 : f32
    %65 = vector.broadcast %cst_29 : f32 to vector<256x2xf32>
    %66 = arith.addf %65, %64 : vector<256x2xf32>
    %67 = arith.divf %65, %66 : vector<256x2xf32>
    %c0_30 = arith.constant 0 : index
    %c0_31 = arith.constant 0 : index
    %68 = vector.load %arg8[%c0_30, %c0_31] : memref<256x2xf32, #tpu.memory_space<vmem>>, vector<256x2xf32>
    tpu.vector_store %arg8[%c0_30, %c0_31], %67 {strides = array<i32>} : memref<256x2xf32, #tpu.memory_space<vmem>>, vector<256x2xf32>,
    return
  }
  func.func @transform_0(%arg0: i32) -> (i32, i32) {
    %c0_i32 = arith.constant 0 : i32
    %c0_i32_0 = arith.constant 0 : i32
    %c0_i32_1 = arith.constant 0 : i32
    return %c0_i32, %c0_i32_0 : i32, i32
  }
  func.func @transform_1(%arg0: i32) -> (i32, i32) {
    %c0_i32 = arith.constant 0 : i32
    %c0_i32_0 = arith.constant 0 : i32
    %c0_i32_1 = arith.constant 0 : i32
    return %c0_i32, %c0_i32_0 : i32, i32
  }
  func.func @transform_2(%arg0: i32) -> (i32, i32) {
    %c0_i32 = arith.constant 0 : i32
    %c0_i32_0 = arith.constant 0 : i32
    %c0_i32_1 = arith.constant 0 : i32
    return %c0_i32, %c0_i32_0 : i32, i32
  }
  func.func @transform_3(%arg0: i32) -> (i32, i32) {
    %c0_i32 = arith.constant 0 : i32
    %c0_i32_0 = arith.constant 0 : i32
    %c0_i32_1 = arith.constant 0 : i32
    return %c0_i32, %c0_i32_0 : i32, i32
  }
  func.func @transform_4(%arg0: i32) -> (i32, i32) {
    %c0_i32 = arith.constant 0 : i32
    %c0_i32_0 = arith.constant 0 : i32
    %c0_i32_1 = arith.constant 0 : i32
    return %c0_i32, %c0_i32_0 : i32, i32
  }
  func.func @transform_5(%arg0: i32) -> (i32, i32) {
    %c0_i32 = arith.constant 0 : i32
    %c0_i32_0 = arith.constant 0 : i32
    %c0_i32_1 = arith.constant 0 : i32
    return %c0_i32, %c0_i32_0 : i32, i32
  }
  func.func @transform_6(%arg0: i32) -> (i32, i32) {
    %c0_i32 = arith.constant 0 : i32
    %c0_i32_0 = arith.constant 0 : i32
    %c0_i32_1 = arith.constant 0 : i32
    return %c0_i32, %c0_i32_0 : i32, i32
  }
  func.func @transform_7(%arg0: i32) -> (i32, i32) {
    %c0_i32 = arith.constant 0 : i32
    %c0_i32_0 = arith.constant 0 : i32
    %c0_i32_1 = arith.constant 0 : i32
    return %c0_i32, %c0_i32_0 : i32, i32
  }
}

</mosaic_0001>

<bundles_post_ra>
// kernel: moe_router_sig.1
= control target key start
LH: loop header
LB: loop body
LE: loop exit
PB: predicated region body
PF: predicated region fallthrough
CT: control target
= control target key end

     0   :  { %12 = vsyncpa [#allocation3], 0  ;;  %s3583_s24 = smov [#allocation2]   ;;  %s6266_s0 = inlined_call_operand.vmem [shape: f32[256,32], index: 0, kind: input, shape index: {}]   ;;  %s6267_s1 = inlined_call_operand.vmem [shape: bf16[32,512], index: 1, kind: input, shape index: {}]   ;;  %s6268_s2 = inlined_call_operand.vmem [shape: f32[2,512], index: 2, kind: input, shape index: {}]   ;;  %s6269_s3 = inlined_call_operand.vmem [shape: bf16[512,128], index: 3, kind: input, shape index: {}]   ;;  %s6270_s4 = inlined_call_operand.vmem [shape: f32[2,128], index: 4, kind: input, shape index: {}]   ;;  %s6271_s5 = inlined_call_operand.hbm [shape: bf16[128,128], index: 5, kind: input, shape index: {}]   ;;  %s6272_s6 = inlined_call_operand.vmem [shape: f32[1,2], index: 6, kind: input, shape index: {}]   ;;  %s6273_s7 = inlined_call_operand.vmem [shape: f32[256,2], index: 7, kind: output, shape index: {}]  }
   0x1   :  { %s28_s25 = sshll.u32 %s3583_s24, 4  ;;  %s3559_s28 = scalar_lea.hbm %s6271_s5, 1024  ;;  %s29_s25 = int_to_ptr.vmem [resolvable:$true] %s28_s25 }
   0x2   :  { %p3560_p0 = scmp.ne.s32.totalorder %s6271_s5, %s3559_s28  ;;  %p3563_p1 = scmp.lt.u32.totalorder %s3559_s28, %s6271_s5 }
   0x4   :  { %p3565_p2 = pnand %p3563_p1, %p3560_p0 }
   0x6   :  { %3568 = shalt.err (!%p3565_p2)
}
   0x7   :  { %s3569_s10 = scalar_lea.vmem %s29_s25, 1024  ;;  %p3574_p4 = scmp.lt.s32.totalorder %s29_s25, %s29_s25 }
   0x8   :  { %p3570_p3 = scmp.ne.s32.totalorder %s29_s25, %s3569_s10  ;;  %p3575_p5 = scmp.lt.s32.totalorder %s3569_s10, %s3569_s10 }
   0xa   :  { %p3576_p6 = por %p3575_p5, %p3574_p4 }
   0xc   :  { %p3577_p7 = pnand %p3576_p6, %p3570_p3 }
   0xe   :  { %3580 = shalt.err (!%p3577_p7)
}
   0xf   :  { %s3584_s11 = smov 64   ;;  %s3585_s12 = smov 4  }
  0x10   :  { %34 = dma.hbm_to_vmem [thread:$0]  %s6271_s5, 1024, %s29_s25, [#allocation3], %s3584_s11, %s3584_s11, %s3585_s12  }
  0x11   :  { %3581 = dma.done.wait [#allocation3], 1024  }
  0x12   :  { %3582 = vsyncadd [#allocation3], 4294966272  ;;  %v3586_v0 = vmov 0   ;;  %v3305_v1 = vld [vmem:[%s6267_s1 + $0x4] ss:$16 sps:$4 sm:$0xff]   ;;  %v42_v6 = vld [vmem:[%s6266_s0 + $0x8] sm:$0xff] }
  0x13   :  { %218 = vmatprep.mubr.bf16.mxu0 %v3586_v0  ;;  %338 = vmatprep.mubr.bf16.mxu1 %v3586_v0  ;;  %v3307_v2 = vld [vmem:[%s6267_s1] ss:$16 sps:$4 sm:$0xff]   ;;  %v3308_v3 = vld [vmem:[%s6267_s1 + $0x24] ss:$16 sps:$4 sm:$0xff]   ;;  %v66_v8 = vld [vmem:[%s6266_s0 + $0xc8] sm:$0xff]  ;;  %vm137_vm0 = vcmask 261120  }
  0x14   :  { %186 = vmatprep.subr.bf16.mxu0 %v3305_v1  ;;  %3296 = vmatprep.subr.bf16.mxu1 %v3305_v1  ;;  %v3310_v4 = vld [vmem:[%s6267_s1 + $0x20] ss:$16 sps:$4 sm:$0xff]   ;;  %v3313_v9 = vld [vmem:[%s6267_s1 + $0xc] ss:$16 sps:$4 sm:$0xff]   ;;  %v3311_v12 = vld [vmem:[%s6267_s1 + $0x8] ss:$16 sps:$4 sm:$0xff]  }
  0x15   :  { %v41_v5 = vld [vmem:[%s6266_s0] sm:$0xff]  ;;  %187 = vmatpush1.bf16.msra.mxu0 %v3307_v2  ;;  %3298 = vmatpush1.bf16.msra.mxu1 %v3307_v2  ;;  %v3316_v13 = vld [vmem:[%s6267_s1 + $0x2c] ss:$16 sps:$4 sm:$0xff]   ;;  %v43_v14 = vld [vmem:[%s6266_s0 + $0x10] sm:$0xff]  ;;  %vm2848_vm1 = vcmask 15360  }
  0x16   :  { %v65_v7 = vld [vmem:[%s6266_s0 + $0xc0] sm:$0xff]  ;;  %188 = vmatprep.subr.bf16.mxu0 %v3308_v3  ;;  %3297 = vmatprep.subr.bf16.mxu1 %v3308_v3  ;;  %v73_v10 = vpack.c.bf16 %v42_v6, %v41_v5  ;;  %v44_v15 = vld [vmem:[%s6266_s0 + $0x18] sm:$0xff]  ;;  %v67_v16 = vld [vmem:[%s6266_s0 + $0xd0] sm:$0xff] }
  0x17   :  { %v3669_v11 = vpack.c.bf16 %v66_v8, %v65_v7  ;;  %v68_v17 = vld [vmem:[%s6266_s0 + $0xd8] sm:$0xff]  ;;  %v74_v19 = vpack.c.bf16 %v44_v15, %v43_v14  ;;  %v45_v21 = vld [vmem:[%s6266_s0 + $0x20] sm:$0xff]  ;;  %v46_v22 = vld [vmem:[%s6266_s0 + $0x28] sm:$0xff] }
  0x18   :  { %v3314_v18 = vld [vmem:[%s6267_s1 + $0x28] ss:$16 sps:$4 sm:$0xff]   ;;  %v3697_v20 = vpack.c.bf16 %v68_v17, %v67_v16  ;;  %v69_v23 = vld [vmem:[%s6266_s0 + $0xe0] sm:$0xff]  ;;  %v75_v25 = vpack.c.bf16 %v46_v22, %v45_v21  ;;  %v47_v27 = vld [vmem:[%s6266_s0 + $0x30] sm:$0xff] }
  0x19   :  { %189 = vmatpush1.bf16.msra.mxu0 %v3310_v4  ;;  %3299 = vmatpush1.bf16.msra.mxu1 %v3310_v4  ;;  %v70_v24 = vld [vmem:[%s6266_s0 + $0xe8] sm:$0xff]  ;;  %v48_v28 = vld [vmem:[%s6266_s0 + $0x38] sm:$0xff]  ;;  %v71_v29 = vld [vmem:[%s6266_s0 + $0xf0] sm:$0xff] }
  0x1a   :  { %379 = vmatprep.subr.bf16.mxu1 %v3313_v9  ;;  %v3716_v26 = vpack.c.bf16 %v70_v24, %v69_v23  ;;  %v72_v30 = vld [vmem:[%s6266_s0 + $0xf8] sm:$0xff]  ;;  %v76_v31 = vpack.c.bf16 %v48_v28, %v47_v27  ;;  %v49_v33 = vld [vmem:[%s6266_s0 + $0x40] sm:$0xff]  ;;  %v50_v34 = vld [vmem:[%s6266_s0 + $0x48] sm:$0xff] }
  0x1b   :  { %v3735_v32 = vpack.c.bf16 %v72_v30, %v71_v29  ;;  %v77_v35 = vpack.c.bf16 %v50_v34, %v49_v33  ;;  %v51_v36 = vld [vmem:[%s6266_s0 + $0x50] sm:$0xff]  ;;  %v52_v37 = vld [vmem:[%s6266_s0 + $0x58] sm:$0xff]  ;;  %v53_v39 = vld [vmem:[%s6266_s0 + $0x60] sm:$0xff] }
  0x1c   :  { %2894 = vmatmul.mubr.msk.bf16.vlgmr.msra.gmra.mrb[0].mxu0 %vm137_vm0, %v73_v10  ;;  %2906 = vmatmul.mubr.msk.bf16.vlgmr.msra.gmra.mrb[0].mxu1 %vm137_vm0, %v3669_v11  ;;  %v78_v38 = vpack.c.bf16 %v52_v37, %v51_v36  ;;  %v54_v40 = vld [vmem:[%s6266_s0 + $0x68] sm:$0xff]  ;;  %v55_v42 = vld [vmem:[%s6266_s0 + $0x70] sm:$0xff]  ;;  %v56_v43 = vld [vmem:[%s6266_s0 + $0x78] sm:$0xff] }
  0x1d   :  { %380 = vmatpush1.bf16.msra.mxu1 %v3311_v12  ;;  %228 = vmatprep.mubr.bf16.mxu0 %v3586_v0  ;;  %v79_v41 = vpack.c.bf16 %v54_v40, %v53_v39  ;;  %v80_v44 = vpack.c.bf16 %v56_v43, %v55_v42  ;;  %v57_v45 = vld [vmem:[%s6266_s0 + $0x80] sm:$0xff]  ;;  %v58_v46 = vld [vmem:[%s6266_s0 + $0x88] sm:$0xff]  ;;  %v59_v48 = vld [vmem:[%s6266_s0 + $0x90] sm:$0xff] }
  0x1e   :  { %348 = vmatprep.mubr.bf16.mxu1 %v3586_v0  ;;  %381 = vmatprep.subr.bf16.mxu1 %v3316_v13  ;;  %v81_v47 = vpack.c.bf16 %v58_v46, %v57_v45  ;;  %v60_v49 = vld [vmem:[%s6266_s0 + $0x98] sm:$0xff]  ;;  %v61_v51 = vld [vmem:[%s6266_s0 + $0xa0] sm:$0xff]  ;;  %v62_v52 = vld [vmem:[%s6266_s0 + $0xa8] sm:$0xff] }
  0x1f   :  { %v82_v50 = vpack.c.bf16 %v60_v49, %v59_v48  ;;  %v83_v53 = vpack.c.bf16 %v62_v52, %v61_v51  ;;  %v63_v54 = vld [vmem:[%s6266_s0 + $0xb0] sm:$0xff]  ;;  %v64_v55 = vld [vmem:[%s6266_s0 + $0xb8] sm:$0xff]  ;;  %v3317_v57 = vld [vmem:[%s6269_s3 + $0xc0] sm:$0xff]  }
  0x20   :  { %v84_v56 = vpack.c.bf16 %v64_v55, %v63_v54  ;;  %v3318_v58 = vld [vmem:[%s6269_s3 + $0x80] sm:$0xff]   ;;  %v3319_v59 = vld [vmem:[%s6269_s3 + $0xc8] sm:$0xff]   ;;  %v3322_v4 = vld [vmem:[%s6269_s3 + $0xd0] sm:$0xff]  }
  0x21   :  { %382 = vmatpush1.bf16.msra.mxu1 %v3314_v18  ;;  %v3321_v60 = vld [vmem:[%s6269_s3 + $0x40] sm:$0xff]   ;;  %v3324_v14 = vld [vmem:[%s6269_s3 + $0x90] sm:$0xff]   ;;  %v3325_v36 = vld [vmem:[%s6269_s3 + $0x48] sm:$0xff]  }
  0x22   :  { %3112 = vmatprep.subr.bf16.mxu1 %v3317_v57  ;;  %v3323_v61 = vld [vmem:[%s6269_s3] sm:$0xff]   ;;  %3000 = vmatprep.subr.bf16.mxu0 %v3321_v60  ;;  %v3327_v39 = vld [vmem:[%s6269_s3 + $0xd8] sm:$0xff]  }
  0x23   :  { %3001 = vmatpush3.bf16.msra.mxu0 %v3323_v61  ;;  %v3328_v40 = vld [vmem:[%s6269_s3 + $0x98] sm:$0xff]   ;;  %v3329_v61 = vld [vmem:[%s6269_s3 + $0x50] sm:$0xff]  }
  0x24   :  { %2895 = vmatmul.mubr.msk.bf16.gmra.mrb[4].mxu0 %vm137_vm0, %v74_v19  ;;  %2907 = vmatmul.mubr.msk.bf16.gmra.mrb[4].mxu1 %vm137_vm0, %v3697_v20 }
  0x25   :  { %238 = vmatprep.mubr.bf16.mxu0 %v3586_v0  ;;  %358 = vmatprep.mubr.bf16.mxu1 %v3586_v0 }
  0x26   :  { %3002 = vmatprep.subr.bf16.mxu0 %v3325_v36 }
  0x2c   :  { %2896 = vmatmul.mubr.msk.bf16.gmra.mrb[8].mxu0 %vm137_vm0, %v75_v25  ;;  %2908 = vmatmul.mubr.msk.bf16.gmra.mrb[8].mxu1 %vm137_vm0, %v3716_v26 }
  0x2d   :  { %248 = vmatprep.mubr.bf16.mxu0 %v3586_v0  ;;  %368 = vmatprep.mubr.bf16.mxu1 %v3586_v0 }
  0x34   :  { %2897 = vmatmul.mubr.msk.bf16.gmra.mrb[12].mxu0 %vm137_vm0, %v76_v31  ;;  %2909 = vmatmul.mubr.msk.bf16.gmra.mrb[12].mxu1 %vm137_vm0, %v3735_v32 }
  0x35   :  { %258 = vmatprep.mubr.bf16.mxu0 %v3586_v0  ;;  %411 = vmatprep.mubr.bf16.mxu1 %v3586_v0 }
  0x3c   :  { %2898 = vmatmul.mubr.msk.bf16.gmra.mrb[16].mxu0 %vm137_vm0, %v77_v35  ;;  %2910 = vmatmul.mubr.msk.bf16.vlgmr.msra.gmra.mrb[16].mxu1 %vm137_vm0, %v73_v10 }
  0x3d   :  { %268 = vmatprep.mubr.bf16.mxu0 %v3586_v0  ;;  %421 = vmatprep.mubr.bf16.mxu1 %v3586_v0 }
  0x3e   :  { %3113 = vmatpush3.bf16.msra.mxu1 %v3318_v58 }
  0x3f   :  { %3114 = vmatprep.subr.bf16.mxu1 %v3319_v59 }
  0x44   :  { %2899 = vmatmul.mubr.msk.bf16.gmra.mrb[20].mxu0 %vm137_vm0, %v78_v38  ;;  %2911 = vmatmul.mubr.msk.bf16.gmra.mrb[20].mxu1 %vm137_vm0, %v74_v19 }
  0x45   :  { %278 = vmatprep.mubr.bf16.mxu0 %v3586_v0  ;;  %431 = vmatprep.mubr.bf16.mxu1 %v3586_v0 }
  0x4c   :  { %2900 = vmatmul.mubr.msk.bf16.gmra.mrb[24].mxu0 %vm137_vm0, %v79_v41  ;;  %2912 = vmatmul.mubr.msk.bf16.gmra.mrb[24].mxu1 %vm137_vm0, %v75_v25 }
  0x4d   :  { %288 = vmatprep.mubr.bf16.mxu0 %v3586_v0  ;;  %441 = vmatprep.mubr.bf16.mxu1 %v3586_v0 }
  0x54   :  { %2901 = vmatmul.mubr.msk.bf16.gmra.mrb[28].mxu0 %vm137_vm0, %v80_v44  ;;  %2913 = vmatmul.mubr.msk.bf16.gmra.mrb[28].mxu1 %vm137_vm0, %v76_v31 }
  0x55   :  { %298 = vmatprep.mubr.bf16.mxu0 %v3586_v0  ;;  %451 = vmatprep.mubr.bf16.mxu1 %v3586_v0 }
  0x5c   :  { %2902 = vmatmul.mubr.msk.bf16.gmra.mrb[32].mxu0 %vm137_vm0, %v81_v47  ;;  %2914 = vmatmul.mubr.msk.bf16.gmra.mrb[32].mxu1 %vm137_vm0, %v77_v35 }
  0x5d   :  { %308 = vmatprep.mubr.bf16.mxu0 %v3586_v0  ;;  %461 = vmatprep.mubr.bf16.mxu1 %v3586_v0 }
  0x64   :  { %2903 = vmatmul.mubr.msk.bf16.gmra.mrb[36].mxu0 %vm137_vm0, %v82_v50  ;;  %2915 = vmatmul.mubr.msk.bf16.gmra.mrb[36].mxu1 %vm137_vm0, %v78_v38  ;;  %v3326_v38 = vld [vmem:[%s6269_s3 + $0x8] sm:$0xff]  }
  0x65   :  { %318 = vmatprep.mubr.bf16.mxu0 %v3586_v0  ;;  %471 = vmatprep.mubr.bf16.mxu1 %v3586_v0 }
  0x66   :  { %3003 = vmatpush3.bf16.msra.mxu0 %v3326_v38 }
  0x67   :  { %3004 = vmatprep.subr.bf16.mxu0 %v3329_v61 }
  0x6c   :  { %2904 = vmatmul.mubr.msk.bf16.gmra.mrb[40].mxu0 %vm137_vm0, %v83_v53  ;;  %2916 = vmatmul.mubr.msk.bf16.gmra.mrb[40].mxu1 %vm137_vm0, %v79_v41 }
  0x6d   :  { %328 = vmatprep.mubr.bf16.mxu0 %v3586_v0  ;;  %481 = vmatprep.mubr.bf16.mxu1 %v3586_v0 }
  0x74   :  { %2905 = vmatmul.mubr.msk.bf16.gmra.mrb[44].mxu0 %vm137_vm0, %v84_v56  ;;  %2917 = vmatmul.mubr.msk.bf16.gmra.mrb[44].mxu1 %vm137_vm0, %v80_v44 }
  0x75   :  { %491 = vmatprep.mubr.bf16.mxu1 %v3586_v0 }
  0x7c   :  { %2918 = vmatmul.mubr.msk.bf16.gmra.mrb[48].mxu1 %vm137_vm0, %v81_v47 }
  0x7d   :  { %501 = vmatprep.mubr.bf16.mxu1 %v3586_v0 }
  0x84   :  { %2919 = vmatmul.mubr.msk.bf16.gmra.mrb[52].mxu1 %vm137_vm0, %v82_v50 }
  0x85   :  { %511 = vmatprep.mubr.bf16.mxu1 %v3586_v0 }
  0x8c   :  { %2920 = vmatmul.mubr.msk.bf16.gmra.mrb[56].mxu1 %vm137_vm0, %v83_v53 }
  0x8d   :  { %521 = vmatprep.mubr.bf16.mxu1 %v3586_v0 }
  0x94   :  { %2921 = vmatmul.mubr.msk.bf16.gmra.mrb[60].mxu1 %vm137_vm0, %v84_v56 }
  0x95   :  { %531 = vmatprep.mubr.bf16.mxu1 %v3586_v0 }
  0x9c   :  { %2922 = vmatmul.mubr.msk.bf16.gmra.mrb[64].mxu1 %vm137_vm0, %v3669_v11 }
  0x9d   :  { %541 = vmatprep.mubr.bf16.mxu1 %v3586_v0 }
  0xa4   :  { %2923 = vmatmul.mubr.msk.bf16.gmra.mrb[68].mxu1 %vm137_vm0, %v3697_v20 }
  0xa5   :  { %551 = vmatprep.mubr.bf16.mxu1 %v3586_v0 }
  0xac   :  { %2924 = vmatmul.mubr.msk.bf16.gmra.mrb[72].mxu1 %vm137_vm0, %v3716_v26 }
  0xad   :  { %561 = vmatprep.mubr.bf16.mxu1 %v3586_v0  ;;  %v3320_v0 = vld [vmem:[%s6269_s3 + $0x88] sm:$0xff]  }
  0xae   :  { %3115 = vmatpush3.bf16.msra.mxu1 %v3320_v0  ;;  %v3330_v0 = vld [vmem:[%s6269_s3 + $0x10] sm:$0xff]  }
  0xaf   :  { %3116 = vmatprep.subr.bf16.mxu1 %v3322_v4  ;;  %3005 = vmatpush3.bf16.msra.mxu0 %v3330_v0 }
  0xb2   :  { %3117 = vmatpush3.bf16.msra.mxu1 %v3324_v14 }
  0xb3   :  { %3118 = vmatprep.subr.bf16.mxu1 %v3327_v39 }
  0xb4   :  { %2925 = vmatmul.mubr.msk.bf16.gmra.mrb[76].mxu1 %vm137_vm0, %v3735_v32 }
  0xb6   :  { %3119 = vmatpush3.bf16.msra.mxu1 %v3328_v40 }
  0xef   :  { %v3855_v62 = vpop.f32.mrb[0].mxu1  ;;  %v3857_v63 = vpop.f32.mrb[0].mxu0 }
  0xf0   :  { %6371 = vst [vmem:[#allocation5_spill] sm:$0xff] %v3855_v62  ;;  %v3862_v1 = vpop.f32.mrb[1].mxu1  ;;  %v724_v2 = vmul.f32 %v3857_v63, %v3857_v63  ;;  %v3866_v3 = vpop.f32.mrb[1].mxu0 }
  0xf1   :  { %6372 = vst [vmem:[#allocation6_spill] sm:$0xff] %v3862_v1  ;;  %v3871_v5 = vpop.f32.mrb[2].mxu1  ;;  %v725_v6 = vmul.f32 %v3866_v3, %v3866_v3  ;;  %v3875_v7 = vpop.f32.mrb[2].mxu0 }
  0xf2   :  { %6373 = vst [vmem:[#allocation7_spill] sm:$0xff] %v3871_v5  ;;  %v3877_v8 = vpop.f32.mrb[3].mxu1  ;;  %v572_v9 = vadd.f32 %v3875_v7, %v3857_v63  ;;  %v728_v10 = vmul.f32 %v3875_v7, %v3875_v7  ;;  %v3883_v11 = vpop.f32.mrb[3].mxu0 }
  0xf3   :  { %6374 = vst [vmem:[#allocation8_spill] sm:$0xff] %v3877_v8  ;;  %v609_v12 = vadd.f32 %v3883_v11, %v3866_v3  ;;  %v729_v13 = vmul.f32 %v3883_v11, %v3883_v11 }
  0xf4   :  { %v852_v15 = vadd.f32 %v728_v10, %v724_v2 }
  0xf5   :  { %v889_v16 = vadd.f32 %v729_v13, %v725_v6 }
  0xf7   :  { %v3892_v17 = vpop.f32.mrb[4].mxu1  ;;  %v3894_v18 = vpop.f32.mrb[4].mxu0 }
  0xf8   :  { %6375 = vst [vmem:[#allocation9_spill] sm:$0xff] %v3892_v17  ;;  %v3896_v19 = vpop.f32.mrb[5].mxu1  ;;  %v573_v20 = vadd.f32 %v572_v9, %v3894_v18  ;;  %v732_v21 = vmul.f32 %v3894_v18, %v3894_v18  ;;  %v3901_v22 = vpop.f32.mrb[5].mxu0 }
  0xf9   :  { %6376 = vst [vmem:[#allocation10_spill] sm:$0xff] %v3896_v19  ;;  %v3903_v23 = vpop.f32.mrb[6].mxu1  ;;  %v610_v24 = vadd.f32 %v609_v12, %v3901_v22  ;;  %v733_v25 = vmul.f32 %v3901_v22, %v3901_v22  ;;  %v3908_v26 = vpop.f32.mrb[6].mxu0 }
  0xfa   :  { %6377 = vst [vmem:[#allocation11_spill] sm:$0xff] %v3903_v23  ;;  %v3910_v27 = vpop.f32.mrb[7].mxu1  ;;  %v853_v28 = vadd.f32 %v852_v15, %v732_v21  ;;  %v574_v29 = vadd.f32 %v573_v20, %v3908_v26  ;;  %v736_v30 = vmul.f32 %v3908_v26, %v3908_v26  ;;  %v3915_v31 = vpop.f32.mrb[7].mxu0 }
  0xfb   :  { %6378 = vst [vmem:[#allocation12_spill] sm:$0xff] %v3910_v27  ;;  %v890_v32 = vadd.f32 %v889_v16, %v733_v25  ;;  %v611_v33 = vadd.f32 %v610_v24, %v3915_v31  ;;  %v737_v34 = vmul.f32 %v3915_v31, %v3915_v31 }
  0xfc   :  { %v854_v35 = vadd.f32 %v853_v28, %v736_v30 }
  0xfd   :  { %v891_v37 = vadd.f32 %v890_v32, %v737_v34 }
  0xff   :  { %v3932_v41 = vpop.f32.mrb[8].mxu1  ;;  %v3934_v42 = vpop.f32.mrb[8].mxu0 }
 0x100   :  { %6379 = vst [vmem:[#allocation13_spill] sm:$0xff] %v3932_v41  ;;  %6380 = vst [vmem:[#allocation14_spill] sm:$0xff] %v3934_v42  ;;  %v3936_v43 = vpop.f32.mrb[9].mxu1  ;;  %v575_v44 = vadd.f32 %v574_v29, %v3934_v42  ;;  %v740_v45 = vmul.f32 %v3934_v42, %v3934_v42  ;;  %v3941_v46 = vpop.f32.mrb[9].mxu0 }
 0x101   :  { %6381 = vst [vmem:[#allocation15_spill] sm:$0xff] %v3936_v43  ;;  %6382 = vst [vmem:[#allocation16_spill] sm:$0xff] %v3941_v46  ;;  %v3943_v47 = vpop.f32.mrb[10].mxu1  ;;  %v612_v48 = vadd.f32 %v611_v33, %v3941_v46  ;;  %v741_v49 = vmul.f32 %v3941_v46, %v3941_v46  ;;  %v3948_v50 = vpop.f32.mrb[10].mxu0 }
 0x102   :  { %6383 = vst [vmem:[#allocation17_spill] sm:$0xff] %v3943_v47  ;;  %6384 = vst [vmem:[#allocation18_spill] sm:$0xff] %v3948_v50  ;;  %v3950_v51 = vpop.f32.mrb[11].mxu1  ;;  %v855_v52 = vadd.f32 %v854_v35, %v740_v45  ;;  %v576_v53 = vadd.f32 %v575_v44, %v3948_v50  ;;  %v744_v54 = vmul.f32 %v3948_v50, %v3948_v50  ;;  %v3955_v55 = vpop.f32.mrb[11].mxu0 }
 0x103   :  { %6385 = vst [vmem:[#allocation19_spill] sm:$0xff] %v3950_v51  ;;  %6386 = vst [vmem:[#allocation20_spill] sm:$0xff] %v3955_v55  ;;  %v892_v56 = vadd.f32 %v891_v37, %v741_v49  ;;  %v613_v57 = vadd.f32 %v612_v48, %v3955_v55  ;;  %v745_v58 = vmul.f32 %v3955_v55, %v3955_v55 }
 0x104   :  { %v856_v59 = vadd.f32 %v855_v52, %v744_v54 }
 0x105   :  { %v893_v60 = vadd.f32 %v892_v56, %v745_v58 }
 0x107   :  { %v3966_v2 = vpop.f32.mrb[12].mxu1  ;;  %v3968_v4 = vpop.f32.mrb[12].mxu0 }
 0x108   :  { %6387 = vst [vmem:[#allocation21_spill] sm:$0xff] %v3966_v2  ;;  %6388 = vst [vmem:[#allocation22_spill] sm:$0xff] %v3968_v4  ;;  %v3970_v6 = vpop.f32.mrb[13].mxu1  ;;  %v577_v9 = vadd.f32 %v576_v53, %v3968_v4  ;;  %v748_v10 = vmul.f32 %v3968_v4, %v3968_v4  ;;  %v3975_v12 = vpop.f32.mrb[13].mxu0 }
 0x109   :  { %6389 = vst [vmem:[#allocation23_spill] sm:$0xff] %v3970_v6  ;;  %6390 = vst [vmem:[#allocation24_spill] sm:$0xff] %v3975_v12  ;;  %v3977_v13 = vpop.f32.mrb[14].mxu1  ;;  %v614_v14 = vadd.f32 %v613_v57, %v3975_v12  ;;  %v749_v15 = vmul.f32 %v3975_v12, %v3975_v12  ;;  %v3982_v16 = vpop.f32.mrb[14].mxu0 }
 0x10a   :  { %6391 = vst [vmem:[#allocation25_spill] sm:$0xff] %v3977_v13  ;;  %6392 = vst [vmem:[#allocation26_spill] sm:$0xff] %v3982_v16  ;;  %v3984_v20 = vpop.f32.mrb[15].mxu1  ;;  %v857_v21 = vadd.f32 %v856_v59, %v748_v10  ;;  %v578_v24 = vadd.f32 %v577_v9, %v3982_v16  ;;  %v752_v25 = vmul.f32 %v3982_v16, %v3982_v16  ;;  %v3989_v28 = vpop.f32.mrb[15].mxu0 }
 0x10b   :  { %6393 = vst [vmem:[#allocation27_spill] sm:$0xff] %v3984_v20  ;;  %6394 = vst [vmem:[#allocation28_spill] sm:$0xff] %v3989_v28  ;;  %v894_v29 = vadd.f32 %v893_v60, %v749_v15  ;;  %v615_v30 = vadd.f32 %v614_v14, %v3989_v28  ;;  %v753_v32 = vmul.f32 %v3989_v28, %v3989_v28 }
 0x10c   :  { %v858_v33 = vadd.f32 %v857_v21, %v752_v25 }
 0x10d   :  { %v895_v34 = vadd.f32 %v894_v29, %v753_v32 }
 0x10f   :  { %v3994_v35 = vpop.f32.mrb[16].mxu1  ;;  %v3996_v36 = vpop.f32.mrb[16].mxu0 }
 0x110   :  { %6395 = vst [vmem:[#allocation29_spill] sm:$0xff] %v3996_v36  ;;  %v3998_v37 = vpop.f32.mrb[17].mxu1  ;;  %v579_v38 = vadd.f32 %v578_v24, %v3996_v36  ;;  %v756_v39 = vmul.f32 %v3996_v36, %v3996_v36  ;;  %v4003_v40 = vpop.f32.mrb[17].mxu0  ;;  %v726_v44 = vmul.f32 %v3994_v35, %v3994_v35 }
 0x111   :  { %6396 = vst [vmem:[#allocation30_spill] sm:$0xff] %v4003_v40  ;;  %v727_v45 = vmul.f32 %v3998_v37, %v3998_v37  ;;  %v4009_v48 = vpop.f32.mrb[18].mxu1  ;;  %v616_v49 = vadd.f32 %v615_v30, %v4003_v40  ;;  %v757_v52 = vmul.f32 %v4003_v40, %v4003_v40  ;;  %v4014_v53 = vpop.f32.mrb[18].mxu0 }
 0x112   :  { %6397 = vst [vmem:[#allocation31_spill] sm:$0xff] %v4014_v53  ;;  %v646_v54 = vadd.f32 %v4009_v48, %v3994_v35  ;;  %v730_v56 = vmul.f32 %v4009_v48, %v4009_v48  ;;  %v4020_v57 = vpop.f32.mrb[19].mxu1  ;;  %v859_v58 = vadd.f32 %v858_v33, %v756_v39  ;;  %v580_v59 = vadd.f32 %v579_v38, %v4014_v53  ;;  %v4023_v60 = vpop.f32.mrb[19].mxu0 }
 0x113   :  { %6398 = vst [vmem:[#allocation32_spill] sm:$0xff] %v4023_v60  ;;  %v683_v61 = vadd.f32 %v4020_v57, %v3998_v37  ;;  %v731_v0 = vmul.f32 %v4020_v57, %v4020_v57  ;;  %v896_v9 = vadd.f32 %v895_v34, %v757_v52  ;;  %v760_v10 = vmul.f32 %v4014_v53, %v4014_v53 }
 0x114   :  { %v926_v14 = vadd.f32 %v730_v56, %v726_v44  ;;  %v617_v15 = vadd.f32 %v616_v49, %v4023_v60  ;;  %v761_v21 = vmul.f32 %v4023_v60, %v4023_v60 }
 0x115   :  { %v963_v24 = vadd.f32 %v731_v0, %v727_v45  ;;  %v860_v25 = vadd.f32 %v859_v58, %v760_v10 }
 0x116   :  { %v897_v29 = vadd.f32 %v896_v9, %v761_v21 }
 0x117   :  { %v4034_v30 = vpop.f32.mrb[20].mxu1  ;;  %v4036_v32 = vpop.f32.mrb[20].mxu0 }
 0x118   :  { %6399 = vst [vmem:[#allocation33_spill] sm:$0xff] %v4036_v32  ;;  %v647_v33 = vadd.f32 %v646_v54, %v4034_v30  ;;  %v734_v34 = vmul.f32 %v4034_v30, %v4034_v30  ;;  %v4041_v38 = vpop.f32.mrb[21].mxu1  ;;  %v581_v39 = vadd.f32 %v580_v59, %v4036_v32  ;;  %v764_v44 = vmul.f32 %v4036_v32, %v4036_v32  ;;  %v4046_v49 = vpop.f32.mrb[21].mxu0 }
 0x119   :  { %6400 = vst [vmem:[#allocation34_spill] sm:$0xff] %v4046_v49  ;;  %v684_v45 = vadd.f32 %v683_v61, %v4041_v38  ;;  %v735_v52 = vmul.f32 %v4041_v38, %v4041_v38  ;;  %v4051_v56 = vpop.f32.mrb[22].mxu1  ;;  %v618_v54 = vadd.f32 %v617_v15, %v4046_v49  ;;  %v765_v58 = vmul.f32 %v4046_v49, %v4046_v49  ;;  %v4056_v0 = vpop.f32.mrb[22].mxu0 }
 0x11a   :  { %6401 = vst [vmem:[#allocation35_spill] sm:$0xff] %v4056_v0  ;;  %v927_v59 = vadd.f32 %v926_v14, %v734_v34  ;;  %v648_v9 = vadd.f32 %v647_v33, %v4051_v56  ;;  %v738_v10 = vmul.f32 %v4051_v56, %v4051_v56  ;;  %v4061_v21 = vpop.f32.mrb[23].mxu1  ;;  %v861_v61 = vadd.f32 %v860_v25, %v764_v44  ;;  %v4063_v32 = vpop.f32.mrb[23].mxu0 }
 0x11b   :  { %6402 = vst [vmem:[#allocation36_spill] sm:$0xff] %v4061_v21  ;;  %6403 = vst [vmem:[#allocation37_spill] sm:$0xff] %v4063_v32  ;;  %v964_v60 = vadd.f32 %v963_v24, %v735_v52  ;;  %v685_v53 = vadd.f32 %v684_v45, %v4061_v21  ;;  %v739_v15 = vmul.f32 %v4061_v21, %v4061_v21 }
 0x11c   :  { %v898_v49 = vadd.f32 %v897_v29, %v765_v58  ;;  %v928_v40 = vadd.f32 %v927_v59, %v738_v10  ;;  %v582_v14 = vadd.f32 %v581_v39, %v4056_v0  ;;  %v768_v33 = vmul.f32 %v4056_v0, %v4056_v0 }
 0x11d   :  { %v619_v34 = vadd.f32 %v618_v54, %v4063_v32  ;;  %v965_v36 = vadd.f32 %v964_v60, %v739_v15  ;;  %v769_v25 = vmul.f32 %v4063_v32, %v4063_v32 }
 0x11e   :  { %v862_v44 = vadd.f32 %v861_v61, %v768_v33 }
 0x11f   :  { %v4074_v24 = vpop.f32.mrb[24].mxu1  ;;  %v899_v45 = vadd.f32 %v898_v49, %v769_v25  ;;  %v4076_v52 = vpop.f32.mrb[24].mxu0 }
 0x120   :  { %6404 = vst [vmem:[#allocation38_spill] sm:$0xff] %v4074_v24  ;;  %6405 = vst [vmem:[#allocation39_spill] sm:$0xff] %v4076_v52  ;;  %v649_v29 = vadd.f32 %v648_v9, %v4074_v24  ;;  %v742_v39 = vmul.f32 %v4074_v24, %v4074_v24  ;;  %v4081_v58 = vpop.f32.mrb[25].mxu1  ;;  %v583_v59 = vadd.f32 %v582_v14, %v4076_v52  ;;  %v4086_v54 = vpop.f32.mrb[25].mxu0 }
 0x121   :  { %6406 = vst [vmem:[#allocation40_spill] sm:$0xff] %v4081_v58  ;;  %v772_v60 = vmul.f32 %v4076_v52, %v4076_v52  ;;  %6407 = vst [vmem:[#allocation41_spill] sm:$0xff] %v4086_v54  ;;  %v686_v10 = vadd.f32 %v685_v53, %v4081_v58  ;;  %v743_v49 = vmul.f32 %v4081_v58, %v4081_v58  ;;  %v4091_v61 = vpop.f32.mrb[26].mxu1  ;;  %v4096_v33 = vpop.f32.mrb[26].mxu0 }
 0x122   :  { %6408 = vst [vmem:[#allocation42_spill] sm:$0xff] %v4091_v61  ;;  %v620_v9 = vadd.f32 %v619_v34, %v4086_v54  ;;  %v773_v15 = vmul.f32 %v4086_v54, %v4086_v54  ;;  %6409 = vst [vmem:[#allocation43_spill] sm:$0xff] %v4096_v33  ;;  %v929_v14 = vadd.f32 %v928_v40, %v742_v39  ;;  %v4101_v32 = vpop.f32.mrb[27].mxu1  ;;  %v4103_v0 = vpop.f32.mrb[27].mxu0 }
 0x123   :  { %v650_v25 = vadd.f32 %v649_v29, %v4091_v61  ;;  %v746_v52 = vmul.f32 %v4091_v61, %v4091_v61  ;;  %6410 = vst [vmem:[#allocation44_spill] sm:$0xff] %v4101_v32  ;;  %v863_v53 = vadd.f32 %v862_v44, %v772_v60  ;;  %6411 = vst [vmem:[#allocation45_spill] sm:$0xff] %v4103_v0 }
 0x124   :  { %v966_v28 = vadd.f32 %v965_v36, %v743_v49  ;;  %v687_v16 = vadd.f32 %v686_v10, %v4101_v32  ;;  %v747_v34 = vmul.f32 %v4101_v32, %v4101_v32  ;;  %v900_v54 = vadd.f32 %v899_v45, %v773_v15 }
 0x125   :  { %v930_v12 = vadd.f32 %v929_v14, %v746_v52  ;;  %v584_v40 = vadd.f32 %v583_v59, %v4096_v33  ;;  %v776_v29 = vmul.f32 %v4096_v33, %v4096_v33  ;;  %v621_v39 = vadd.f32 %v620_v9, %v4103_v0 }
 0x126   :  { %v967_v4 = vadd.f32 %v966_v28, %v747_v34  ;;  %v777_v44 = vmul.f32 %v4103_v0, %v4103_v0 }
 0x127   :  { %v864_v60 = vadd.f32 %v863_v53, %v776_v29  ;;  %v4114_v36 = vpop.f32.mrb[28].mxu1  ;;  %v4116_v49 = vpop.f32.mrb[28].mxu0 }
 0x128   :  { %6412 = vst [vmem:[#allocation46_spill] sm:$0xff] %v4114_v36  ;;  %v901_v10 = vadd.f32 %v900_v54, %v777_v44  ;;  %6413 = vst [vmem:[#allocation47_spill] sm:$0xff] %v4116_v49  ;;  %v651_v45 = vadd.f32 %v650_v25, %v4114_v36  ;;  %v750_v52 = vmul.f32 %v4114_v36, %v4114_v36  ;;  %v4121_v59 = vpop.f32.mrb[29].mxu1  ;;  %v4126_v9 = vpop.f32.mrb[29].mxu0 }
 0x129   :  { %6414 = vst [vmem:[#allocation48_spill] sm:$0xff] %v4121_v59  ;;  %v585_v15 = vadd.f32 %v584_v40, %v4116_v49  ;;  %v780_v28 = vmul.f32 %v4116_v49, %v4116_v49  ;;  %6415 = vst [vmem:[#allocation49_spill] sm:$0xff] %v4126_v9  ;;  %v688_v14 = vadd.f32 %v687_v16, %v4121_v59  ;;  %v4131_v53 = vpop.f32.mrb[30].mxu1  ;;  %v4136_v29 = vpop.f32.mrb[30].mxu0 }
 0x12a   :  { %v751_v54 = vmul.f32 %v4121_v59, %v4121_v59  ;;  %6416 = vst [vmem:[#allocation50_spill] sm:$0xff] %v4131_v53  ;;  %v622_v25 = vadd.f32 %v621_v39, %v4126_v9  ;;  %v781_v34 = vmul.f32 %v4126_v9, %v4126_v9  ;;  %6417 = vst [vmem:[#allocation51_spill] sm:$0xff] %v4136_v29  ;;  %v4141_v0 = vpop.f32.mrb[31].mxu1  ;;  %v4143_v33 = vpop.f32.mrb[31].mxu0 }
 0x12b   :  { %v931_v40 = vadd.f32 %v930_v12, %v750_v52  ;;  %v652_v44 = vadd.f32 %v651_v45, %v4131_v53  ;;  %v754_v49 = vmul.f32 %v4131_v53, %v4131_v53  ;;  %6418 = vst [vmem:[#allocation52_spill] sm:$0xff] %v4141_v0  ;;  %v865_v16 = vadd.f32 %v864_v60, %v780_v28 }
 0x12c   :  { %6419 = vst [vmem:[#allocation53_spill] sm:$0xff] %v4143_v33  ;;  %v968_v59 = vadd.f32 %v967_v4, %v751_v54  ;;  %v689_v36 = vadd.f32 %v688_v14, %v4141_v0  ;;  %v755_v39 = vmul.f32 %v4141_v0, %v4141_v0  ;;  %v902_v9 = vadd.f32 %v901_v10, %v781_v34 }
 0x12d   :  { %v932_v32 = vadd.f32 %v931_v40, %v754_v49  ;;  %v586_v12 = vadd.f32 %v585_v15, %v4136_v29  ;;  %v784_v45 = vmul.f32 %v4136_v29, %v4136_v29  ;;  %v623_v52 = vadd.f32 %v622_v25, %v4143_v33 }
 0x12e   :  { %v969_v53 = vadd.f32 %v968_v59, %v755_v39  ;;  %v785_v60 = vmul.f32 %v4143_v33, %v4143_v33 }
 0x12f   :  { %v866_v28 = vadd.f32 %v865_v16, %v784_v45  ;;  %v4154_v4 = vpop.f32.mrb[32].mxu1  ;;  %v4156_v54 = vpop.f32.mrb[32].mxu0 }
 0x130   :  { %6420 = vst [vmem:[#allocation54_spill] sm:$0xff] %v4154_v4  ;;  %v903_v14 = vadd.f32 %v902_v9, %v785_v60  ;;  %6421 = vst [vmem:[#allocation55_spill] sm:$0xff] %v4156_v54  ;;  %v653_v10 = vadd.f32 %v652_v44, %v4154_v4  ;;  %v758_v49 = vmul.f32 %v4154_v4, %v4154_v4  ;;  %v4161_v15 = vpop.f32.mrb[33].mxu1  ;;  %v4166_v25 = vpop.f32.mrb[33].mxu0 }
 0x131   :  { %6422 = vst [vmem:[#allocation56_spill] sm:$0xff] %v4161_v15  ;;  %v587_v34 = vadd.f32 %v586_v12, %v4156_v54  ;;  %v788_v59 = vmul.f32 %v4156_v54, %v4156_v54  ;;  %6423 = vst [vmem:[#allocation57_spill] sm:$0xff] %v4166_v25  ;;  %v690_v40 = vadd.f32 %v689_v36, %v4161_v15  ;;  %v4171_v16 = vpop.f32.mrb[34].mxu1  ;;  %v4176_v45 = vpop.f32.mrb[34].mxu0 }
 0x132   :  { %v759_v9 = vmul.f32 %v4161_v15, %v4161_v15  ;;  %6424 = vst [vmem:[#allocation58_spill] sm:$0xff] %v4171_v16  ;;  %v624_v44 = vadd.f32 %v623_v52, %v4166_v25  ;;  %v789_v39 = vmul.f32 %v4166_v25, %v4166_v25  ;;  %6425 = vst [vmem:[#allocation59_spill] sm:$0xff] %v4176_v45  ;;  %v4181_v33 = vpop.f32.mrb[35].mxu1  ;;  %v4183_v29 = vpop.f32.mrb[35].mxu0 }
 0x133   :  { %v933_v12 = vadd.f32 %v932_v32, %v758_v49  ;;  %v654_v60 = vadd.f32 %v653_v10, %v4171_v16  ;;  %v762_v54 = vmul.f32 %v4171_v16, %v4171_v16  ;;  %6426 = vst [vmem:[#allocation60_spill] sm:$0xff] %v4181_v33  ;;  %v867_v36 = vadd.f32 %v866_v28, %v788_v59 }
 0x134   :  { %6427 = vst [vmem:[#allocation61_spill] sm:$0xff] %v4183_v29  ;;  %v970_v15 = vadd.f32 %v969_v53, %v759_v9  ;;  %v691_v4 = vadd.f32 %v690_v40, %v4181_v33  ;;  %v763_v52 = vmul.f32 %v4181_v33, %v4181_v33  ;;  %v904_v25 = vadd.f32 %v903_v14, %v789_v39 }
 0x135   :  { %v934_v0 = vadd.f32 %v933_v12, %v762_v54  ;;  %v588_v32 = vadd.f32 %v587_v34, %v4176_v45  ;;  %v792_v10 = vmul.f32 %v4176_v45, %v4176_v45  ;;  %v625_v49 = vadd.f32 %v624_v44, %v4183_v29 }
 0x136   :  { %v971_v16 = vadd.f32 %v970_v15, %v763_v52  ;;  %v793_v28 = vmul.f32 %v4183_v29, %v4183_v29 }
 0x137   :  { %v868_v59 = vadd.f32 %v867_v36, %v792_v10  ;;  %v4194_v53 = vpop.f32.mrb[36].mxu1  ;;  %v4196_v9 = vpop.f32.mrb[36].mxu0 }
 0x138   :  { %6428 = vst [vmem:[#allocation62_spill] sm:$0xff] %v4194_v53  ;;  %v905_v40 = vadd.f32 %v904_v25, %v793_v28  ;;  %6429 = vst [vmem:[#allocation63_spill] sm:$0xff] %v4196_v9  ;;  %v655_v14 = vadd.f32 %v654_v60, %v4194_v53  ;;  %v766_v54 = vmul.f32 %v4194_v53, %v4194_v53  ;;  %v4201_v34 = vpop.f32.mrb[37].mxu1  ;;  %v4206_v44 = vpop.f32.mrb[37].mxu0 }
 0x139   :  { %6430 = vst [vmem:[#allocation64_spill] sm:$0xff] %v4201_v34  ;;  %v589_v39 = vadd.f32 %v588_v32, %v4196_v9  ;;  %v796_v15 = vmul.f32 %v4196_v9, %v4196_v9  ;;  %6431 = vst [vmem:[#allocation65_spill] sm:$0xff] %v4206_v44  ;;  %v692_v12 = vadd.f32 %v691_v4, %v4201_v34  ;;  %v4211_v36 = vpop.f32.mrb[38].mxu1  ;;  %v4216_v10 = vpop.f32.mrb[38].mxu0 }
 0x13a   :  { %v767_v25 = vmul.f32 %v4201_v34, %v4201_v34  ;;  %6432 = vst [vmem:[#allocation66_spill] sm:$0xff] %v4211_v36  ;;  %v626_v60 = vadd.f32 %v625_v49, %v4206_v44  ;;  %v797_v52 = vmul.f32 %v4206_v44, %v4206_v44  ;;  %6433 = vst [vmem:[#allocation67_spill] sm:$0xff] %v4216_v10  ;;  %v4221_v29 = vpop.f32.mrb[39].mxu1  ;;  %v4223_v45 = vpop.f32.mrb[39].mxu0 }
 0x13b   :  { %v935_v32 = vadd.f32 %v934_v0, %v766_v54  ;;  %v656_v28 = vadd.f32 %v655_v14, %v4211_v36  ;;  %v770_v9 = vmul.f32 %v4211_v36, %v4211_v36  ;;  %6434 = vst [vmem:[#allocation68_spill] sm:$0xff] %v4221_v29  ;;  %v869_v4 = vadd.f32 %v868_v59, %v796_v15 }
 0x13c   :  { %6435 = vst [vmem:[#allocation69_spill] sm:$0xff] %v4223_v45  ;;  %v972_v34 = vadd.f32 %v971_v16, %v767_v25  ;;  %v693_v53 = vadd.f32 %v692_v12, %v4221_v29  ;;  %v771_v49 = vmul.f32 %v4221_v29, %v4221_v29  ;;  %v906_v44 = vadd.f32 %v905_v40, %v797_v52 }
 0x13d   :  { %v936_v33 = vadd.f32 %v935_v32, %v770_v9  ;;  %v590_v0 = vadd.f32 %v589_v39, %v4216_v10  ;;  %v800_v14 = vmul.f32 %v4216_v10, %v4216_v10  ;;  %v627_v54 = vadd.f32 %v626_v60, %v4223_v45 }
 0x13e   :  { %v973_v36 = vadd.f32 %v972_v34, %v771_v49  ;;  %v801_v59 = vmul.f32 %v4223_v45, %v4223_v45 }
 0x13f   :  { %v870_v15 = vadd.f32 %v869_v4, %v800_v14  ;;  %v4234_v16 = vpop.f32.mrb[40].mxu1  ;;  %v4236_v25 = vpop.f32.mrb[40].mxu0 }
 0x140   :  { %6436 = vst [vmem:[#allocation70_spill] sm:$0xff] %v4234_v16  ;;  %v907_v12 = vadd.f32 %v906_v44, %v801_v59  ;;  %6437 = vst [vmem:[#allocation71_spill] sm:$0xff] %v4236_v25  ;;  %v657_v40 = vadd.f32 %v656_v28, %v4234_v16  ;;  %v774_v9 = vmul.f32 %v4234_v16, %v4234_v16  ;;  %v4241_v39 = vpop.f32.mrb[41].mxu1  ;;  %v4246_v60 = vpop.f32.mrb[41].mxu0 }
 0x141   :  { %6438 = vst [vmem:[#allocation72_spill] sm:$0xff] %v4241_v39  ;;  %v591_v52 = vadd.f32 %v590_v0, %v4236_v25  ;;  %v804_v34 = vmul.f32 %v4236_v25, %v4236_v25  ;;  %6439 = vst [vmem:[#allocation73_spill] sm:$0xff] %v4246_v60  ;;  %v694_v32 = vadd.f32 %v693_v53, %v4241_v39  ;;  %v4251_v4 = vpop.f32.mrb[42].mxu1  ;;  %v4256_v14 = vpop.f32.mrb[42].mxu0 }
 0x142   :  { %v775_v44 = vmul.f32 %v4241_v39, %v4241_v39  ;;  %6440 = vst [vmem:[#allocation74_spill] sm:$0xff] %v4251_v4  ;;  %v628_v28 = vadd.f32 %v627_v54, %v4246_v60  ;;  %v805_v49 = vmul.f32 %v4246_v60, %v4246_v60  ;;  %6441 = vst [vmem:[#allocation75_spill] sm:$0xff] %v4256_v14  ;;  %v4261_v45 = vpop.f32.mrb[43].mxu1  ;;  %v4263_v10 = vpop.f32.mrb[43].mxu0 }
 0x143   :  { %v937_v0 = vadd.f32 %v936_v33, %v774_v9  ;;  %v658_v59 = vadd.f32 %v657_v40, %v4251_v4  ;;  %v778_v25 = vmul.f32 %v4251_v4, %v4251_v4  ;;  %6442 = vst [vmem:[#allocation76_spill] sm:$0xff] %v4261_v45  ;;  %v871_v53 = vadd.f32 %v870_v15, %v804_v34 }
 0x144   :  { %6443 = vst [vmem:[#allocation77_spill] sm:$0xff] %v4263_v10  ;;  %v974_v39 = vadd.f32 %v973_v36, %v775_v44  ;;  %v695_v16 = vadd.f32 %v694_v32, %v4261_v45  ;;  %v779_v54 = vmul.f32 %v4261_v45, %v4261_v45  ;;  %v908_v60 = vadd.f32 %v907_v12, %v805_v49 }
 0x145   :  { %v938_v29 = vadd.f32 %v937_v0, %v778_v25  ;;  %v592_v33 = vadd.f32 %v591_v52, %v4256_v14  ;;  %v808_v40 = vmul.f32 %v4256_v14, %v4256_v14  ;;  %v629_v9 = vadd.f32 %v628_v28, %v4263_v10 }
 0x146   :  { %v820_v15 = vmul.f32 %v3855_v62, %v3855_v62  ;;  %v821_v36 = vmul.f32 %v3862_v1, %v3862_v1  ;;  %v975_v34 = vadd.f32 %v974_v39, %v779_v54  ;;  %v809_v32 = vmul.f32 %v4263_v10, %v4263_v10 }
 0x147   :  { %v824_v12 = vmul.f32 %v3871_v5, %v3871_v5  ;;  %v825_v25 = vmul.f32 %v3877_v8, %v3877_v8  ;;  %v828_v52 = vmul.f32 %v3892_v17, %v3892_v17  ;;  %v872_v44 = vadd.f32 %v871_v53, %v808_v40  ;;  %v4296_v54 = vpop.f32.mrb[44].mxu0  ;;  %v4298_v10 = vpop.f32.mrb[44].mxu1 }
 0x148   :  { %v4286_v28 = vmul.f32 %v3896_v19, %v3896_v19  ;;  %v4290_v39 = vmul.f32 %v3903_v23, %v3903_v23  ;;  %v4294_v49 = vmul.f32 %v3910_v27, %v3910_v27  ;;  %v909_v0 = vadd.f32 %v908_v60, %v809_v32  ;;  %6444 = vst [vmem:[#allocation78_spill] sm:$0xff] %v4296_v54  ;;  %v4306_v4 = vpop.f32.mrb[45].mxu0  ;;  %v4308_v61 = vpop.f32.mrb[45].mxu1 }
 0x149   :  { %6445 = vst [vmem:[#allocation79_spill] sm:$0xff] %v4298_v10  ;;  %v593_v14 = vadd.f32 %v592_v33, %v4296_v54  ;;  %v812_v53 = vmul.f32 %v4296_v54, %v4296_v54  ;;  %v659_v40 = vadd.f32 %v658_v59, %v4298_v10  ;;  %v782_v45 = vmul.f32 %v4298_v10, %v4298_v10  ;;  %v4316_v54 = vpop.f32.mrb[46].mxu0  ;;  %v4318_v59 = vpop.f32.mrb[46].mxu1 }
 0x14a   :  { %6446 = vst [vmem:[#allocation80_spill] sm:$0xff] %v4306_v4  ;;  %6447 = vst [vmem:[#allocation81_spill] sm:$0xff] %v4308_v61  ;;  %v630_v60 = vadd.f32 %v629_v9, %v4306_v4  ;;  %v813_v32 = vmul.f32 %v4306_v4, %v4306_v4  ;;  %v696_v55 = vadd.f32 %v695_v16, %v4308_v61  ;;  %v4323_v9 = vpop.f32.mrb[47].mxu0  ;;  %v4325_v46 = vpop.f32.mrb[47].mxu1 }
 0x14b   :  { %v783_v33 = vmul.f32 %v4308_v61, %v4308_v61  ;;  %v873_v50 = vadd.f32 %v872_v44, %v812_v53  ;;  %v939_v10 = vadd.f32 %v938_v29, %v782_v45  ;;  %v594_v58 = vadd.f32 %v593_v14, %v4316_v54  ;;  %6448 = vst [vmem:[#allocation82_spill] sm:$0xff] %v4323_v9 }
 0x14c   :  { %v816_v24 = vmul.f32 %v4316_v54, %v4316_v54  ;;  %v910_v4 = vadd.f32 %v909_v0, %v813_v32  ;;  %v660_v42 = vadd.f32 %v659_v40, %v4318_v59  ;;  %v786_v61 = vmul.f32 %v4318_v59, %v4318_v59 }
 0x14d   :  { %v976_v16 = vadd.f32 %v975_v34, %v783_v33  ;;  %v595_v21 = vadd.f32 %v594_v58, %v3855_v62  ;;  %v631_v29 = vadd.f32 %v630_v60, %v4323_v9  ;;  %v817_v45 = vmul.f32 %v4323_v9, %v4323_v9 }
 0x14e   :  { %v874_v44 = vadd.f32 %v873_v50, %v816_v24  ;;  %v836_v14 = vmul.f32 %v3932_v41, %v3932_v41  ;;  %v940_v53 = vadd.f32 %v939_v10, %v786_v61  ;;  %v697_v0 = vadd.f32 %v696_v55, %v4325_v46 }
 0x14f   :  { %v787_v34 = vmul.f32 %v4325_v46, %v4325_v46  ;;  %v596_v40 = vadd.f32 %v595_v21, %v3871_v5  ;;  %v632_v58 = vadd.f32 %v631_v29, %v3862_v1  ;;  %v911_v50 = vadd.f32 %v910_v4, %v817_v45  ;;  %v4347_v55 = vpop.f32.mrb[48].mxu1 }
 0x150   :  { %v875_v32 = vadd.f32 %v874_v44, %v820_v15  ;;  %v837_v24 = vmul.f32 %v3936_v43, %v3936_v43  ;;  %v840_v60 = vmul.f32 %v3943_v47, %v3943_v47  ;;  %v841_v61 = vmul.f32 %v3950_v51, %v3950_v51  ;;  %v4351_v44 = vpop.f32.mrb[49].mxu1 }
 0x151   :  { %v977_v10 = vadd.f32 %v976_v16, %v787_v34  ;;  %v597_v33 = vadd.f32 %v596_v40, %v3892_v17  ;;  %v633_v21 = vadd.f32 %v632_v58, %v3877_v8  ;;  %v912_v15 = vadd.f32 %v911_v50, %v821_v36  ;;  %v4359_v34 = vpop.f32.mrb[50].mxu1 }
 0x152   :  { %v876_v62 = vadd.f32 %v875_v32, %v824_v12  ;;  %v661_v4 = vadd.f32 %v660_v42, %v4347_v55  ;;  %v790_v29 = vmul.f32 %v4347_v55, %v4347_v55  ;;  %v698_v45 = vadd.f32 %v697_v0, %v4351_v44  ;;  %v4363_v58 = vpop.f32.mrb[51].mxu1 }
 0x153   :  { %v791_v16 = vmul.f32 %v4351_v44, %v4351_v44  ;;  %v598_v40 = vadd.f32 %v597_v33, %v3903_v23  ;;  %v634_v32 = vadd.f32 %v633_v21, %v3896_v19  ;;  %v913_v36 = vadd.f32 %v912_v15, %v825_v25 }
 0x154   :  { %v877_v12 = vadd.f32 %v876_v62, %v828_v52  ;;  %v941_v50 = vadd.f32 %v940_v53, %v790_v29  ;;  %v662_v17 = vadd.f32 %v661_v4, %v4359_v34  ;;  %v794_v0 = vmul.f32 %v4359_v34, %v4359_v34 }
 0x155   :  { %v978_v42 = vadd.f32 %v977_v10, %v791_v16  ;;  %v599_v8 = vadd.f32 %v598_v40, %v3932_v41  ;;  %v635_v1 = vadd.f32 %v634_v32, %v3910_v27  ;;  %v914_v62 = vadd.f32 %v913_v36, %v4286_v28 }
 0x156   :  { %v878_v5 = vadd.f32 %v877_v12, %v4290_v39  ;;  %v844_v25 = vmul.f32 %v3966_v2, %v3966_v2  ;;  %v942_v52 = vadd.f32 %v941_v50, %v794_v0  ;;  %v699_v53 = vadd.f32 %v698_v45, %v4363_v58 }
 0x157   :  { %v795_v10 = vmul.f32 %v4363_v58, %v4363_v58  ;;  %v600_v33 = vadd.f32 %v599_v8, %v3943_v47  ;;  %v636_v15 = vadd.f32 %v635_v1, %v3936_v43  ;;  %v915_v39 = vadd.f32 %v914_v62, %v4294_v49  ;;  %v4386_v16 = vpop.f32.mrb[52].mxu1 }
 0x158   :  { %v879_v21 = vadd.f32 %v878_v5, %v836_v14  ;;  %v845_v4 = vmul.f32 %v3970_v6, %v3970_v6  ;;  %v848_v28 = vmul.f32 %v3977_v13, %v3977_v13  ;;  %v849_v29 = vmul.f32 %v3984_v20, %v3984_v20  ;;  %v4390_v14 = vpop.f32.mrb[53].mxu1 }
 0x159   :  { %v979_v45 = vadd.f32 %v978_v42, %v795_v10  ;;  %v601_v40 = vadd.f32 %v600_v33, %v3966_v2  ;;  %v637_v5 = vadd.f32 %v636_v15, %v3950_v51  ;;  %v916_v1 = vadd.f32 %v915_v39, %v837_v24  ;;  %v4398_v50 = vpop.f32.mrb[54].mxu1 }
 0x15a   :  { %v880_v8 = vadd.f32 %v879_v21, %v840_v60  ;;  %v663_v49 = vadd.f32 %v662_v17, %v4386_v16  ;;  %v798_v12 = vmul.f32 %v4386_v16, %v4386_v16  ;;  %v700_v32 = vadd.f32 %v699_v53, %v4390_v14  ;;  %v4402_v62 = vpop.f32.mrb[55].mxu1  ;;  %v3331_v21 = vld [vmem:[%s6269_s3 + $0xe0] sm:$0xff]  }
 0x15b   :  { %v799_v36 = vmul.f32 %v4390_v14, %v4390_v14  ;;  %v602_v42 = vadd.f32 %v601_v40, %v3977_v13  ;;  %v638_v0 = vadd.f32 %v637_v5, %v3970_v6  ;;  %v917_v24 = vadd.f32 %v916_v1, %v841_v61  ;;  %3120 = vmatprep.subr.bf16.mxu1 %v3331_v21 }
 0x15c   :  { %v881_v60 = vadd.f32 %v880_v8, %v844_v25  ;;  %v943_v10 = vadd.f32 %v942_v52, %v798_v12  ;;  %v664_v33 = vadd.f32 %v663_v49, %v4398_v50  ;;  %v802_v53 = vmul.f32 %v4398_v50, %v4398_v50 }
 0x15d   :  { %v980_v17 = vadd.f32 %v979_v45, %v799_v36  ;;  %v603_v15 = vrot.slane %v602_v42, 4  ;;  %v639_v25 = vadd.f32 %v638_v0, %v3984_v20  ;;  %v918_v40 = vadd.f32 %v917_v24, %v845_v4 }
 0x15e   :  { %v882_v39 = vadd.f32 %v881_v60, %v848_v28  ;;  %v944_v8 = vadd.f32 %v943_v10, %v802_v53  ;;  %v701_v61 = vadd.f32 %v700_v32, %v4402_v62  ;;  %v803_v52 = vmul.f32 %v4402_v62, %v4402_v62 }
 0x15f   :  { %v604_v45 = vadd.f32 %v603_v15, %v602_v42  ;;  %v640_v1 = vrot.slane %v639_v25, 4  ;;  %v919_v49 = vadd.f32 %v918_v40, %v849_v29  ;;  %v4414_v36 = vpop.f32.mrb[56].mxu1 }
 0x160   :  { %v883_v5 = vrot.slane %v882_v39, 4  ;;  %v981_v12 = vadd.f32 %v980_v17, %v803_v52  ;;  %v4416_v0 = vpop.f32.mrb[57].mxu1  ;;  %v665_v4 = vadd.f32 %v664_v33, %v4414_v36  ;;  %v806_v32 = vmul.f32 %v4414_v36, %v4414_v36 }
 0x161   :  { %v605_v13 = vrot.slane %v604_v45, 2  ;;  %v641_v28 = vadd.f32 %v640_v1, %v639_v25  ;;  %v920_v60 = vrot.slane %v919_v49, 4  ;;  %v702_v24 = vadd.f32 %v701_v61, %v4416_v0  ;;  %v4424_v29 = vpop.f32.mrb[58].mxu1 }
 0x162   :  { %v884_v6 = vadd.f32 %v883_v5, %v882_v39  ;;  %v807_v42 = vmul.f32 %v4416_v0, %v4416_v0  ;;  %v4426_v15 = vpop.f32.mrb[59].mxu1  ;;  %v945_v39 = vadd.f32 %v944_v8, %v806_v32  ;;  %v666_v33 = vadd.f32 %v665_v4, %v4424_v29 }
 0x163   :  { %v606_v10 = vadd.f32 %v605_v13, %v604_v45  ;;  %v642_v53 = vrot.slane %v641_v28, 2  ;;  %v921_v21 = vadd.f32 %v920_v60, %v919_v49  ;;  %v810_v40 = vmul.f32 %v4424_v29, %v4424_v29 }
 0x164   :  { %v885_v17 = vrot.slane %v884_v6, 2  ;;  %v982_v25 = vadd.f32 %v981_v12, %v807_v42  ;;  %v703_v2 = vadd.f32 %v702_v24, %v4426_v15  ;;  %v811_v13 = vmul.f32 %v4426_v15, %v4426_v15 }
 0x165   :  { %v607_v52 = vrot.slane %v606_v10, 1  ;;  %v643_v5 = vadd.f32 %v642_v53, %v641_v28  ;;  %v922_v1 = vrot.slane %v921_v21, 2  ;;  %v946_v20 = vadd.f32 %v945_v39, %v810_v40 }
 0x166   :  { %v886_v61 = vadd.f32 %v885_v17, %v884_v6  ;;  %v983_v12 = vadd.f32 %v982_v25, %v811_v13 }
 0x167   :  { %v608_v45 = vadd.f32 %v607_v52, %v606_v10  ;;  %v644_v60 = vrot.slane %v643_v5, 1  ;;  %v923_v8 = vadd.f32 %v922_v1, %v921_v21  ;;  %v4434_v32 = vpop.f32.mrb[60].mxu1 }
 0x168   :  { %v887_v49 = vrot.slane %v886_v61, 1  ;;  %v667_v6 = vadd.f32 %v666_v33, %v4434_v32  ;;  %v4437_v28 = vpop.f32.mrb[61].mxu1  ;;  %v814_v24 = vmul.f32 %v4434_v32, %v4434_v32 }
 0x169   :  { %v645_v42 = vadd.f32 %v644_v60, %v643_v5  ;;  %v924_v51 = vrot.slane %v923_v8, 1  ;;  %v704_v17 = vadd.f32 %v703_v2, %v4437_v28  ;;  %v815_v10 = vmul.f32 %v4437_v28, %v4437_v28  ;;  %v4444_v53 = vpop.f32.mrb[62].mxu1 }
 0x16a   :  { %v888_v4 = vadd.f32 %v887_v49, %v886_v61  ;;  %6449 = vst [vmem:[#allocation83_spill] sm:$0xff] %v4444_v53  ;;  %v4446_v21 = vmul.f32 0.00390625, %v608_v45  ;;  %v668_v40 = vadd.f32 %v667_v6, %v4444_v53  ;;  %v818_v33 = vmul.f32 %v4444_v53, %v4444_v53  ;;  %v4451_v52 = vpop.f32.mrb[63].mxu1  ;;  %v3333_v45 = vld [vmem:[%s6269_s3 + $0x58] sm:$0xff]  }
 0x16b   :  { %v925_v25 = vadd.f32 %v924_v51, %v923_v8  ;;  %6450 = vst [vmem:[#allocation84_spill] sm:$0xff] %v4451_v52  ;;  %v947_v61 = vadd.f32 %v946_v20, %v814_v24  ;;  %v984_v5 = vadd.f32 %v983_v12, %v815_v10  ;;  %v705_v2 = vadd.f32 %v704_v17, %v4451_v52  ;;  %v3334_v20 = vld [vmem:[%s6269_s3 + $0x18] sm:$0xff]  }
 0x16c   :  { %v1000_v39 = vmul.f32 0.00390625, %v888_v4  ;;  %v819_v1 = vmul.f32 %v4451_v52, %v4451_v52  ;;  %v4456_v49 = vmul.f32 0.00390625, %v645_v42  ;;  %v1004_v51 = vmul.f32 %v4446_v21, %v4446_v21  ;;  %3006 = vmatprep.subr.bf16.mxu0 %v3333_v45 }
 0x16d   :  { %v1001_v13 = vmul.f32 0.00390625, %v925_v25  ;;  %v948_v60 = vadd.f32 %v947_v61, %v818_v33  ;;  %3007 = vmatpush3.bf16.msra.mxu0 %v3334_v20  ;;  %v3335_v33 = vld [vmem:[%s6269_s3 + $0x60] sm:$0xff]  }
 0x16e   :  { %v985_v8 = vadd.f32 %v984_v5, %v819_v1  ;;  %v1005_v12 = vmul.f32 %v4456_v49, %v4456_v49  ;;  %v1008_v4 = vsub.f32 %v1000_v39, %v1004_v51  ;;  %v3337_v1 = vld [vmem:[%s6269_s3 + $0x20] sm:$0xff]   ;;  %3008 = vmatprep.subr.bf16.mxu0 %v3335_v33 }
 0x16f   :  { %v4468_v42 = vpop.f32.mrb[64].mxu1 }
 0x170   :  { %6451 = vst [vmem:[#allocation85_spill] sm:$0xff] %v4468_v42  ;;  %v669_v6 = vadd.f32 %v668_v40, %v4468_v42  ;;  %v822_v24 = vmul.f32 %v4468_v42, %v4468_v42  ;;  %v4473_v17 = vpop.f32.mrb[65].mxu1  ;;  %v1009_v10 = vsub.f32 %v1001_v13, %v1005_v12  ;;  %v1013_v25 = vadd.f32 1e-05, %v1008_v4  ;;  %v3332_v40 = vld [vmem:[%s6269_s3 + $0xa0] sm:$0xff]  }
 0x171   :  { %6452 = vst [vmem:[#allocation86_spill] sm:$0xff] %v4473_v17  ;;  %v706_v61 = vadd.f32 %v705_v2, %v4473_v17  ;;  %v823_v39 = vmul.f32 %v4473_v17, %v4473_v17  ;;  %v4481_v5 = vpop.f32.mrb[66].mxu1  ;;  %3121 = vmatpush3.bf16.msra.mxu1 %v3332_v40  ;;  %3009 = vmatpush3.bf16.msra.mxu0 %v3337_v1  ;;  %v3343_v40 = vld [vmem:[%s6269_s3 + $0x70] sm:$0xff]  }
 0x172   :  { %6453 = vst [vmem:[#allocation87_spill] sm:$0xff] %v4481_v5  ;;  %v949_v13 = vadd.f32 %v948_v60, %v822_v24  ;;  %v670_v51 = vadd.f32 %v669_v6, %v4481_v5  ;;  %v826_v45 = vmul.f32 %v4481_v5, %v4481_v5  ;;  %v4492_v2 = vpop.f32.mrb[67].mxu1  ;;  %v1014_v20 = vadd.f32 1e-05, %v1009_v10  ;;  %v3336_v60 = vld [vmem:[%s6269_s3 + $0xe8] sm:$0xff]  }
 0x173   :  { %6454 = vst [vmem:[#allocation88_spill] sm:$0xff] %v4492_v2  ;;  %v986_v12 = vadd.f32 %v985_v8, %v823_v39  ;;  %v707_v4 = vadd.f32 %v706_v61, %v4492_v2  ;;  %v827_v47 = vmul.f32 %v4492_v2, %v4492_v2  ;;  %3357 = vrsqrt.f32 %v1013_v25  ;;  %v3339_v6 = vld [vmem:[%s6269_s3 + $0x68] sm:$0xff]   ;;  %3122 = vmatprep.subr.bf16.mxu1 %v3336_v60  ;;  %v3341_v39 = vld [vmem:[%s6269_s3 + $0xf0] sm:$0xff]  }
 0x174   :  { %v950_v43 = vadd.f32 %v949_v13, %v826_v45  ;;  %3359 = vrsqrt.f32 %v1014_v20  ;;  %v3338_v8 = vld [vmem:[%s6269_s3 + $0xa8] sm:$0xff]   ;;  %3010 = vmatprep.subr.bf16.mxu0 %v3339_v6  ;;  %v3344_v20 = vld [vmem:[%s6269_s3 + $0x30] sm:$0xff]  }
 0x175   :  { %v987_v24 = vadd.f32 %v986_v12, %v827_v47  ;;  %v3340_v10 = vld [vmem:[%s6269_s3 + $0x28] sm:$0xff]   ;;  %3123 = vmatpush3.bf16.msra.mxu1 %v3338_v8 }
 0x176   :  { %3011 = vmatpush3.bf16.msra.mxu0 %v3340_v10  ;;  %3124 = vmatprep.subr.bf16.mxu1 %v3341_v39 }
 0x177   :  { %v4509_v25 = vpop.f32.mrb[68].mxu1  ;;  %3012 = vmatprep.subr.bf16.mxu0 %v3343_v40  ;;  %v3348_v40 = vld [vmem:[%s6269_s3 + $0x38] sm:$0xff]  }
 0x178   :  { %6455 = vst [vmem:[#allocation89_spill] sm:$0xff] %v4509_v25  ;;  %v671_v33 = vadd.f32 %v670_v51, %v4509_v25  ;;  %v830_v61 = vmul.f32 %v4509_v25, %v4509_v25  ;;  %v4514_v47 = vpop.f32.mrb[69].mxu1  ;;  %v3342_v51 = vld [vmem:[%s6269_s3 + $0xb0] sm:$0xff]  }
 0x179   :  { %6456 = vst [vmem:[#allocation90_spill] sm:$0xff] %v4514_v47  ;;  %v708_v1 = vadd.f32 %v707_v4, %v4514_v47  ;;  %v831_v13 = vmul.f32 %v4514_v47, %v4514_v47  ;;  %v4525_v45 = vpop.f32.mrb[70].mxu1  ;;  %3125 = vmatpush3.bf16.msra.mxu1 %v3342_v51 }
 0x17a   :  { %6457 = vst [vmem:[#allocation91_spill] sm:$0xff] %v4525_v45  ;;  %v951_v12 = vadd.f32 %v950_v43, %v830_v61  ;;  %v672_v60 = vadd.f32 %v671_v33, %v4525_v45  ;;  %v834_v6 = vmul.f32 %v4525_v45, %v4525_v45  ;;  %v4536_v4 = vpop.f32.mrb[71].mxu1  ;;  %3013 = vmatpush3.bf16.msra.mxu0 %v3344_v20  ;;  %v3345_v43 = vld [vmem:[%s6269_s3 + $0xf8] sm:$0xff]  }
 0x17b   :  { %6458 = vst [vmem:[#allocation92_spill] sm:$0xff] %v4536_v4  ;;  %v988_v8 = vadd.f32 %v987_v24, %v831_v13  ;;  %v709_v10 = vadd.f32 %v708_v1, %v4536_v4  ;;  %v835_v41 = vmul.f32 %v4536_v4, %v4536_v4  ;;  %v3347_v33 = vld [vmem:[%s6269_s3 + $0x78] sm:$0xff]   ;;  %3126 = vmatprep.subr.bf16.mxu1 %v3345_v43 }
 0x17c   :  { %v952_v27 = vadd.f32 %v951_v12, %v834_v6  ;;  %v3346_v24 = vld [vmem:[%s6269_s3 + $0xb8] sm:$0xff]   ;;  %3014 = vmatprep.subr.bf16.mxu0 %v3347_v33 }
 0x17d   :  { %v4547_v61 = vpop.eup %3357  ;;  %v989_v39 = vadd.f32 %v988_v8, %v835_v41  ;;  %3127 = vmatpush3.bf16.msra.mxu1 %v3346_v24 }
 0x17e   :  { %v4555_v1 = vpop.eup %3359  ;;  %3015 = vmatpush3.bf16.msra.mxu0 %v3348_v40 }
 0x17f   :  { %v4557_v13 = vpop.f32.mrb[72].mxu1 }
 0x180   :  { %6459 = vst [vmem:[#allocation93_spill] sm:$0xff] %v4557_v13  ;;  %v673_v41 = vadd.f32 %v672_v60, %v4557_v13  ;;  %v838_v20 = vmul.f32 %v4557_v13, %v4557_v13  ;;  %v4564_v12 = vpop.f32.mrb[73].mxu1 }
 0x181   :  { %6460 = vst [vmem:[#allocation94_spill] sm:$0xff] %v4564_v12  ;;  %v710_v6 = vadd.f32 %v709_v10, %v4564_v12  ;;  %v839_v8 = vmul.f32 %v4564_v12, %v4564_v12  ;;  %v4569_v43 = vpop.f32.mrb[74].mxu1 }
 0x182   :  { %6461 = vst [vmem:[#allocation95_spill] sm:$0xff] %v4569_v43  ;;  %v953_v33 = vadd.f32 %v952_v27, %v838_v20  ;;  %v674_v4 = vadd.f32 %v673_v41, %v4569_v43  ;;  %v842_v24 = vmul.f32 %v4569_v43, %v4569_v43  ;;  %v4574_v40 = vpop.f32.mrb[75].mxu1 }
 0x183   :  { %6462 = vst [vmem:[#allocation96_spill] sm:$0xff] %v4574_v40  ;;  %v990_v60 = vadd.f32 %v989_v39, %v839_v8  ;;  %v711_v51 = vadd.f32 %v710_v6, %v4574_v40  ;;  %v843_v13 = vmul.f32 %v4574_v40, %v4574_v40 }
 0x184   :  { %v954_v10 = vadd.f32 %v953_v33, %v842_v24 }
 0x185   :  { %v991_v45 = vadd.f32 %v990_v60, %v843_v13 }
 0x187   :  { %v4579_v23 = vpop.f32.mrb[76].mxu1 }
 0x188   :  { %6463 = vst [vmem:[#allocation97_spill] sm:$0xff] %v4579_v23  ;;  %v675_v12 = vadd.f32 %v674_v4, %v4579_v23  ;;  %v846_v27 = vmul.f32 %v4579_v23, %v4579_v23  ;;  %v4584_v41 = vpop.f32.mrb[77].mxu1 }
 0x189   :  { %6464 = vst [vmem:[#allocation98_spill] sm:$0xff] %v4584_v41  ;;  %v712_v20 = vadd.f32 %v711_v51, %v4584_v41  ;;  %v847_v39 = vmul.f32 %v4584_v41, %v4584_v41  ;;  %v4589_v6 = vpop.f32.mrb[78].mxu1 }
 0x18a   :  { %6465 = vst [vmem:[#allocation99_spill] sm:$0xff] %v4589_v6  ;;  %v955_v8 = vadd.f32 %v954_v10, %v846_v27  ;;  %v676_v33 = vadd.f32 %v675_v12, %v4589_v6  ;;  %v850_v13 = vmul.f32 %v4589_v6, %v4589_v6  ;;  %v4594_v24 = vpop.f32.mrb[79].mxu1 }
 0x18b   :  { %v992_v4 = vadd.f32 %v991_v45, %v847_v39  ;;  %v713_v60 = vadd.f32 %v712_v20, %v4594_v24  ;;  %v851_v23 = vmul.f32 %v4594_v24, %v4594_v24 }
 0x18c   :  { %v677_v51 = vrot.slane %v676_v33, 4  ;;  %v956_v40 = vadd.f32 %v955_v8, %v850_v13 }
 0x18d   :  { %v714_v43 = vrot.slane %v713_v60, 4  ;;  %v993_v41 = vadd.f32 %v992_v4, %v851_v23 }
 0x18e   :  { %v678_v47 = vadd.f32 %v677_v51, %v676_v33  ;;  %v957_v25 = vrot.slane %v956_v40, 4 }
 0x18f   :  { %v715_v10 = vadd.f32 %v714_v43, %v713_v60  ;;  %v994_v27 = vrot.slane %v993_v41, 4 }
 0x190   :  { %v679_v12 = vrot.slane %v678_v47, 2  ;;  %v958_v19 = vadd.f32 %v957_v25, %v956_v40 }
 0x191   :  { %v716_v2 = vrot.slane %v715_v10, 2  ;;  %v995_v6 = vadd.f32 %v994_v27, %v993_v41 }
 0x192   :  { %v680_v5 = vadd.f32 %v679_v12, %v678_v47  ;;  %v959_v17 = vrot.slane %v958_v19, 2 }
 0x193   :  { %v717_v45 = vadd.f32 %v716_v2, %v715_v10  ;;  %v996_v39 = vrot.slane %v995_v6, 2 }
 0x194   :  { %v681_v20 = vrot.slane %v680_v5, 1  ;;  %v960_v42 = vadd.f32 %v959_v17, %v958_v19  ;;  %v3587_v19 = vmov 1966171168  }
 0x195   :  { %v718_v52 = vrot.slane %v717_v45, 1  ;;  %v997_v53 = vadd.f32 %v996_v39, %v995_v6  ;;  %v1028_v17 = vunpack.c.l.s4 %v3587_v19 }
 0x196   :  { %v682_v9 = vadd.f32 %v681_v20, %v680_v5  ;;  %v961_v8 = vrot.slane %v960_v42, 1  ;;  %v1030_v5 = vlaneseq }
 0x197   :  { %v719_v13 = vadd.f32 %v718_v52, %v717_v45  ;;  %v998_v23 = vrot.slane %v997_v53, 1  ;;  %v1029_v6 = vunpack.c.0.s8 %v1028_v17  ;;  %v6466_v45 = vcombine.low %v4547_v61, %v4555_v1 }
 0x198   :  { %v722_v33 = vmul.f32 0.00390625, %v682_v9  ;;  %v962_v4 = vadd.f32 %v961_v8, %v960_v42  ;;  %v4599_v52 = vshrl.u32 %v1030_v5, 7 }
 0x199   :  { %v723_v43 = vmul.f32 0.00390625, %v719_v13  ;;  %v999_v60 = vadd.f32 %v998_v23, %v997_v53  ;;  %v1012_v13 = vld [vmem:[%s6268_s2] ss:$2 sm:$0xf] }
 0x19a   :  { %v1002_v51 = vmul.f32 0.00390625, %v962_v4  ;;  %v1006_v25 = vmul.f32 %v722_v33, %v722_v33  ;;  %v1032_v42 = vsub.s32 %v1029_v6, %v4599_v52  ;;  %v4609_v23 = vsub.s32 0, %v4599_v52 }
 0x19b   :  { %v1003_v40 = vmul.f32 0.00390625, %v999_v60  ;;  %v1007_v41 = vmul.f32 %v723_v43, %v723_v43  ;;  %v1060_v60 = vsub.s32 1, %v4599_v52 }
 0x19c   :  { %v1010_v47 = vsub.f32 %v1002_v51, %v1006_v25  ;;  %v1033_v39 = vrot.slane %v6466_v45, %v1032_v42  ;;  %6467 = vst [vmem:[#allocation100_spill] sm:$0xff] %v4609_v23  ;;  %v1064_v51 = vsub.s32 2, %v4599_v52  ;;  %v1068_v25 = vsub.s32 3, %v4599_v52  ;;  %v6469_v45 = vld [vmem:[#allocation14_spill] sm:$0xff] }
 0x19d   :  { %v1011_v27 = vsub.f32 %v1003_v40, %v1007_v41 }
 0x19e   :  { %v1015_v2 = vadd.f32 1e-05, %v1010_v47 }
 0x19f   :  { %v1016_v10 = vadd.f32 1e-05, %v1011_v27 }
 0x1a0   :  { %3361 = vrsqrt.f32 %v1015_v2 }
 0x1a1   :  { %3363 = vrsqrt.f32 %v1016_v10 }
 0x1aa   :  { %v3362_v9 = vpop.eup %3361 }
 0x1ab   :  { %v3364_v53 = vpop.eup %3363 }
 0x1ac   :  { %v1026_v12 = vcombine.low %v3362_v9, %v3364_v53 }
 0x1ae   :  { %v1040_v20 = vrot.slane %v1026_v12, %v1032_v42  ;;  %v6468_v12 = vld [vmem:[#allocation36_spill] sm:$0xff] }
 0x1b0   :  { %v1041_v8 = vcombine.low %v1033_v39, %v1040_v20  ;;  %v6470_v39 = vld [vmem:[#allocation16_spill] sm:$0xff]  ;;  %v6471_v20 = vld [vmem:[#allocation38_spill] sm:$0xff] }
 0x1b2   :  { %v1048_v4 = vrot.slane %v1041_v8, %v1032_v42  ;;  %v6472_v8 = vld [vmem:[#allocation40_spill] sm:$0xff] }
 0x1b4   :  { %v1050_v40 = vmul.f32 %v1048_v4, %v1012_v13  ;;  %v6473_v4 = vld [vmem:[#allocation18_spill] sm:$0xff] }
 0x1b6   :  { %v4615_v61 = vrot.slane %v1050_v40, %v4609_v23  ;;  %v4617_v1 = vrot.slane %v1050_v40, %v1060_v60  ;;  %v4619_v41 = vrot.slane %v1050_v40, %v1064_v51  ;;  %v4621_v47 = vrot.slane %v1050_v40, %v1068_v25 }
 0x1b8   :  { %v1074_v27 = vmul.f32 %v4615_v61, %v4446_v21  ;;  %v1075_v2 = vmul.f32 %v4617_v1, %v4456_v49  ;;  %v1076_v10 = vmul.f32 %v4619_v41, %v722_v33  ;;  %v1077_v19 = vmul.f32 %v4621_v47, %v723_v43 }
 0x1b9   :  { %v1235_v17 = vmul.f32 %v4621_v47, %v4594_v24  ;;  %v4633_v5 = vmul.f32 %v4615_v61, %v3857_v63  ;;  %v4637_v6 = vmul.f32 %v4617_v1, %v3866_v3  ;;  %v4641_v21 = vmul.f32 %v4619_v41, %v3994_v35 }
 0x1ba   :  { %v1082_v49 = vcombine.low %v1074_v27, %v1075_v2  ;;  %v1083_v52 = vcombine.low %v1076_v10, %v1077_v19  ;;  %v4645_v33 = vmul.f32 %v4621_v47, %v3998_v37  ;;  %v4649_v24 = vmul.f32 %v4615_v61, %v3875_v7  ;;  %v6474_v27 = vld [vmem:[#allocation20_spill] sm:$0xff]  ;;  %v6475_v19 = vld [vmem:[#allocation42_spill] sm:$0xff] }
 0x1bb   :  { %v4653_v63 = vmul.f32 %v4617_v1, %v3883_v11  ;;  %v4657_v3 = vmul.f32 %v4619_v41, %v4009_v48  ;;  %v4661_v35 = vmul.f32 %v4621_v47, %v4020_v57  ;;  %v4665_v37 = vmul.f32 %v4615_v61, %v3894_v18 }
 0x1bc   :  { %v1090_v43 = vrot.slane %v1082_v49, %v1032_v42  ;;  %v1097_v9 = vrot.slane %v1083_v52, %v1032_v42  ;;  %v4669_v7 = vmul.f32 %v4617_v1, %v3901_v22  ;;  %v4673_v11 = vmul.f32 %v4619_v41, %v4034_v30  ;;  %v6476_v52 = vld [vmem:[#allocation44_spill] sm:$0xff] }
 0x1bd   :  { %v4677_v48 = vmul.f32 %v4621_v47, %v4041_v38  ;;  %v4681_v57 = vmul.f32 %v4615_v61, %v3908_v26  ;;  %v4685_v18 = vmul.f32 %v4617_v1, %v3915_v31  ;;  %v4689_v22 = vmul.f32 %v4619_v41, %v4051_v56  ;;  %v2926_v31 = vld [vmem:[%s6268_s2 + $0x1] ss:$2 sm:$0xf] }
 0x1be   :  { %v1098_v53 = vcombine.low %v1090_v43, %v1097_v9  ;;  %v4693_v30 = vmul.f32 %v4621_v47, %v6468_v12  ;;  %v4697_v38 = vmul.f32 %v4615_v61, %v6469_v45  ;;  %v4701_v26 = vmul.f32 %v4617_v1, %v6470_v39  ;;  %v6477_v9 = vld [vmem:[#allocation22_spill] sm:$0xff]  ;;  %v6479_v45 = vld [vmem:[#allocation24_spill] sm:$0xff] }
 0x1bf   :  { %v4708_v56 = vmul.f32 %v4619_v41, %v6471_v20  ;;  %v4712_v13 = vmul.f32 %v4621_v47, %v6472_v8  ;;  %v4716_v40 = vmul.f32 %v4615_v61, %v6473_v4  ;;  %v4720_v2 = vmul.f32 %v4617_v1, %v6474_v27  ;;  %v6481_v20 = vld [vmem:[#allocation46_spill] sm:$0xff] }
 0x1c0   :  { %v1105_v10 = vrot.slane %v1098_v53, %v1032_v42  ;;  %v4724_v49 = vmul.f32 %v4619_v41, %v6475_v19  ;;  %v4728_v43 = vmul.f32 %v4621_v47, %v6476_v52  ;;  %v4732_v12 = vmul.f32 %v4615_v61, %v6477_v9  ;;  %v6483_v42 = vld [vmem:[#allocation48_spill] sm:$0xff]  ;;  %v6485_v4 = vld [vmem:[#allocation26_spill] sm:$0xff] }
 0x1c1   :  { %v4736_v39 = vmul.f32 %v4617_v1, %v6479_v45  ;;  %v4740_v8 = vmul.f32 %v4619_v41, %v6481_v20  ;;  %v4744_v53 = vmul.f32 %v4621_v47, %v6483_v42  ;;  %v4748_v27 = vmul.f32 %v4615_v61, %v6485_v4  ;;  %v6486_v52 = vld [vmem:[#allocation28_spill] sm:$0xff] }
 0x1c2   :  { %6478 = vst [vmem:[#allocation36_spill] sm:$0xff] %v4732_v12  ;;  %v1107_v19 = vsub.f32 %v2926_v31, %v1105_v10  ;;  %v4752_v9 = vmul.f32 %v4617_v1, %v6486_v52  ;;  %v6487_v12 = vld [vmem:[#allocation50_spill] sm:$0xff]  ;;  %v6497_v52 = vld [vmem:[#allocation56_spill] sm:$0xff] }
 0x1c3   :  { %6480 = vst [vmem:[#allocation14_spill] sm:$0xff] %v4736_v39  ;;  %6482 = vst [vmem:[#allocation16_spill] sm:$0xff] %v4740_v8  ;;  %v4756_v45 = vmul.f32 %v4619_v41, %v6487_v12  ;;  %v6489_v39 = vld [vmem:[#allocation52_spill] sm:$0xff]  ;;  %v6491_v8 = vld [vmem:[#allocation29_spill] sm:$0xff]  ;;  %v4776_v12 = vmul.f32 %v4621_v47, %v6497_v52 }
 0x1c4   :  { %6484 = vst [vmem:[#allocation38_spill] sm:$0xff] %v4744_v53  ;;  %v4760_v20 = vmul.f32 %v4621_v47, %v6489_v39  ;;  %v4764_v42 = vmul.f32 %v4615_v61, %v6491_v8  ;;  %v6493_v53 = vld [vmem:[#allocation30_spill] sm:$0xff]  ;;  %v4781_v39 = vrot.slane %v1107_v19, %v1060_v60  ;;  %v4785_v8 = vrot.slane %v1107_v19, %v1068_v25  ;;  %v6506_v25 = vld [vmem:[#allocation33_spill] sm:$0xff] }
 0x1c5   :  { %6488 = vst [vmem:[#allocation40_spill] sm:$0xff] %v4756_v45  ;;  %v4768_v4 = vmul.f32 %v4617_v1, %v6493_v53  ;;  %v6495_v31 = vld [vmem:[#allocation54_spill] sm:$0xff]  ;;  %v4779_v45 = vrot.slane %v1107_v19, %v4609_v23  ;;  %v6504_v23 = vld [vmem:[#allocation60_spill] sm:$0xff] }
 0x1c6   :  { %6490 = vst [vmem:[#allocation18_spill] sm:$0xff] %v4760_v20  ;;  %6492 = vst [vmem:[#allocation20_spill] sm:$0xff] %v4764_v42  ;;  %v4772_v10 = vmul.f32 %v4619_v41, %v6495_v31  ;;  %v4783_v20 = vrot.slane %v1107_v19, %v1064_v51  ;;  %v6498_v42 = vld [vmem:[#allocation31_spill] sm:$0xff]  ;;  %v4801_v60 = vmul.f32 %v4621_v47, %v6504_v23 }
 0x1c7   :  { %6494 = vst [vmem:[#allocation42_spill] sm:$0xff] %v4768_v4  ;;  %v4789_v53 = vmul.f32 %v4615_v61, %v6498_v42  ;;  %v6500_v4 = vld [vmem:[#allocation32_spill] sm:$0xff]  ;;  %v4804_v51 = vadd.f32 %v4785_v8, %v1235_v17  ;;  %v4808_v19 = vmul.f32 %v4615_v61, %v6506_v25  ;;  %v6508_v42 = vld [vmem:[#allocation34_spill] sm:$0xff]  ;;  %v6514_v23 = vld [vmem:[#allocation35_spill] sm:$0xff] }
 0x1c8   :  { %6496 = vst [vmem:[#allocation44_spill] sm:$0xff] %v4772_v10  ;;  %v4793_v31 = vmul.f32 %v4617_v1, %v6500_v4  ;;  %v6502_v10 = vld [vmem:[#allocation58_spill] sm:$0xff]  ;;  %v4824_v17 = vmul.f32 %v4615_v61, %v6514_v23 }
 0x1c9   :  { %6499 = vst [vmem:[#allocation22_spill] sm:$0xff] %v4789_v53  ;;  %v4797_v52 = vmul.f32 %v4619_v41, %v6502_v10  ;;  %6505 = vst [vmem:[#allocation48_spill] sm:$0xff] %v4804_v51  ;;  %v4812_v53 = vmul.f32 %v4617_v1, %v6508_v42  ;;  %v6510_v4 = vld [vmem:[#allocation62_spill] sm:$0xff]  ;;  %v6512_v10 = vld [vmem:[#allocation64_spill] sm:$0xff] }
 0x1ca   :  { %6501 = vst [vmem:[#allocation24_spill] sm:$0xff] %v4793_v31  ;;  %6507 = vst [vmem:[#allocation26_spill] sm:$0xff] %v4808_v19  ;;  %v4816_v31 = vmul.f32 %v4619_v41, %v6510_v4  ;;  %v6516_v51 = vld [vmem:[#allocation37_spill] sm:$0xff]  ;;  %v6518_v19 = vld [vmem:[#allocation66_spill] sm:$0xff] }
 0x1cb   :  { %6503 = vst [vmem:[#allocation46_spill] sm:$0xff] %v4797_v52  ;;  %6509 = vst [vmem:[#allocation28_spill] sm:$0xff] %v4812_v53  ;;  %v4820_v52 = vmul.f32 %v4621_v47, %v6512_v10  ;;  %v4828_v25 = vmul.f32 %v4617_v1, %v6516_v51  ;;  %v4832_v42 = vmul.f32 %v4619_v41, %v6518_v19  ;;  %v6520_v53 = vld [vmem:[#allocation68_spill] sm:$0xff] }
 0x1cc   :  { %6511 = vst [vmem:[#allocation50_spill] sm:$0xff] %v4816_v31  ;;  %6515 = vst [vmem:[#allocation29_spill] sm:$0xff] %v4824_v17  ;;  %v4836_v4 = vmul.f32 %v4621_v47, %v6520_v53  ;;  %v6522_v31 = vld [vmem:[#allocation39_spill] sm:$0xff]  ;;  %v6526_v17 = vld [vmem:[#allocation70_spill] sm:$0xff] }
 0x1cd   :  { %6513 = vst [vmem:[#allocation52_spill] sm:$0xff] %v4820_v52  ;;  %6517 = vst [vmem:[#allocation30_spill] sm:$0xff] %v4828_v25  ;;  %v4840_v10 = vmul.f32 %v4615_v61, %v6522_v31  ;;  %v6524_v52 = vld [vmem:[#allocation41_spill] sm:$0xff]  ;;  %v4848_v51 = vmul.f32 %v4619_v41, %v6526_v17  ;;  %v6528_v25 = vld [vmem:[#allocation72_spill] sm:$0xff] }
 0x1ce   :  { %6519 = vst [vmem:[#allocation54_spill] sm:$0xff] %v4832_v42  ;;  %6521 = vst [vmem:[#allocation56_spill] sm:$0xff] %v4836_v4  ;;  %v4844_v23 = vmul.f32 %v4617_v1, %v6524_v52  ;;  %v4852_v19 = vmul.f32 %v4621_v47, %v6528_v25  ;;  %v6530_v42 = vld [vmem:[#allocation43_spill] sm:$0xff]  ;;  %v6532_v4 = vld [vmem:[#allocation45_spill] sm:$0xff] }
 0x1cf   :  { %6523 = vst [vmem:[#allocation31_spill] sm:$0xff] %v4840_v10  ;;  %6527 = vst [vmem:[#allocation58_spill] sm:$0xff] %v4848_v51  ;;  %v4856_v53 = vmul.f32 %v4615_v61, %v6530_v42  ;;  %v4860_v31 = vmul.f32 %v4617_v1, %v6532_v4  ;;  %v6534_v10 = vld [vmem:[#allocation74_spill] sm:$0xff]  ;;  %v6538_v51 = vld [vmem:[#allocation47_spill] sm:$0xff] }
 0x1d0   :  { %6525 = vst [vmem:[#allocation32_spill] sm:$0xff] %v4844_v23  ;;  %6529 = vst [vmem:[#allocation60_spill] sm:$0xff] %v4852_v19  ;;  %v4864_v52 = vmul.f32 %v4619_v41, %v6534_v10  ;;  %v6536_v23 = vld [vmem:[#allocation76_spill] sm:$0xff]  ;;  %v4872_v25 = vmul.f32 %v4615_v61, %v6538_v51  ;;  %v6539_v19 = vld [vmem:[#allocation49_spill] sm:$0xff] }
 0x1d1   :  { %6531 = vst [vmem:[#allocation33_spill] sm:$0xff] %v4856_v53  ;;  %6533 = vst [vmem:[#allocation34_spill] sm:$0xff] %v4860_v31  ;;  %v4868_v17 = vmul.f32 %v4621_v47, %v6536_v23  ;;  %v4876_v42 = vmul.f32 %v4617_v1, %v6539_v19  ;;  %v6540_v53 = vld [vmem:[#allocation79_spill] sm:$0xff]  ;;  %v6542_v31 = vld [vmem:[#allocation81_spill] sm:$0xff]  ;;  %v4896_v19 = vmul.f32 %v4619_v41, %v4318_v59 }
 0x1d2   :  { %6535 = vst [vmem:[#allocation62_spill] sm:$0xff] %v4864_v52  ;;  %v4880_v4 = vmul.f32 %v4619_v41, %v6540_v53  ;;  %v4884_v10 = vmul.f32 %v4621_v47, %v6542_v31  ;;  %v6544_v52 = vld [vmem:[#allocation51_spill] sm:$0xff]  ;;  %v4900_v53 = vmul.f32 %v4621_v47, %v4325_v46  ;;  %v4916_v59 = vmul.f32 %v4621_v47, %v4351_v44 }
 0x1d3   :  { %6537 = vst [vmem:[#allocation64_spill] sm:$0xff] %v4868_v17  ;;  %v4888_v23 = vmul.f32 %v4615_v61, %v6544_v52  ;;  %v6545_v17 = vld [vmem:[#allocation53_spill] sm:$0xff]  ;;  %6546 = vst [vmem:[#allocation66_spill] sm:$0xff] %v4896_v19  ;;  %v6552_v19 = vld [vmem:[#allocation59_spill] sm:$0xff] }
 0x1d4   :  { %6541 = vst [vmem:[#allocation35_spill] sm:$0xff] %v4880_v4  ;;  %6543 = vst [vmem:[#allocation37_spill] sm:$0xff] %v4884_v10  ;;  %v4892_v51 = vmul.f32 %v4617_v1, %v6545_v17  ;;  %v6548_v4 = vld [vmem:[#allocation55_spill] sm:$0xff]  ;;  %v6549_v10 = vld [vmem:[#allocation57_spill] sm:$0xff]  ;;  %v4912_v17 = vmul.f32 %v4619_v41, %v4347_v55  ;;  %v4920_v46 = vmul.f32 %v4615_v61, %v6552_v19 }
 0x1d5   :  { %6547 = vst [vmem:[#allocation68_spill] sm:$0xff] %v4900_v53  ;;  %v4904_v31 = vmul.f32 %v4615_v61, %v6548_v4  ;;  %v4908_v52 = vmul.f32 %v4617_v1, %v6549_v10  ;;  %6551 = vst [vmem:[#allocation41_spill] sm:$0xff] %v4916_v59  ;;  %v6553_v53 = vld [vmem:[#allocation61_spill] sm:$0xff]  ;;  %v4928_v10 = vmul.f32 %v4619_v41, %v4359_v34 }
 0x1d6   :  { %6550 = vst [vmem:[#allocation39_spill] sm:$0xff] %v4912_v17  ;;  %v4924_v4 = vmul.f32 %v4617_v1, %v6553_v53  ;;  %v4932_v55 = vmul.f32 %v4621_v47, %v4363_v58  ;;  %v6556_v17 = vld [vmem:[#allocation63_spill] sm:$0xff]  ;;  %v6557_v59 = vld [vmem:[#allocation65_spill] sm:$0xff]  ;;  %v4944_v53 = vmul.f32 %v4619_v41, %v4386_v16  ;;  %v4948_v34 = vmul.f32 %v4621_v47, %v4390_v14 }
 0x1d7   :  { %6554 = vst [vmem:[#allocation70_spill] sm:$0xff] %v4928_v10  ;;  %v4936_v44 = vmul.f32 %v4615_v61, %v6556_v17  ;;  %v4940_v19 = vmul.f32 %v4617_v1, %v6557_v59  ;;  %v6560_v10 = vld [vmem:[#allocation67_spill] sm:$0xff]  ;;  %v4960_v59 = vmul.f32 %v4619_v41, %v4398_v50  ;;  %v4964_v16 = vmul.f32 %v4621_v47, %v4402_v62 }
 0x1d8   :  { %6555 = vst [vmem:[#allocation72_spill] sm:$0xff] %v4932_v55  ;;  %6558 = vst [vmem:[#allocation43_spill] sm:$0xff] %v4944_v53  ;;  %v4952_v58 = vmul.f32 %v4615_v61, %v6560_v10  ;;  %v6561_v55 = vld [vmem:[#allocation69_spill] sm:$0xff]  ;;  %v6564_v53 = vld [vmem:[#allocation71_spill] sm:$0xff]  ;;  %v4980_v50 = vmul.f32 %v4621_v47, %v4416_v0 }
 0x1d9   :  { %6559 = vst [vmem:[#allocation45_spill] sm:$0xff] %v4948_v34  ;;  %v4956_v17 = vmul.f32 %v4617_v1, %v6561_v55  ;;  %6562 = vst [vmem:[#allocation74_spill] sm:$0xff] %v4960_v59  ;;  %v4968_v14 = vmul.f32 %v4615_v61, %v6564_v53  ;;  %v6565_v34 = vld [vmem:[#allocation73_spill] sm:$0xff]  ;;  %v4976_v55 = vmul.f32 %v4619_v41, %v4414_v36  ;;  %v6568_v59 = vld [vmem:[#allocation75_spill] sm:$0xff] }
 0x1da   :  { %6563 = vst [vmem:[#allocation76_spill] sm:$0xff] %v4964_v16  ;;  %v4972_v10 = vmul.f32 %v4617_v1, %v6565_v34  ;;  %6567 = vst [vmem:[#allocation49_spill] sm:$0xff] %v4980_v50  ;;  %v4984_v62 = vmul.f32 %v4615_v61, %v6568_v59  ;;  %v6569_v16 = vld [vmem:[#allocation77_spill] sm:$0xff]  ;;  %v4992_v34 = vmul.f32 %v4619_v41, %v4424_v29  ;;  %v6573_v50 = vld [vmem:[#allocation80_spill] sm:$0xff] }
 0x1db   :  { %6566 = vst [vmem:[#allocation47_spill] sm:$0xff] %v4976_v55  ;;  %v4988_v53 = vmul.f32 %v4617_v1, %v6569_v16  ;;  %v4996_v36 = vmul.f32 %v4621_v47, %v4426_v15  ;;  %v6571_v55 = vld [vmem:[#allocation78_spill] sm:$0xff]  ;;  %v5004_v59 = vmul.f32 %v4617_v1, %v6573_v50  ;;  %v5008_v16 = vmul.f32 %v4619_v41, %v4434_v32 }
 0x1dc   :  { %v5000_v0 = vmul.f32 %v4615_v61, %v6571_v55  ;;  %v5012_v29 = vmul.f32 %v4621_v47, %v4437_v28  ;;  %v5016_v15 = vmul.f32 %v4615_v61, %v4316_v54 }
 0x1dd   :  { %6570 = vst [vmem:[#allocation79_spill] sm:$0xff] %v4996_v36  ;;  %6574 = vst [vmem:[#allocation51_spill] sm:$0xff] %v5004_v59  ;;  %v6578_v36 = vld [vmem:[#allocation82_spill] sm:$0xff]  ;;  %v6582_v59 = vld [vmem:[#allocation84_spill] sm:$0xff] }
 0x1de   :  { %6572 = vst [vmem:[#allocation81_spill] sm:$0xff] %v5000_v0  ;;  %6575 = vst [vmem:[#allocation53_spill] sm:$0xff] %v5008_v16  ;;  %v5020_v55 = vmul.f32 %v4617_v1, %v6578_v36  ;;  %v6580_v0 = vld [vmem:[#allocation83_spill] sm:$0xff]  ;;  %v5028_v32 = vmul.f32 %v4621_v47, %v6582_v59  ;;  %v6584_v16 = vld [vmem:[#allocation5_spill] sm:$0xff] }
 0x1df   :  { %6576 = vst [vmem:[#allocation55_spill] sm:$0xff] %v5012_v29  ;;  %6577 = vst [vmem:[#allocation57_spill] sm:$0xff] %v5016_v15  ;;  %v5024_v50 = vmul.f32 %v4619_v41, %v6580_v0  ;;  %v5032_v28 = vmul.f32 %v4615_v61, %v6584_v16  ;;  %v6586_v29 = vld [vmem:[#allocation6_spill] sm:$0xff]  ;;  %v6588_v15 = vld [vmem:[#allocation85_spill] sm:$0xff] }
 0x1e0   :  { %6579 = vst [vmem:[#allocation59_spill] sm:$0xff] %v5020_v55  ;;  %6583 = vst [vmem:[#allocation63_spill] sm:$0xff] %v5028_v32  ;;  %v5036_v54 = vmul.f32 %v4617_v1, %v6586_v29  ;;  %v5040_v36 = vmul.f32 %v4619_v41, %v6588_v15  ;;  %v6590_v55 = vld [vmem:[#allocation86_spill] sm:$0xff]  ;;  %v6594_v32 = vld [vmem:[#allocation8_spill] sm:$0xff] }
 0x1e1   :  { %6581 = vst [vmem:[#allocation61_spill] sm:$0xff] %v5024_v50  ;;  %6585 = vst [vmem:[#allocation65_spill] sm:$0xff] %v5032_v28  ;;  %v5044_v0 = vmul.f32 %v4621_v47, %v6590_v55  ;;  %v6592_v50 = vld [vmem:[#allocation7_spill] sm:$0xff]  ;;  %v5052_v16 = vmul.f32 %v4617_v1, %v6594_v32 }
 0x1e2   :  { %6587 = vst [vmem:[#allocation67_spill] sm:$0xff] %v5036_v54  ;;  %6589 = vst [vmem:[#allocation69_spill] sm:$0xff] %v5040_v36  ;;  %v5048_v59 = vmul.f32 %v4615_v61, %v6592_v50  ;;  %v6596_v28 = vld [vmem:[#allocation87_spill] sm:$0xff]  ;;  %v6598_v54 = vld [vmem:[#allocation88_spill] sm:$0xff] }
 0x1e3   :  { %6591 = vst [vmem:[#allocation71_spill] sm:$0xff] %v5044_v0  ;;  %6595 = vst [vmem:[#allocation75_spill] sm:$0xff] %v5052_v16  ;;  %v5056_v29 = vmul.f32 %v4619_v41, %v6596_v28  ;;  %v5060_v15 = vmul.f32 %v4621_v47, %v6598_v54  ;;  %v6600_v36 = vld [vmem:[#allocation9_spill] sm:$0xff]  ;;  %v6602_v0 = vld [vmem:[#allocation10_spill] sm:$0xff] }
 0x1e4   :  { %6593 = vst [vmem:[#allocation73_spill] sm:$0xff] %v5048_v59  ;;  %v5064_v55 = vmul.f32 %v4615_v61, %v6600_v36  ;;  %v5068_v50 = vmul.f32 %v4617_v1, %v6602_v0  ;;  %v6604_v59 = vld [vmem:[#allocation89_spill] sm:$0xff]  ;;  %v6606_v16 = vld [vmem:[#allocation90_spill] sm:$0xff] }
 0x1e5   :  { %6597 = vst [vmem:[#allocation77_spill] sm:$0xff] %v5056_v29  ;;  %6599 = vst [vmem:[#allocation78_spill] sm:$0xff] %v5060_v15  ;;  %v5072_v32 = vmul.f32 %v4619_v41, %v6604_v59  ;;  %v5076_v28 = vmul.f32 %v4621_v47, %v6606_v16  ;;  %v6608_v29 = vld [vmem:[#allocation11_spill] sm:$0xff]  ;;  %v6610_v15 = vld [vmem:[#allocation12_spill] sm:$0xff] }
 0x1e6   :  { %6601 = vst [vmem:[#allocation80_spill] sm:$0xff] %v5064_v55  ;;  %6603 = vst [vmem:[#allocation82_spill] sm:$0xff] %v5068_v50  ;;  %v5080_v54 = vmul.f32 %v4615_v61, %v6608_v29  ;;  %v5084_v36 = vmul.f32 %v4617_v1, %v6610_v15  ;;  %v6612_v55 = vld [vmem:[#allocation91_spill] sm:$0xff]  ;;  %v6614_v50 = vld [vmem:[#allocation92_spill] sm:$0xff] }
 0x1e7   :  { %6605 = vst [vmem:[#allocation83_spill] sm:$0xff] %v5072_v32  ;;  %6607 = vst [vmem:[#allocation84_spill] sm:$0xff] %v5076_v28  ;;  %v5088_v0 = vmul.f32 %v4619_v41, %v6612_v55  ;;  %v5092_v59 = vmul.f32 %v4621_v47, %v6614_v50  ;;  %v6616_v32 = vld [vmem:[#allocation13_spill] sm:$0xff]  ;;  %v6618_v28 = vld [vmem:[#allocation15_spill] sm:$0xff] }
 0x1e8   :  { %6609 = vst [vmem:[#allocation5_spill] sm:$0xff] %v5080_v54  ;;  %6611 = vst [vmem:[#allocation6_spill] sm:$0xff] %v5084_v36  ;;  %v5096_v16 = vmul.f32 %v4615_v61, %v6616_v32  ;;  %v5100_v29 = vmul.f32 %v4617_v1, %v6618_v28  ;;  %v6620_v54 = vld [vmem:[#allocation93_spill] sm:$0xff]  ;;  %v6622_v36 = vld [vmem:[#allocation94_spill] sm:$0xff] }
 0x1e9   :  { %6613 = vst [vmem:[#allocation85_spill] sm:$0xff] %v5088_v0  ;;  %6615 = vst [vmem:[#allocation86_spill] sm:$0xff] %v5092_v59  ;;  %v5104_v15 = vmul.f32 %v4619_v41, %v6620_v54  ;;  %v5108_v55 = vmul.f32 %v4621_v47, %v6622_v36  ;;  %v6624_v0 = vld [vmem:[#allocation17_spill] sm:$0xff]  ;;  %v6626_v59 = vld [vmem:[#allocation19_spill] sm:$0xff] }
 0x1ea   :  { %6617 = vst [vmem:[#allocation7_spill] sm:$0xff] %v5096_v16  ;;  %6619 = vst [vmem:[#allocation8_spill] sm:$0xff] %v5100_v29  ;;  %v5112_v50 = vmul.f32 %v4615_v61, %v6624_v0  ;;  %v5116_v32 = vmul.f32 %v4617_v1, %v6626_v59  ;;  %v6628_v16 = vld [vmem:[#allocation95_spill] sm:$0xff]  ;;  %v6630_v29 = vld [vmem:[#allocation96_spill] sm:$0xff] }
 0x1eb   :  { %6621 = vst [vmem:[#allocation87_spill] sm:$0xff] %v5104_v15  ;;  %6623 = vst [vmem:[#allocation88_spill] sm:$0xff] %v5108_v55  ;;  %v5120_v28 = vmul.f32 %v4619_v41, %v6628_v16  ;;  %v5124_v54 = vmul.f32 %v4621_v47, %v6630_v29  ;;  %v6632_v15 = vld [vmem:[#allocation21_spill] sm:$0xff]  ;;  %v6634_v55 = vld [vmem:[#allocation23_spill] sm:$0xff] }
 0x1ec   :  { %6625 = vst [vmem:[#allocation9_spill] sm:$0xff] %v5112_v50  ;;  %6627 = vst [vmem:[#allocation10_spill] sm:$0xff] %v5116_v32  ;;  %v5128_v36 = vmul.f32 %v4615_v61, %v6632_v15  ;;  %v5132_v0 = vmul.f32 %v4617_v1, %v6634_v55  ;;  %v6635_v50 = vld [vmem:[#allocation97_spill] sm:$0xff]  ;;  %v6636_v32 = vld [vmem:[#allocation98_spill] sm:$0xff] }
 0x1ed   :  { %6629 = vst [vmem:[#allocation89_spill] sm:$0xff] %v5120_v28  ;;  %6631 = vst [vmem:[#allocation90_spill] sm:$0xff] %v5124_v54  ;;  %v5136_v59 = vmul.f32 %v4619_v41, %v6635_v50  ;;  %v5140_v16 = vmul.f32 %v4621_v47, %v6636_v32  ;;  %v6637_v28 = vld [vmem:[#allocation25_spill] sm:$0xff]  ;;  %v6638_v54 = vld [vmem:[#allocation27_spill] sm:$0xff]  ;;  %v5156_v50 = vadd.f32 %v4779_v45, %v4633_v5 }
 0x1ee   :  { %6633 = vst [vmem:[#allocation11_spill] sm:$0xff] %v5128_v36  ;;  %v5144_v29 = vmul.f32 %v4615_v61, %v6637_v28  ;;  %v5148_v15 = vmul.f32 %v4617_v1, %v6638_v54  ;;  %v6639_v36 = vld [vmem:[#allocation99_spill] sm:$0xff]  ;;  %v5160_v47 = vadd.f32 %v4781_v39, %v4637_v6  ;;  %v5164_v61 = vadd.f32 %v4783_v20, %v4641_v21  ;;  %v6640_v32 = vld [vmem:[#allocation36_spill] sm:$0xff]  ;;  %v6642_v28 = vld [vmem:[#allocation14_spill] sm:$0xff] }
 0x1ef   :  { %v5152_v55 = vmul.f32 %v4619_v41, %v6639_v36  ;;  %v5168_v1 = vadd.f32 %v4785_v8, %v4645_v33  ;;  %v5172_v41 = vadd.f32 %v4779_v45, %v4649_v24  ;;  %v5176_v5 = vadd.f32 %v4781_v39, %v4653_v63  ;;  %v6644_v54 = vld [vmem:[#allocation16_spill] sm:$0xff]  ;;  %v6646_v36 = vld [vmem:[#allocation38_spill] sm:$0xff] }
 0x1f0   :  { %v5180_v6 = vadd.f32 %v4783_v20, %v4657_v3  ;;  %v5184_v21 = vadd.f32 %v4785_v8, %v4661_v35  ;;  %v5188_v33 = vadd.f32 %v4779_v45, %v4665_v37  ;;  %v5192_v24 = vadd.f32 %v4781_v39, %v4669_v7 }
 0x1f1   :  { %v5196_v63 = vadd.f32 %v4783_v20, %v4673_v11  ;;  %v5200_v3 = vadd.f32 %v4785_v8, %v4677_v48  ;;  %v5204_v35 = vadd.f32 %v4779_v45, %v4681_v57  ;;  %v5208_v37 = vadd.f32 %v4781_v39, %v4685_v18 }
 0x1f2   :  { %v5212_v7 = vadd.f32 %v4783_v20, %v4689_v22  ;;  %v5216_v11 = vadd.f32 %v4785_v8, %v4693_v30  ;;  %v5220_v48 = vadd.f32 %v4779_v45, %v4697_v38  ;;  %v5224_v57 = vadd.f32 %v4781_v39, %v4701_v26 }
 0x1f3   :  { %v5228_v18 = vadd.f32 %v4783_v20, %v4708_v56  ;;  %v5232_v22 = vadd.f32 %v4785_v8, %v4712_v13  ;;  %v5236_v30 = vadd.f32 %v4779_v45, %v4716_v40  ;;  %v5240_v38 = vadd.f32 %v4781_v39, %v4720_v2 }
 0x1f4   :  { %v5244_v26 = vadd.f32 %v4783_v20, %v4724_v49  ;;  %v5248_v56 = vadd.f32 %v4785_v8, %v4728_v43  ;;  %v5252_v13 = vadd.f32 %v4779_v45, %v6640_v32  ;;  %v5256_v40 = vadd.f32 %v4781_v39, %v6642_v28 }
 0x1f5   :  { %v5260_v2 = vadd.f32 %v4783_v20, %v6644_v54  ;;  %v5264_v49 = vadd.f32 %v4785_v8, %v6646_v36  ;;  %v5268_v43 = vadd.f32 %v4779_v45, %v4748_v27  ;;  %v5272_v32 = vadd.f32 %v4781_v39, %v4752_v9 }
 0x1f6   :  { %6641 = vst [vmem:[#allocation12_spill] sm:$0xff] %v5252_v13  ;;  %6643 = vst [vmem:[#allocation91_spill] sm:$0xff] %v5256_v40  ;;  %v6649_v13 = vld [vmem:[#allocation40_spill] sm:$0xff]  ;;  %v6651_v40 = vld [vmem:[#allocation18_spill] sm:$0xff] }
 0x1f7   :  { %6645 = vst [vmem:[#allocation92_spill] sm:$0xff] %v5260_v2  ;;  %6647 = vst [vmem:[#allocation13_spill] sm:$0xff] %v5264_v49  ;;  %v5276_v28 = vadd.f32 %v4783_v20, %v6649_v13  ;;  %v5280_v54 = vadd.f32 %v4785_v8, %v6651_v40  ;;  %v6653_v2 = vld [vmem:[#allocation20_spill] sm:$0xff]  ;;  %v6655_v49 = vld [vmem:[#allocation42_spill] sm:$0xff]  ;;  %v5296_v13 = vadd.f32 %v4785_v8, %v4776_v12 }
 0x1f8   :  { %6648 = vst [vmem:[#allocation15_spill] sm:$0xff] %v5268_v43  ;;  %v5284_v36 = vadd.f32 %v4779_v45, %v6653_v2  ;;  %v5288_v27 = vadd.f32 %v4781_v39, %v6655_v49  ;;  %v6656_v43 = vld [vmem:[#allocation44_spill] sm:$0xff] }
 0x1f9   :  { %6650 = vst [vmem:[#allocation93_spill] sm:$0xff] %v5276_v28  ;;  %6652 = vst [vmem:[#allocation94_spill] sm:$0xff] %v5280_v54  ;;  %v5292_v9 = vadd.f32 %v4783_v20, %v6656_v43  ;;  %v6659_v28 = vld [vmem:[#allocation22_spill] sm:$0xff]  ;;  %v6661_v54 = vld [vmem:[#allocation24_spill] sm:$0xff]  ;;  %v5312_v43 = vadd.f32 %v4785_v8, %v4801_v60 }
 0x1fa   :  { %6654 = vst [vmem:[#allocation17_spill] sm:$0xff] %v5284_v36  ;;  %6658 = vst [vmem:[#allocation95_spill] sm:$0xff] %v5296_v13  ;;  %v5300_v40 = vadd.f32 %v4779_v45, %v6659_v28  ;;  %v5304_v2 = vadd.f32 %v4781_v39, %v6661_v54  ;;  %v6663_v36 = vld [vmem:[#allocation46_spill] sm:$0xff]  ;;  %v6668_v13 = vld [vmem:[#allocation28_spill] sm:$0xff] }
 0x1fb   :  { %6657 = vst [vmem:[#allocation19_spill] sm:$0xff] %v5292_v9  ;;  %v5308_v49 = vadd.f32 %v4783_v20, %v6663_v36  ;;  %6665 = vst [vmem:[#allocation97_spill] sm:$0xff] %v5312_v43  ;;  %v6666_v9 = vld [vmem:[#allocation26_spill] sm:$0xff]  ;;  %v5320_v28 = vadd.f32 %v4781_v39, %v6668_v13 }
 0x1fc   :  { %6660 = vst [vmem:[#allocation96_spill] sm:$0xff] %v5300_v40  ;;  %6662 = vst [vmem:[#allocation21_spill] sm:$0xff] %v5304_v2  ;;  %v5316_v12 = vadd.f32 %v4779_v45, %v6666_v9  ;;  %v6670_v40 = vld [vmem:[#allocation50_spill] sm:$0xff]  ;;  %v6672_v2 = vld [vmem:[#allocation52_spill] sm:$0xff] }
 0x1fd   :  { %6664 = vst [vmem:[#allocation23_spill] sm:$0xff] %v5308_v49  ;;  %6669 = vst [vmem:[#allocation25_spill] sm:$0xff] %v5320_v28  ;;  %v5324_v54 = vadd.f32 %v4783_v20, %v6670_v40  ;;  %v5328_v36 = vadd.f32 %v4785_v8, %v6672_v2  ;;  %v6674_v49 = vld [vmem:[#allocation29_spill] sm:$0xff]  ;;  %v6676_v43 = vld [vmem:[#allocation30_spill] sm:$0xff] }
 0x1fe   :  { %6667 = vst [vmem:[#allocation98_spill] sm:$0xff] %v5316_v12  ;;  %v5332_v60 = vadd.f32 %v4779_v45, %v6674_v49  ;;  %v5336_v9 = vadd.f32 %v4781_v39, %v6676_v43  ;;  %v6678_v12 = vld [vmem:[#allocation54_spill] sm:$0xff]  ;;  %v6680_v28 = vld [vmem:[#allocation56_spill] sm:$0xff] }
 0x1ff   :  { %6671 = vst [vmem:[#allocation27_spill] sm:$0xff] %v5324_v54  ;;  %6673 = vst [vmem:[#allocation99_spill] sm:$0xff] %v5328_v36  ;;  %v5340_v13 = vadd.f32 %v4783_v20, %v6678_v12  ;;  %v5344_v40 = vadd.f32 %v4785_v8, %v6680_v28  ;;  %v6682_v54 = vld [vmem:[#allocation31_spill] sm:$0xff]  ;;  %v6684_v36 = vld [vmem:[#allocation32_spill] sm:$0xff] }
 0x200   :  { %6675 = vst [vmem:[#allocation36_spill] sm:$0xff] %v5332_v60  ;;  %6677 = vst [vmem:[#allocation14_spill] sm:$0xff] %v5336_v9  ;;  %v5348_v2 = vadd.f32 %v4779_v45, %v6682_v54  ;;  %v5352_v49 = vadd.f32 %v4781_v39, %v6684_v36  ;;  %v6686_v60 = vld [vmem:[#allocation58_spill] sm:$0xff]  ;;  %v6688_v9 = vld [vmem:[#allocation60_spill] sm:$0xff] }
 0x201   :  { %6679 = vst [vmem:[#allocation16_spill] sm:$0xff] %v5340_v13  ;;  %6681 = vst [vmem:[#allocation38_spill] sm:$0xff] %v5344_v40  ;;  %v5356_v43 = vadd.f32 %v4783_v20, %v6686_v60  ;;  %v5360_v12 = vadd.f32 %v4785_v8, %v6688_v9  ;;  %v6689_v13 = vld [vmem:[#allocation33_spill] sm:$0xff]  ;;  %v6691_v40 = vld [vmem:[#allocation34_spill] sm:$0xff]  ;;  %v5380_v9 = vadd.f32 %v4779_v45, %v4872_v25 }
 0x202   :  { %6683 = vst [vmem:[#allocation40_spill] sm:$0xff] %v5348_v2  ;;  %6685 = vst [vmem:[#allocation18_spill] sm:$0xff] %v5352_v49  ;;  %v5364_v28 = vadd.f32 %v4779_v45, %v6689_v13  ;;  %v5368_v54 = vadd.f32 %v4781_v39, %v6691_v40  ;;  %v6692_v2 = vld [vmem:[#allocation62_spill] sm:$0xff]  ;;  %v6693_v49 = vld [vmem:[#allocation64_spill] sm:$0xff]  ;;  %v5384_v13 = vadd.f32 %v4781_v39, %v4876_v42 }
 0x203   :  { %6687 = vst [vmem:[#allocation20_spill] sm:$0xff] %v5356_v43  ;;  %v5372_v36 = vadd.f32 %v4783_v20, %v6692_v2  ;;  %v5376_v60 = vadd.f32 %v4785_v8, %v6693_v49  ;;  %6694 = vst [vmem:[#allocation44_spill] sm:$0xff] %v5380_v9  ;;  %v6696_v43 = vld [vmem:[#allocation35_spill] sm:$0xff]  ;;  %v5396_v49 = vadd.f32 %v4779_v45, %v4888_v23  ;;  %v6700_v9 = vld [vmem:[#allocation66_spill] sm:$0xff] }
 0x204   :  { %6690 = vst [vmem:[#allocation42_spill] sm:$0xff] %v5364_v28  ;;  %6695 = vst [vmem:[#allocation22_spill] sm:$0xff] %v5384_v13  ;;  %v5388_v40 = vadd.f32 %v4783_v20, %v6696_v43  ;;  %v6698_v28 = vld [vmem:[#allocation37_spill] sm:$0xff]  ;;  %v5400_v25 = vadd.f32 %v4781_v39, %v4892_v51  ;;  %v5404_v42 = vadd.f32 %v4783_v20, %v6700_v9  ;;  %v6701_v13 = vld [vmem:[#allocation68_spill] sm:$0xff] }
 0x205   :  { %v5392_v2 = vadd.f32 %v4785_v8, %v6698_v28  ;;  %6699 = vst [vmem:[#allocation46_spill] sm:$0xff] %v5396_v49  ;;  %v5408_v43 = vadd.f32 %v4785_v8, %v6701_v13  ;;  %v5412_v28 = vadd.f32 %v4779_v45, %v4904_v31  ;;  %v5416_v23 = vadd.f32 %v4781_v39, %v4908_v52  ;;  %v6706_v49 = vld [vmem:[#allocation41_spill] sm:$0xff] }
 0x206   :  { %6697 = vst [vmem:[#allocation24_spill] sm:$0xff] %v5388_v40  ;;  %v6704_v40 = vld [vmem:[#allocation39_spill] sm:$0xff]  ;;  %v5424_v9 = vadd.f32 %v4785_v8, %v6706_v49  ;;  %v5428_v13 = vadd.f32 %v4779_v45, %v4920_v46  ;;  %v5432_v31 = vadd.f32 %v4781_v39, %v4924_v4  ;;  %v5444_v49 = vadd.f32 %v4779_v45, %v4936_v44 }
 0x207   :  { %6702 = vst [vmem:[#allocation26_spill] sm:$0xff] %v5412_v28  ;;  %6703 = vst [vmem:[#allocation28_spill] sm:$0xff] %v5416_v23  ;;  %v5420_v51 = vadd.f32 %v4783_v20, %v6704_v40  ;;  %v6708_v28 = vld [vmem:[#allocation70_spill] sm:$0xff]  ;;  %v6709_v23 = vld [vmem:[#allocation72_spill] sm:$0xff]  ;;  %v5448_v46 = vadd.f32 %v4781_v39, %v4940_v19  ;;  %v5464_v44 = vadd.f32 %v4781_v39, %v4956_v17 }
 0x208   :  { %6707 = vst [vmem:[#allocation52_spill] sm:$0xff] %v5428_v13  ;;  %v5436_v52 = vadd.f32 %v4783_v20, %v6708_v28  ;;  %v5440_v40 = vadd.f32 %v4785_v8, %v6709_v23  ;;  %6710 = vst [vmem:[#allocation29_spill] sm:$0xff] %v5444_v49  ;;  %v6714_v13 = vld [vmem:[#allocation45_spill] sm:$0xff]  ;;  %v5460_v23 = vadd.f32 %v4779_v45, %v4952_v58  ;;  %v6716_v49 = vld [vmem:[#allocation74_spill] sm:$0xff] }
 0x209   :  { %6705 = vst [vmem:[#allocation50_spill] sm:$0xff] %v5420_v51  ;;  %6711 = vst [vmem:[#allocation30_spill] sm:$0xff] %v5448_v46  ;;  %v6712_v51 = vld [vmem:[#allocation43_spill] sm:$0xff]  ;;  %v5456_v28 = vadd.f32 %v4785_v8, %v6714_v13  ;;  %v5468_v19 = vadd.f32 %v4783_v20, %v6716_v49  ;;  %v6717_v46 = vld [vmem:[#allocation76_spill] sm:$0xff]  ;;  %v5476_v13 = vadd.f32 %v4779_v45, %v4968_v14 }
 0x20a   :  { %v5452_v4 = vadd.f32 %v4783_v20, %v6712_v51  ;;  %6715 = vst [vmem:[#allocation56_spill] sm:$0xff] %v5460_v23  ;;  %v5472_v51 = vadd.f32 %v4785_v8, %v6717_v46  ;;  %v5480_v58 = vadd.f32 %v4781_v39, %v4972_v10  ;;  %v6721_v23 = vld [vmem:[#allocation49_spill] sm:$0xff]  ;;  %v5492_v46 = vadd.f32 %v4779_v45, %v4984_v62 }
 0x20b   :  { %6718 = vst [vmem:[#allocation31_spill] sm:$0xff] %v5476_v13  ;;  %v5488_v49 = vadd.f32 %v4785_v8, %v6721_v23  ;;  %v5496_v14 = vadd.f32 %v4781_v39, %v4988_v53  ;;  %v5500_v10 = vadd.f32 %v4783_v20, %v4992_v34  ;;  %v6726_v13 = vld [vmem:[#allocation79_spill] sm:$0xff] }
 0x20c   :  { %6713 = vst [vmem:[#allocation54_spill] sm:$0xff] %v5452_v4  ;;  %v6719_v4 = vld [vmem:[#allocation47_spill] sm:$0xff]  ;;  %6723 = vst [vmem:[#allocation60_spill] sm:$0xff] %v5492_v46  ;;  %v6732_v46 = vld [vmem:[#allocation53_spill] sm:$0xff] }
 0x20d   :  { %v5484_v17 = vadd.f32 %v4783_v20, %v6719_v4  ;;  %6722 = vst [vmem:[#allocation58_spill] sm:$0xff] %v5488_v49  ;;  %6724 = vst [vmem:[#allocation33_spill] sm:$0xff] %v5496_v14  ;;  %v5504_v4 = vadd.f32 %v4785_v8, %v6726_v13  ;;  %v6730_v49 = vld [vmem:[#allocation51_spill] sm:$0xff]  ;;  %v5516_v53 = vadd.f32 %v4783_v20, %v6732_v46 }
 0x20e   :  { %6725 = vst [vmem:[#allocation34_spill] sm:$0xff] %v5500_v10  ;;  %v5512_v62 = vadd.f32 %v4781_v39, %v6730_v49  ;;  %v6734_v14 = vld [vmem:[#allocation55_spill] sm:$0xff]  ;;  %v6736_v10 = vld [vmem:[#allocation57_spill] sm:$0xff] }
 0x20f   :  { %6720 = vst [vmem:[#allocation32_spill] sm:$0xff] %v5484_v17  ;;  %6727 = vst [vmem:[#allocation62_spill] sm:$0xff] %v5504_v4  ;;  %v6728_v17 = vld [vmem:[#allocation81_spill] sm:$0xff]  ;;  %v5520_v34 = vadd.f32 %v4785_v8, %v6734_v14  ;;  %v5524_v13 = vadd.f32 %v4779_v45, %v6736_v10  ;;  %v6738_v4 = vld [vmem:[#allocation59_spill] sm:$0xff] }
 0x210   :  { %v5508_v23 = vadd.f32 %v4779_v45, %v6728_v17  ;;  %6731 = vst [vmem:[#allocation35_spill] sm:$0xff] %v5512_v62  ;;  %6733 = vst [vmem:[#allocation37_spill] sm:$0xff] %v5516_v53  ;;  %v5528_v17 = vadd.f32 %v4781_v39, %v6738_v4  ;;  %v6742_v62 = vld [vmem:[#allocation63_spill] sm:$0xff]  ;;  %v6744_v53 = vld [vmem:[#allocation65_spill] sm:$0xff] }
 0x211   :  { %6735 = vst [vmem:[#allocation66_spill] sm:$0xff] %v5520_v34  ;;  %6737 = vst [vmem:[#allocation68_spill] sm:$0xff] %v5524_v13  ;;  %v5536_v46 = vadd.f32 %v4785_v8, %v6742_v62  ;;  %v5540_v14 = vadd.f32 %v4779_v45, %v6744_v53  ;;  %v6746_v34 = vld [vmem:[#allocation67_spill] sm:$0xff]  ;;  %v6748_v13 = vld [vmem:[#allocation69_spill] sm:$0xff] }
 0x212   :  { %6729 = vst [vmem:[#allocation64_spill] sm:$0xff] %v5508_v23  ;;  %6739 = vst [vmem:[#allocation39_spill] sm:$0xff] %v5528_v17  ;;  %v6740_v23 = vld [vmem:[#allocation61_spill] sm:$0xff]  ;;  %v5544_v10 = vadd.f32 %v4781_v39, %v6746_v34  ;;  %v5548_v4 = vadd.f32 %v4783_v20, %v6748_v13  ;;  %v6750_v17 = vld [vmem:[#allocation71_spill] sm:$0xff] }
 0x213   :  { %v5532_v49 = vadd.f32 %v4783_v20, %v6740_v23  ;;  %6743 = vst [vmem:[#allocation70_spill] sm:$0xff] %v5536_v46  ;;  %6745 = vst [vmem:[#allocation72_spill] sm:$0xff] %v5540_v14  ;;  %v5552_v23 = vadd.f32 %v4785_v8, %v6750_v17  ;;  %v6754_v46 = vld [vmem:[#allocation75_spill] sm:$0xff]  ;;  %v6756_v14 = vld [vmem:[#allocation77_spill] sm:$0xff] }
 0x214   :  { %6747 = vst [vmem:[#allocation43_spill] sm:$0xff] %v5544_v10  ;;  %6749 = vst [vmem:[#allocation45_spill] sm:$0xff] %v5548_v4  ;;  %v5560_v53 = vadd.f32 %v4781_v39, %v6754_v46  ;;  %v5564_v34 = vadd.f32 %v4783_v20, %v6756_v14  ;;  %v6758_v10 = vld [vmem:[#allocation78_spill] sm:$0xff]  ;;  %v6760_v4 = vld [vmem:[#allocation80_spill] sm:$0xff] }
 0x215   :  { %6741 = vst [vmem:[#allocation41_spill] sm:$0xff] %v5532_v49  ;;  %6751 = vst [vmem:[#allocation74_spill] sm:$0xff] %v5552_v23  ;;  %v6752_v49 = vld [vmem:[#allocation73_spill] sm:$0xff]  ;;  %v5568_v13 = vadd.f32 %v4785_v8, %v6758_v10  ;;  %v5572_v17 = vadd.f32 %v4779_v45, %v6760_v4  ;;  %v6762_v23 = vld [vmem:[#allocation82_spill] sm:$0xff] }
 0x216   :  { %v5556_v62 = vadd.f32 %v4779_v45, %v6752_v49  ;;  %6755 = vst [vmem:[#allocation47_spill] sm:$0xff] %v5560_v53  ;;  %6757 = vst [vmem:[#allocation49_spill] sm:$0xff] %v5564_v34  ;;  %v5576_v49 = vadd.f32 %v4781_v39, %v6762_v23  ;;  %v6766_v53 = vld [vmem:[#allocation84_spill] sm:$0xff]  ;;  %v6768_v34 = vld [vmem:[#allocation5_spill] sm:$0xff] }
 0x217   :  { %6759 = vst [vmem:[#allocation79_spill] sm:$0xff] %v5568_v13  ;;  %6761 = vst [vmem:[#allocation81_spill] sm:$0xff] %v5572_v17  ;;  %v5584_v14 = vadd.f32 %v4785_v8, %v6766_v53  ;;  %v5588_v10 = vadd.f32 %v4779_v45, %v6768_v34  ;;  %v6770_v13 = vld [vmem:[#allocation6_spill] sm:$0xff]  ;;  %v6772_v17 = vld [vmem:[#allocation85_spill] sm:$0xff] }
 0x218   :  { %6753 = vst [vmem:[#allocation76_spill] sm:$0xff] %v5556_v62  ;;  %6763 = vst [vmem:[#allocation51_spill] sm:$0xff] %v5576_v49  ;;  %v6764_v62 = vld [vmem:[#allocation83_spill] sm:$0xff]  ;;  %v5592_v4 = vadd.f32 %v4781_v39, %v6770_v13  ;;  %v5596_v23 = vadd.f32 %v4783_v20, %v6772_v17  ;;  %v6774_v49 = vld [vmem:[#allocation86_spill] sm:$0xff] }
 0x219   :  { %v5580_v46 = vadd.f32 %v4783_v20, %v6764_v62  ;;  %6767 = vst [vmem:[#allocation55_spill] sm:$0xff] %v5584_v14  ;;  %6769 = vst [vmem:[#allocation57_spill] sm:$0xff] %v5588_v10  ;;  %v5600_v62 = vadd.f32 %v4785_v8, %v6774_v49  ;;  %v6778_v14 = vld [vmem:[#allocation8_spill] sm:$0xff]  ;;  %v6780_v10 = vld [vmem:[#allocation87_spill] sm:$0xff] }
 0x21a   :  { %6771 = vst [vmem:[#allocation59_spill] sm:$0xff] %v5592_v4  ;;  %6773 = vst [vmem:[#allocation61_spill] sm:$0xff] %v5596_v23  ;;  %v5608_v34 = vadd.f32 %v4781_v39, %v6778_v14  ;;  %v5612_v13 = vadd.f32 %v4783_v20, %v6780_v10  ;;  %v6782_v4 = vld [vmem:[#allocation88_spill] sm:$0xff]  ;;  %v6783_v23 = vld [vmem:[#allocation9_spill] sm:$0xff] }
 0x21b   :  { %6765 = vst [vmem:[#allocation53_spill] sm:$0xff] %v5580_v46  ;;  %6775 = vst [vmem:[#allocation63_spill] sm:$0xff] %v5600_v62  ;;  %v6776_v46 = vld [vmem:[#allocation7_spill] sm:$0xff]  ;;  %v5616_v17 = vadd.f32 %v4785_v8, %v6782_v4  ;;  %v5620_v49 = vadd.f32 %v4779_v45, %v6783_v23  ;;  %v6784_v62 = vld [vmem:[#allocation10_spill] sm:$0xff]  ;;  %v5640_v23 = vadd.f32 %v4781_v39, %v5132_v0 }
 0x21c   :  { %v5604_v53 = vadd.f32 %v4779_v45, %v6776_v46  ;;  %6779 = vst [vmem:[#allocation67_spill] sm:$0xff] %v5608_v34  ;;  %6781 = vst [vmem:[#allocation69_spill] sm:$0xff] %v5612_v13  ;;  %v5624_v46 = vadd.f32 %v4781_v39, %v6784_v62  ;;  %v6786_v34 = vld [vmem:[#allocation90_spill] sm:$0xff]  ;;  %v6787_v13 = vld [vmem:[#allocation11_spill] sm:$0xff]  ;;  %v5644_v62 = vadd.f32 %v4783_v20, %v5136_v59  ;;  %v1387_v59 = vmax.f32 %v5164_v61, 0.0 }
 0x21d   :  { %v5632_v10 = vadd.f32 %v4785_v8, %v6786_v34  ;;  %v5636_v4 = vadd.f32 %v4779_v45, %v6787_v13  ;;  %v5652_v34 = vadd.f32 %v4779_v45, %v5144_v29  ;;  %v5656_v13 = vadd.f32 %v4781_v39, %v5148_v15 }
 0x21e   :  { %6777 = vst [vmem:[#allocation65_spill] sm:$0xff] %v5604_v53  ;;  %v6785_v53 = vld [vmem:[#allocation89_spill] sm:$0xff]  ;;  %6789 = vst [vmem:[#allocation73_spill] sm:$0xff] %v5644_v62  ;;  %v5660_v0 = vadd.f32 %v4783_v20, %v5152_v55  ;;  %v1389_v62 = vmax.f32 %v5172_v41, 0.0  ;;  %v1390_v45 = vmax.f32 %v5176_v5, 0.0  ;;  %v1388_v29 = vmax.f32 %v5168_v1, 0.0 }
 0x21f   :  { %v5628_v14 = vadd.f32 %v4783_v20, %v6785_v53  ;;  %6788 = vst [vmem:[#allocation71_spill] sm:$0xff] %v5636_v4  ;;  %v5648_v53 = vadd.f32 %v4785_v8, %v5140_v16  ;;  %6790 = vst [vmem:[#allocation75_spill] sm:$0xff] %v5652_v34  ;;  %v1385_v4 = vmax.f32 %v5156_v50, 0.0  ;;  %v1391_v8 = vmax.f32 %v5180_v6, 0.0 }
 0x220   :  { %6791 = vst [vmem:[#allocation77_spill] sm:$0xff] %v5660_v0  ;;  %v1386_v16 = vmax.f32 %v5160_v47, 0.0  ;;  %v1392_v39 = vmax.f32 %v5184_v21, 0.0  ;;  %v1394_v15 = vmax.f32 %v5192_v24, 0.0  ;;  %v1398_v50 = vmax.f32 %v5208_v37, 0.0 }
 0x221   :  { %v1513_v20 = vpack.c.bf16 %v1389_v62, %v1385_v4  ;;  %v1515_v55 = vpack.c.bf16 %v1391_v8, %v1387_v59  ;;  %v1396_v61 = vmax.f32 %v5200_v3, 0.0  ;;  %v1400_v6 = vmax.f32 %v5216_v11, 0.0  ;;  %v6792_v59 = vld [vmem:[#allocation91_spill] sm:$0xff] }
 0x222   :  { %v1514_v0 = vpack.c.bf16 %v1390_v45, %v1386_v16  ;;  %v1516_v41 = vpack.c.bf16 %v1392_v39, %v1388_v29  ;;  %v1393_v47 = vmax.f32 %v5188_v33, 0.0  ;;  %v1518_v34 = vpack.c.bf16 %v1398_v50, %v1394_v15  ;;  %v6793_v16 = vld [vmem:[#allocation13_spill] sm:$0xff]  ;;  %v6794_v39 = vld [vmem:[#allocation94_spill] sm:$0xff]  ;;  %v6797_v50 = vld [vmem:[#allocation92_spill] sm:$0xff] }
 0x223   :  { %v1397_v5 = vmax.f32 %v5204_v35, 0.0  ;;  %v1395_v1 = vmax.f32 %v5196_v63, 0.0  ;;  %v1399_v21 = vmax.f32 %v5212_v7, 0.0  ;;  %v1520_v24 = vpack.c.bf16 %v1400_v6, %v1396_v61  ;;  %v6798_v61 = vld [vmem:[#allocation93_spill] sm:$0xff] }
 0x224   :  { %1865 = vmatprep.mubr.bf16.mxu0 %v1514_v0  ;;  %2026 = vmatprep.mubr.bf16.mxu1 %v1516_v41  ;;  %v1402_v37 = vmax.f32 %v5224_v57, 0.0  ;;  %v1406_v3 = vmax.f32 %v5240_v38, 0.0  ;;  %v1404_v4 = vmax.f32 %v5232_v22, 0.0  ;;  %v1408_v62 = vmax.f32 %v5248_v56, 0.0 }
 0x225   :  { %1866 = vmatmul.mubr.bf16.vlgmr.msra.gmra.mrb[48].mxu0 %v1513_v20  ;;  %2027 = vmatmul.mubr.bf16.vlgmr.msra.gmra.mrb[80].mxu1 %v1515_v55  ;;  %v1517_v11 = vpack.c.bf16 %v1397_v5, %v1393_v47  ;;  %v1519_v33 = vpack.c.bf16 %v1399_v21, %v1395_v1  ;;  %v1401_v35 = vmax.f32 %v5220_v48, 0.0  ;;  %v1405_v7 = vmax.f32 %v5236_v30, 0.0  ;;  %v6796_v55 = vld [vmem:[#allocation15_spill] sm:$0xff]  ;;  %v6799_v47 = vld [vmem:[#allocation21_spill] sm:$0xff] }
 0x226   :  { %1873 = vmatprep.mubr.bf16.mxu0 %v1518_v34  ;;  %2034 = vmatprep.mubr.bf16.mxu1 %v1520_v24  ;;  %v1522_v63 = vpack.c.bf16 %v1406_v3, %v1402_v37  ;;  %v1403_v0 = vmax.f32 %v5228_v18, 0.0  ;;  %v1407_v57 = vmax.f32 %v5244_v26, 0.0  ;;  %v1524_v38 = vpack.c.bf16 %v1408_v62, %v1404_v4  ;;  %v6795_v34 = vld [vmem:[#allocation12_spill] sm:$0xff]  ;;  %v6800_v5 = vld [vmem:[#allocation95_spill] sm:$0xff]  ;;  %v6801_v37 = vld [vmem:[#allocation97_spill] sm:$0xff] }
 0x227   :  { %v1410_v22 = vmax.f32 %v6792_v59, 0.0  ;;  %v1414_v8 = vmax.f32 %v5272_v32, 0.0  ;;  %v1412_v45 = vmax.f32 %v6793_v16, 0.0  ;;  %v1521_v29 = vpack.c.bf16 %v1405_v7, %v1401_v35  ;;  %v6802_v4 = vld [vmem:[#allocation17_spill] sm:$0xff]  ;;  %v6803_v7 = vld [vmem:[#allocation96_spill] sm:$0xff] }
 0x228   :  { %v1523_v56 = vpack.c.bf16 %v1407_v57, %v1403_v0  ;;  %v1416_v48 = vmax.f32 %v6794_v39, 0.0  ;;  %v1409_v15 = vmax.f32 %v6795_v34, 0.0  ;;  %v1413_v30 = vmax.f32 %v6796_v55, 0.0  ;;  %v6804_v57 = vld [vmem:[#allocation19_spill] sm:$0xff]  ;;  %v6806_v16 = vld [vmem:[#allocation25_spill] sm:$0xff]  ;;  %v6807_v39 = vld [vmem:[#allocation14_spill] sm:$0xff] }
 0x229   :  { %v1526_v20 = vpack.c.bf16 %v1414_v8, %v1410_v22  ;;  %v1411_v18 = vmax.f32 %v6797_v50, 0.0  ;;  %v1415_v26 = vmax.f32 %v6798_v61, 0.0  ;;  %v1418_v6 = vmax.f32 %v5288_v27, 0.0  ;;  %v6805_v22 = vld [vmem:[#allocation23_spill] sm:$0xff]  ;;  %v6809_v50 = vld [vmem:[#allocation38_spill] sm:$0xff] }
 0x22a   :  { %v1528_v41 = vpack.c.bf16 %v1416_v48, %v1412_v45  ;;  %v1422_v32 = vmax.f32 %v6799_v47, 0.0  ;;  %v1420_v1 = vmax.f32 %v6800_v5, 0.0  ;;  %v5697_v21 = vpack.c.bf16 %v1413_v30, %v1409_v15  ;;  %v6808_v34 = vld [vmem:[#allocation99_spill] sm:$0xff]  ;;  %v6810_v61 = vld [vmem:[#allocation98_spill] sm:$0xff]  ;;  %v6813_v5 = vld [vmem:[#allocation16_spill] sm:$0xff] }
 0x22b   :  { %v5699_v24 = vpack.c.bf16 %v1415_v26, %v1411_v18  ;;  %v1424_v3 = vmax.f32 %v6801_v37, 0.0  ;;  %v1417_v62 = vmax.f32 %v6802_v4, 0.0  ;;  %v1421_v0 = vmax.f32 %v6803_v7, 0.0  ;;  %v6812_v47 = vld [vmem:[#allocation27_spill] sm:$0xff] }
 0x22c   :  { %v5703_v35 = vpack.c.bf16 %v1422_v32, %v1418_v6  ;;  %v1419_v59 = vmax.f32 %v6804_v57, 0.0  ;;  %v1423_v27 = vmax.f32 %v6805_v22, 0.0  ;;  %v1426_v45 = vmax.f32 %v6806_v16, 0.0  ;;  %v6815_v57 = vld [vmem:[#allocation40_spill] sm:$0xff] }
 0x22d   :  { %1874 = vmatmul.mubr.bf16.gmra.mrb[52].mxu0 %v1517_v11  ;;  %2035 = vmatmul.mubr.bf16.gmra.mrb[84].mxu1 %v1519_v33  ;;  %v5708_v8 = vpack.c.bf16 %v1424_v3, %v1420_v1  ;;  %v1430_v48 = vmax.f32 %v6807_v39, 0.0  ;;  %v1428_v15 = vmax.f32 %v6808_v34, 0.0  ;;  %v5713_v55 = vpack.c.bf16 %v1421_v0, %v1417_v62  ;;  %v6811_v33 = vld [vmem:[#allocation36_spill] sm:$0xff] }
 0x22e   :  { %1881 = vmatprep.mubr.bf16.mxu0 %v1522_v63  ;;  %2042 = vmatprep.mubr.bf16.mxu1 %v1524_v38  ;;  %v5715_v30 = vpack.c.bf16 %v1423_v27, %v1419_v59  ;;  %v1432_v18 = vmax.f32 %v6809_v50, 0.0  ;;  %v1425_v26 = vmax.f32 %v6810_v61, 0.0  ;;  %v1429_v6 = vmax.f32 %v6811_v33, 0.0  ;;  %v6814_v63 = vld [vmem:[#allocation18_spill] sm:$0xff] }
 0x22f   :  { %v5719_v11 = vpack.c.bf16 %v1430_v48, %v1426_v45  ;;  %v1427_v32 = vmax.f32 %v6812_v47, 0.0  ;;  %v1431_v1 = vmax.f32 %v6813_v5, 0.0  ;;  %v1434_v38 = vmax.f32 %v6814_v63, 0.0  ;;  %v6816_v27 = vld [vmem:[#allocation42_spill] sm:$0xff]  ;;  %v6817_v45 = vld [vmem:[#allocation20_spill] sm:$0xff] }
 0x230   :  { %v5724_v37 = vpack.c.bf16 %v1432_v18, %v1428_v15  ;;  %v1438_v3 = vmax.f32 %v5368_v54, 0.0  ;;  %v1436_v4 = vmax.f32 %v5360_v12, 0.0  ;;  %v5729_v62 = vpack.c.bf16 %v1429_v6, %v1425_v26  ;;  %v6818_v54 = vld [vmem:[#allocation22_spill] sm:$0xff]  ;;  %v6819_v26 = vld [vmem:[#allocation44_spill] sm:$0xff] }
 0x231   :  { %v5731_v7 = vpack.c.bf16 %v1431_v1, %v1427_v32  ;;  %v1440_v0 = vmax.f32 %v5376_v60, 0.0  ;;  %v1433_v59 = vmax.f32 %v6815_v57, 0.0  ;;  %v1437_v16 = vmax.f32 %v6816_v27, 0.0  ;;  %v6821_v32 = vld [vmem:[#allocation24_spill] sm:$0xff] }
 0x232   :  { %v5735_v22 = vpack.c.bf16 %v1438_v3, %v1434_v38  ;;  %v1435_v39 = vmax.f32 %v6817_v45, 0.0  ;;  %v1439_v48 = vmax.f32 %v5372_v36, 0.0  ;;  %v1442_v12 = vmax.f32 %v6818_v54, 0.0  ;;  %v6820_v36 = vld [vmem:[#allocation46_spill] sm:$0xff]  ;;  %v6822_v1 = vld [vmem:[#allocation28_spill] sm:$0xff] }
 0x233   :  { %v5740_v34 = vpack.c.bf16 %v1440_v0, %v1436_v4  ;;  %v1446_v15 = vmax.f32 %v5400_v25, 0.0  ;;  %v1444_v50 = vmax.f32 %v5392_v2, 0.0  ;;  %v5745_v18 = vpack.c.bf16 %v1437_v16, %v1433_v59  ;;  %v6823_v4 = vld [vmem:[#allocation26_spill] sm:$0xff] }
 0x234   :  { %v5747_v60 = vpack.c.bf16 %v1439_v48, %v1435_v39  ;;  %v1448_v61 = vmax.f32 %v5408_v43, 0.0  ;;  %v1441_v33 = vmax.f32 %v6819_v26, 0.0  ;;  %v1445_v47 = vmax.f32 %v6820_v36, 0.0  ;;  %v6829_v26 = vld [vmem:[#allocation54_spill] sm:$0xff] }
 0x235   :  { %1882 = vmatmul.mubr.bf16.gmra.mrb[56].mxu0 %v1521_v29  ;;  %2043 = vmatmul.mubr.bf16.gmra.mrb[88].mxu1 %v1523_v56  ;;  %v5751_v6 = vpack.c.bf16 %v1446_v15, %v1442_v12  ;;  %v1443_v5 = vmax.f32 %v6821_v32, 0.0  ;;  %v1447_v25 = vmax.f32 %v5404_v42, 0.0  ;;  %v1450_v63 = vmax.f32 %v6822_v1, 0.0  ;;  %v6824_v42 = vld [vmem:[#allocation52_spill] sm:$0xff]  ;;  %v6827_v12 = vld [vmem:[#allocation29_spill] sm:$0xff] }
 0x236   :  { %1889 = vmatprep.mubr.bf16.mxu0 %v1526_v20  ;;  %2050 = vmatprep.mubr.bf16.mxu1 %v1528_v41  ;;  %v5756_v2 = vpack.c.bf16 %v1448_v61, %v1444_v50  ;;  %v1454_v43 = vmax.f32 %v5432_v31, 0.0  ;;  %v1452_v38 = vmax.f32 %v5424_v9, 0.0  ;;  %v5761_v29 = vpack.c.bf16 %v1445_v47, %v1441_v33  ;;  %v6825_v41 = vld [vmem:[#allocation50_spill] sm:$0xff]  ;;  %v6828_v61 = vld [vmem:[#allocation56_spill] sm:$0xff] }
 0x237   :  { %v5763_v56 = vpack.c.bf16 %v1447_v25, %v1443_v5  ;;  %v1456_v3 = vmax.f32 %v5440_v40, 0.0  ;;  %v1449_v0 = vmax.f32 %v6823_v4, 0.0  ;;  %v1453_v20 = vmax.f32 %v6824_v42, 0.0  ;;  %v6826_v31 = vld [vmem:[#allocation30_spill] sm:$0xff] }
 0x238   :  { %v5767_v57 = vpack.c.bf16 %v1454_v43, %v1450_v63  ;;  %v1451_v59 = vmax.f32 %v6825_v41, 0.0  ;;  %v1455_v27 = vmax.f32 %v5436_v52, 0.0  ;;  %v1458_v9 = vmax.f32 %v6826_v31, 0.0  ;;  %v6831_v5 = vld [vmem:[#allocation58_spill] sm:$0xff]  ;;  %v6837_v41 = vld [vmem:[#allocation35_spill] sm:$0xff] }
 0x239   :  { %v5772_v16 = vpack.c.bf16 %v1456_v3, %v1452_v38  ;;  %v1462_v45 = vmax.f32 %v5464_v44, 0.0  ;;  %v1460_v39 = vmax.f32 %v5456_v28, 0.0  ;;  %v5777_v48 = vpack.c.bf16 %v1453_v20, %v1449_v0  ;;  %v6830_v44 = vld [vmem:[#allocation33_spill] sm:$0xff]  ;;  %v6832_v63 = vld [vmem:[#allocation62_spill] sm:$0xff]  ;;  %v6833_v38 = vld [vmem:[#allocation31_spill] sm:$0xff] }
 0x23a   :  { %v5779_v40 = vpack.c.bf16 %v1455_v27, %v1451_v59  ;;  %v1464_v54 = vmax.f32 %v5472_v51, 0.0  ;;  %v1457_v15 = vmax.f32 %v6827_v12, 0.0  ;;  %v1461_v52 = vmax.f32 %v6828_v61, 0.0  ;;  %v6834_v3 = vld [vmem:[#allocation60_spill] sm:$0xff]  ;;  %v6836_v42 = vld [vmem:[#allocation34_spill] sm:$0xff]  ;;  %v6838_v27 = vld [vmem:[#allocation39_spill] sm:$0xff] }
 0x23b   :  { %v5783_v50 = vpack.c.bf16 %v1462_v45, %v1458_v9  ;;  %v1459_v33 = vmax.f32 %v6829_v26, 0.0  ;;  %v1463_v36 = vmax.f32 %v5468_v19, 0.0  ;;  %v1466_v28 = vmax.f32 %v5480_v58, 0.0  ;;  %v6835_v0 = vld [vmem:[#allocation32_spill] sm:$0xff]  ;;  %v6839_v9 = vld [vmem:[#allocation66_spill] sm:$0xff] }
 0x23c   :  { %v5788_v47 = vpack.c.bf16 %v1464_v54, %v1460_v39  ;;  %v1470_v32 = vmax.f32 %v6830_v44, 0.0  ;;  %v1468_v25 = vmax.f32 %v6831_v5, 0.0  ;;  %v5795_v51 = vpack.c.bf16 %v1461_v52, %v1457_v15  ;;  %v6841_v12 = vld [vmem:[#allocation64_spill] sm:$0xff]  ;;  %v6845_v5 = vld [vmem:[#allocation43_spill] sm:$0xff] }
 0x23d   :  { %1890 = vmatmul.mubr.bf16.gmra.mrb[60].mxu0 %v5697_v21  ;;  %2051 = vmatmul.mubr.bf16.gmra.mrb[92].mxu1 %v5699_v24  ;;  %v5797_v1 = vpack.c.bf16 %v1463_v36, %v1459_v33  ;;  %v1472_v43 = vmax.f32 %v6832_v63, 0.0  ;;  %v1465_v19 = vmax.f32 %v6833_v38, 0.0  ;;  %v1469_v4 = vmax.f32 %v6834_v3, 0.0  ;;  %v6842_v52 = vld [vmem:[#allocation68_spill] sm:$0xff]  ;;  %v6843_v33 = vld [vmem:[#allocation37_spill] sm:$0xff]  ;;  %v6846_v63 = vld [vmem:[#allocation47_spill] sm:$0xff] }
 0x23e   :  { %1897 = vmatprep.mubr.bf16.mxu0 %v5703_v35  ;;  %2058 = vmatprep.mubr.bf16.mxu1 %v5708_v8  ;;  %v5803_v58 = vpack.c.bf16 %v1470_v32, %v1466_v28  ;;  %v1467_v21 = vmax.f32 %v6835_v0, 0.0  ;;  %v1471_v24 = vmax.f32 %v6836_v42, 0.0  ;;  %v1474_v59 = vmax.f32 %v6837_v41, 0.0  ;;  %v6840_v8 = vld [vmem:[#allocation70_spill] sm:$0xff]  ;;  %v6844_v28 = vld [vmem:[#allocation41_spill] sm:$0xff]  ;;  %v6848_v0 = vld [vmem:[#allocation79_spill] sm:$0xff] }
 0x23f   :  { %v5808_v20 = vpack.c.bf16 %v1472_v43, %v1468_v25  ;;  %v1478_v31 = vmax.f32 %v6838_v27, 0.0  ;;  %v1476_v45 = vmax.f32 %v6839_v9, 0.0  ;;  %v5813_v39 = vpack.c.bf16 %v1469_v4, %v1465_v19  ;;  %v6847_v38 = vld [vmem:[#allocation74_spill] sm:$0xff]  ;;  %v6849_v42 = vld [vmem:[#allocation72_spill] sm:$0xff] }
 0x240   :  { %v5815_v35 = vpack.c.bf16 %v1471_v24, %v1467_v21  ;;  %v1480_v54 = vmax.f32 %v6840_v8, 0.0  ;;  %v1473_v15 = vmax.f32 %v6841_v12, 0.0  ;;  %v1477_v26 = vmax.f32 %v6842_v52, 0.0  ;;  %v6853_v12 = vld [vmem:[#allocation51_spill] sm:$0xff] }
 0x241   :  { %v5819_v61 = vpack.c.bf16 %v1478_v31, %v1474_v59  ;;  %v1475_v36 = vmax.f32 %v6843_v33, 0.0  ;;  %v1479_v44 = vmax.f32 %v6844_v28, 0.0  ;;  %v1482_v25 = vmax.f32 %v6845_v5, 0.0  ;;  %v6850_v59 = vld [vmem:[#allocation76_spill] sm:$0xff]  ;;  %v6851_v31 = vld [vmem:[#allocation45_spill] sm:$0xff]  ;;  %v6854_v52 = vld [vmem:[#allocation59_spill] sm:$0xff] }
 0x242   :  { %v5824_v32 = vpack.c.bf16 %v1480_v54, %v1476_v45  ;;  %v1486_v43 = vmax.f32 %v6846_v63, 0.0  ;;  %v1484_v19 = vmax.f32 %v6847_v38, 0.0  ;;  %v5829_v3 = vpack.c.bf16 %v1477_v26, %v1473_v15  ;;  %v6852_v45 = vld [vmem:[#allocation49_spill] sm:$0xff]  ;;  %v6855_v33 = vld [vmem:[#allocation55_spill] sm:$0xff] }
 0x243   :  { %v5831_v4 = vpack.c.bf16 %v1479_v44, %v1475_v36  ;;  %v1488_v21 = vmax.f32 %v6848_v0, 0.0  ;;  %v1481_v24 = vmax.f32 %v6849_v42, 0.0  ;;  %v1485_v27 = vmax.f32 %v6850_v59, 0.0  ;;  %v6856_v5 = vld [vmem:[#allocation63_spill] sm:$0xff]  ;;  %v6857_v63 = vld [vmem:[#allocation81_spill] sm:$0xff] }
 0x244   :  { %v5835_v41 = vpack.c.bf16 %v1486_v43, %v1482_v25  ;;  %v1483_v9 = vmax.f32 %v6851_v31, 0.0  ;;  %v1487_v8 = vmax.f32 %v6852_v45, 0.0  ;;  %v1490_v15 = vmax.f32 %v6853_v12, 0.0  ;;  %v6861_v31 = vld [vmem:[#allocation67_spill] sm:$0xff] }
 0x245   :  { %1898 = vmatmul.mubr.bf16.gmra.mrb[64].mxu0 %v5713_v55  ;;  %2059 = vmatmul.mubr.bf16.gmra.mrb[96].mxu1 %v5715_v30  ;;  %v5842_v54 = vpack.c.bf16 %v1488_v21, %v1484_v19  ;;  %v1494_v26 = vmax.f32 %v6854_v52, 0.0  ;;  %v1492_v36 = vmax.f32 %v6855_v33, 0.0  ;;  %v1561_v28 = vpack.c.bf16 %v1485_v27, %v1481_v24  ;;  %v6858_v30 = vld [vmem:[#allocation57_spill] sm:$0xff] }
 0x246   :  { %1905 = vmatprep.mubr.bf16.mxu0 %v5719_v11  ;;  %2066 = vmatprep.mubr.bf16.mxu1 %v5724_v37  ;;  %v1563_v44 = vpack.c.bf16 %v1487_v8, %v1483_v9  ;;  %v1496_v25 = vmax.f32 %v6856_v5, 0.0  ;;  %v1489_v55 = vmax.f32 %v6857_v63, 0.0  ;;  %v1493_v38 = vmax.f32 %v6858_v30, 0.0  ;;  %v6859_v19 = vld [vmem:[#allocation53_spill] sm:$0xff]  ;;  %v6864_v30 = vld [vmem:[#allocation48_spill] sm:$0xff] }
 0x247   :  { %v1566_v43 = vpack.c.bf16 %v1494_v26, %v1490_v15  ;;  %v1491_v0 = vmax.f32 %v6859_v19, 0.0  ;;  %v6860_v21 = vld [vmem:[#allocation61_spill] sm:$0xff]  ;;  %v1498_v45 = vmax.f32 %v6861_v31, 0.0  ;;  %v1502_v11 = vmax.f32 %v5624_v46, 0.0 }
 0x248   :  { %v1495_v42 = vmax.f32 %v6860_v21, 0.0  ;;  %v1568_v59 = vpack.c.bf16 %v1496_v25, %v1492_v36  ;;  %v1500_v37 = vmax.f32 %v5616_v17, 0.0  ;;  %v1565_v24 = vpack.c.bf16 %v1493_v38, %v1489_v55  ;;  %v6862_v8 = vld [vmem:[#allocation65_spill] sm:$0xff]  ;;  %v6865_v38 = vld [vmem:[#allocation71_spill] sm:$0xff] }
 0x249   :  { %v1504_v9 = vmax.f32 %v5632_v10, 0.0  ;;  %v1497_v12 = vmax.f32 %v6862_v8, 0.0  ;;  %v1570_v15 = vpack.c.bf16 %v1502_v11, %v1498_v45  ;;  %v1501_v52 = vmax.f32 %v5620_v49, 0.0  ;;  %v6863_v26 = vld [vmem:[#allocation69_spill] sm:$0xff] }
 0x24a   :  { %v1567_v27 = vpack.c.bf16 %v1495_v42, %v1491_v0  ;;  %v1499_v33 = vmax.f32 %v6863_v26, 0.0  ;;  %v1503_v5 = vmax.f32 %v5628_v14, 0.0  ;;  %v1506_v25 = vmax.f32 %v5640_v23, 0.0  ;;  %v6866_v0 = vld [vmem:[#allocation75_spill] sm:$0xff]  ;;  %v6867_v21 = vld [vmem:[#allocation73_spill] sm:$0xff] }
 0x24b   :  { %v1572_v36 = vpack.c.bf16 %v1504_v9, %v1500_v37  ;;  %v1510_v46 = vmax.f32 %v5656_v13, 0.0  ;;  %v1508_v17 = vmax.f32 %v5648_v53, 0.0  ;;  %v1569_v63 = vpack.c.bf16 %v1501_v52, %v1497_v12  ;;  %v6868_v23 = vld [vmem:[#allocation77_spill] sm:$0xff] }
 0x24c   :  { %v1571_v55 = vpack.c.bf16 %v1503_v5, %v1499_v33  ;;  %v1512_v10 = vmax.f32 %v6864_v30, 0.0  ;;  %v1505_v19 = vmax.f32 %v6865_v38, 0.0  ;;  %v1509_v14 = vmax.f32 %v6866_v0, 0.0 }
 0x24d   :  { %1906 = vmatmul.mubr.bf16.gmra.mrb[68].mxu0 %v5729_v62  ;;  %2067 = vmatmul.mubr.bf16.gmra.mrb[100].mxu1 %v5731_v7  ;;  %v1574_v49 = vpack.c.bf16 %v1510_v46, %v1506_v25  ;;  %v1507_v42 = vmax.f32 %v6867_v21, 0.0  ;;  %v1511_v31 = vmax.f32 %v6868_v23, 0.0  ;;  %v3349_v62 = vld [vmem:[#allocation2] sm:$0xff]   ;;  %v3350_v7 = vld [vmem:[#allocation2 + $0x8] sm:$0xff]  }
 0x24e   :  { %1913 = vmatprep.mubr.bf16.mxu0 %v5735_v22  ;;  %2074 = vmatprep.mubr.bf16.mxu1 %v5740_v34  ;;  %v1576_v53 = vpack.c.bf16 %v1512_v10, %v1508_v17  ;;  %v1573_v13 = vpack.c.bf16 %v1509_v14, %v1505_v19  ;;  %v3351_v22 = vld [vmem:[#allocation2 + $0x10] sm:$0xff]   ;;  %v3352_v34 = vld [vmem:[#allocation2 + $0x18] sm:$0xff]  }
 0x24f   :  { %v1575_v45 = vpack.c.bf16 %v1511_v31, %v1507_v42  ;;  %3248 = vmatprep.subr.bf16.mxu0 %v3349_v62 }
 0x250   :  { %3249 = vmatpush3.bf16.msra.mxu0 %v3349_v62 }
 0x251   :  { %3250 = vmatprep.subr.bf16.mxu0 %v3350_v7 }
 0x254   :  { %3251 = vmatpush3.bf16.msra.mxu0 %v3350_v7 }
 0x255   :  { %1914 = vmatmul.mubr.bf16.gmra.mrb[72].mxu0 %v5745_v18  ;;  %2075 = vmatmul.mubr.bf16.gmra.mrb[104].mxu1 %v5747_v60 }
 0x256   :  { %1921 = vmatprep.mubr.bf16.mxu0 %v5751_v6  ;;  %2082 = vmatprep.mubr.bf16.mxu1 %v5756_v2  ;;  %v3353_v6 = vld [vmem:[#allocation2 + $0x20] sm:$0xff]  }
 0x257   :  { %3252 = vmatprep.subr.bf16.mxu0 %v3351_v22 }
 0x258   :  { %3253 = vmatpush3.bf16.msra.mxu0 %v3351_v22 }
 0x259   :  { %3254 = vmatprep.subr.bf16.mxu0 %v3352_v34 }
 0x25c   :  { %3255 = vmatpush3.bf16.msra.mxu0 %v3352_v34 }
 0x25d   :  { %1922 = vmatmul.mubr.bf16.gmra.mrb[76].mxu0 %v5761_v29  ;;  %2083 = vmatmul.mubr.bf16.gmra.mrb[108].mxu1 %v5763_v56 }
 0x25e   :  { %1929 = vmatprep.mubr.bf16.mxu0 %v5767_v57  ;;  %2090 = vmatprep.mubr.bf16.mxu1 %v5772_v16 }
 0x25f   :  { %3256 = vmatprep.subr.bf16.mxu0 %v3353_v6 }
 0x260   :  { %3257 = vmatpush3.bf16.msra.mxu0 %v3353_v6 }
 0x265   :  { %1930 = vmatmul.mubr.bf16.gmra.mrb[80].mxu0 %v5777_v48  ;;  %2091 = vmatmul.mubr.bf16.gmra.mrb[112].mxu1 %v5779_v40 }
 0x266   :  { %1937 = vmatprep.mubr.bf16.mxu0 %v5783_v50  ;;  %2098 = vmatprep.mubr.bf16.mxu1 %v5788_v47 }
 0x26d   :  { %1938 = vmatmul.mubr.bf16.gmra.mrb[84].mxu0 %v5795_v51  ;;  %2099 = vmatmul.mubr.bf16.gmra.mrb[116].mxu1 %v5797_v1 }
 0x26e   :  { %1945 = vmatprep.mubr.bf16.mxu0 %v5803_v58  ;;  %2106 = vmatprep.mubr.bf16.mxu1 %v5808_v20 }
 0x275   :  { %1946 = vmatmul.mubr.bf16.gmra.mrb[88].mxu0 %v5813_v39  ;;  %2107 = vmatmul.mubr.bf16.gmra.mrb[120].mxu1 %v5815_v35 }
 0x276   :  { %1953 = vmatprep.mubr.bf16.mxu0 %v5819_v61  ;;  %2114 = vmatprep.mubr.bf16.mxu1 %v5824_v32 }
 0x27d   :  { %1954 = vmatmul.mubr.bf16.gmra.mrb[92].mxu0 %v5829_v3  ;;  %2115 = vmatmul.mubr.bf16.gmra.mrb[124].mxu1 %v5831_v4 }
 0x27e   :  { %1961 = vmatprep.mubr.bf16.mxu0 %v5835_v41  ;;  %2122 = vmatprep.mubr.bf16.mxu1 %v5842_v54 }
 0x285   :  { %1962 = vmatmul.mubr.bf16.gmra.mrb[96].mxu0 %v1561_v28  ;;  %2123 = vmatmul.mubr.bf16.gmra.mrb[128].mxu1 %v1563_v44 }
 0x286   :  { %1969 = vmatprep.mubr.bf16.mxu0 %v1566_v43  ;;  %2130 = vmatprep.mubr.bf16.mxu1 %v1568_v59 }
 0x28d   :  { %1970 = vmatmul.mubr.bf16.gmra.mrb[100].mxu0 %v1565_v24  ;;  %2131 = vmatmul.mubr.bf16.gmra.mrb[132].mxu1 %v1567_v27 }
 0x28e   :  { %1977 = vmatprep.mubr.bf16.mxu0 %v1570_v15  ;;  %2138 = vmatprep.mubr.bf16.mxu1 %v1572_v36 }
 0x295   :  { %1978 = vmatmul.mubr.bf16.gmra.mrb[104].mxu0 %v1569_v63  ;;  %2139 = vmatmul.mubr.bf16.gmra.mrb[136].mxu1 %v1571_v55 }
 0x296   :  { %1985 = vmatprep.mubr.bf16.mxu0 %v1574_v49  ;;  %2146 = vmatprep.mubr.bf16.mxu1 %v1576_v53 }
 0x29d   :  { %1986 = vmatmul.mubr.bf16.gmra.mrb[108].mxu0 %v1573_v13  ;;  %2147 = vmatmul.mubr.bf16.gmra.mrb[140].mxu1 %v1575_v45 }
 0x2f8   :  { %v3016_v18 = vpop.f32.mrb[48].mxu0  ;;  %v3128_v60 = vpop.f32.mrb[80].mxu1 }
 0x2f9   :  { %v3017_v2 = vpop.f32.mrb[49].mxu0  ;;  %v3129_v29 = vpop.f32.mrb[81].mxu1 }
 0x2fa   :  { %v3018_v56 = vadd.f32 %v3017_v2, %v3016_v18  ;;  %v3130_v57 = vadd.f32 %v3129_v29, %v3128_v60  ;;  %v3019_v16 = vpop.f32.mrb[50].mxu0  ;;  %v3131_v48 = vpop.f32.mrb[82].mxu1 }
 0x2fb   :  { %v3020_v40 = vpop.f32.mrb[51].mxu0  ;;  %v3132_v50 = vpop.f32.mrb[83].mxu1 }
 0x2fc   :  { %v5898_v47 = vadd.f32 %v3130_v57, %v3018_v56  ;;  %v3021_v51 = vadd.f32 %v3020_v40, %v3019_v16  ;;  %v3133_v1 = vadd.f32 %v3132_v50, %v3131_v48 }
 0x2fe   :  { %v5900_v58 = vadd.f32 %v3133_v1, %v3021_v51  ;;  %v2193_v6 = vmul.f32 %v5898_v47, %v5898_v47 }
 0x300   :  { %v3022_v20 = vpop.f32.mrb[52].mxu0  ;;  %v3134_v39 = vpop.f32.mrb[84].mxu1  ;;  %v2194_v45 = vmul.f32 %v5900_v58, %v5900_v58  ;;  %v2155_v57 = vadd.f32 %v5900_v58, %v5898_v47 }
 0x301   :  { %v3023_v35 = vpop.f32.mrb[53].mxu0  ;;  %v3135_v61 = vpop.f32.mrb[85].mxu1 }
 0x302   :  { %v3024_v32 = vadd.f32 %v3023_v35, %v3022_v20  ;;  %v3136_v3 = vadd.f32 %v3135_v61, %v3134_v39  ;;  %v3025_v4 = vpop.f32.mrb[54].mxu0  ;;  %v3137_v41 = vpop.f32.mrb[86].mxu1  ;;  %v2225_v50 = vadd.f32 %v2194_v45, %v2193_v6 }
 0x303   :  { %v3026_v54 = vpop.f32.mrb[55].mxu0  ;;  %v3138_v28 = vpop.f32.mrb[87].mxu1 }
 0x304   :  { %v5902_v44 = vadd.f32 %v3136_v3, %v3024_v32  ;;  %v3027_v43 = vadd.f32 %v3026_v54, %v3025_v4  ;;  %v3139_v59 = vadd.f32 %v3138_v28, %v3137_v41 }
 0x306   :  { %v5904_v11 = vadd.f32 %v3139_v59, %v3027_v43  ;;  %v2195_v2 = vmul.f32 %v5902_v44, %v5902_v44  ;;  %v2156_v51 = vadd.f32 %v2155_v57, %v5902_v44 }
 0x308   :  { %v3028_v37 = vpop.f32.mrb[56].mxu0  ;;  %v3140_v24 = vpop.f32.mrb[88].mxu1  ;;  %v2226_v20 = vadd.f32 %v2225_v50, %v2195_v2  ;;  %v2196_v39 = vmul.f32 %v5904_v11, %v5904_v11  ;;  %v2157_v41 = vadd.f32 %v2156_v51, %v5904_v11 }
 0x309   :  { %v3029_v27 = vpop.f32.mrb[57].mxu0  ;;  %v3141_v9 = vpop.f32.mrb[89].mxu1 }
 0x30a   :  { %v3030_v8 = vadd.f32 %v3029_v27, %v3028_v37  ;;  %v3142_v12 = vadd.f32 %v3141_v9, %v3140_v24  ;;  %v3031_v15 = vpop.f32.mrb[58].mxu0  ;;  %v3143_v52 = vpop.f32.mrb[90].mxu1  ;;  %v2227_v37 = vadd.f32 %v2226_v20, %v2196_v39 }
 0x30b   :  { %v3032_v26 = vpop.f32.mrb[59].mxu0  ;;  %v3144_v33 = vpop.f32.mrb[91].mxu1 }
 0x30c   :  { %v5906_v5 = vadd.f32 %v3142_v12, %v3030_v8  ;;  %v3033_v36 = vadd.f32 %v3032_v26, %v3031_v15  ;;  %v3145_v25 = vadd.f32 %v3144_v33, %v3143_v52 }
 0x30e   :  { %v5908_v46 = vadd.f32 %v3145_v25, %v3033_v36  ;;  %v2197_v32 = vmul.f32 %v5906_v5, %v5906_v5  ;;  %v2158_v9 = vadd.f32 %v2157_v41, %v5906_v5 }
 0x310   :  { %v3034_v17 = vpop.f32.mrb[60].mxu0  ;;  %v3146_v63 = vpop.f32.mrb[92].mxu1  ;;  %v2228_v52 = vadd.f32 %v2227_v37, %v2197_v32  ;;  %v2198_v26 = vmul.f32 %v5908_v46, %v5908_v46  ;;  %v2159_v25 = vadd.f32 %v2158_v9, %v5908_v46 }
 0x311   :  { %v3035_v55 = vpop.f32.mrb[61].mxu0  ;;  %v3147_v30 = vpop.f32.mrb[93].mxu1 }
 0x312   :  { %v3036_v10 = vadd.f32 %v3035_v55, %v3034_v17  ;;  %v3148_v38 = vadd.f32 %v3147_v30, %v3146_v63  ;;  %v3037_v19 = vpop.f32.mrb[62].mxu0  ;;  %v3149_v49 = vpop.f32.mrb[94].mxu1  ;;  %v2229_v55 = vadd.f32 %v2228_v52, %v2198_v26 }
 0x313   :  { %v3038_v0 = vpop.f32.mrb[63].mxu0  ;;  %v3150_v14 = vpop.f32.mrb[95].mxu1 }
 0x314   :  { %v5910_v21 = vadd.f32 %v3148_v38, %v3036_v10  ;;  %v3039_v42 = vadd.f32 %v3038_v0, %v3037_v19  ;;  %v3151_v23 = vadd.f32 %v3150_v14, %v3149_v49 }
 0x316   :  { %v5912_v31 = vadd.f32 %v3151_v23, %v3039_v42  ;;  %v2199_v36 = vmul.f32 %v5910_v21, %v5910_v21  ;;  %v2160_v38 = vadd.f32 %v2159_v25, %v5910_v21 }
 0x318   :  { %v3040_v53 = vpop.f32.mrb[64].mxu0  ;;  %v3152_v13 = vpop.f32.mrb[96].mxu1  ;;  %v2230_v42 = vadd.f32 %v2229_v55, %v2199_v36  ;;  %v2200_v23 = vmul.f32 %v5912_v31, %v5912_v31 }
 0x319   :  { %v3041_v62 = vpop.f32.mrb[65].mxu0  ;;  %v3153_v7 = vpop.f32.mrb[97].mxu1 }
 0x31a   :  { %v3042_v22 = vadd.f32 %v3041_v62, %v3040_v53  ;;  %v3154_v34 = vadd.f32 %v3153_v7, %v3152_v13  ;;  %v3043_v18 = vpop.f32.mrb[66].mxu0  ;;  %v3155_v60 = vpop.f32.mrb[98].mxu1 }
 0x31b   :  { %v3044_v29 = vpop.f32.mrb[67].mxu0  ;;  %v3156_v56 = vpop.f32.mrb[99].mxu1 }
 0x31c   :  { %v5922_v16 = vadd.f32 %v3154_v34, %v3042_v22  ;;  %v3045_v48 = vadd.f32 %v3044_v29, %v3043_v18  ;;  %v3157_v40 = vadd.f32 %v3156_v56, %v3155_v60  ;;  %v2161_v34 = vadd.f32 %v2160_v38, %v5912_v31 }
 0x31d   :  { %v2231_v60 = vadd.f32 %v2230_v42, %v2200_v23 }
 0x31e   :  { %v5925_v1 = vadd.f32 %v3157_v40, %v3045_v48  ;;  %v2201_v22 = vmul.f32 %v5922_v16, %v5922_v16  ;;  %v2162_v6 = vadd.f32 %v2161_v34, %v5922_v16 }
 0x320   :  { %v3046_v35 = vpop.f32.mrb[68].mxu0  ;;  %v3158_v61 = vpop.f32.mrb[100].mxu1  ;;  %v2232_v56 = vadd.f32 %v2231_v60, %v2201_v22  ;;  %v2202_v57 = vmul.f32 %v5925_v1, %v5925_v1 }
 0x321   :  { %v3047_v3 = vpop.f32.mrb[69].mxu0  ;;  %v3159_v4 = vpop.f32.mrb[101].mxu1 }
 0x322   :  { %v3048_v54 = vadd.f32 %v3047_v3, %v3046_v35  ;;  %v3160_v28 = vadd.f32 %v3159_v4, %v3158_v61  ;;  %v3049_v43 = vpop.f32.mrb[70].mxu0  ;;  %v3161_v59 = vpop.f32.mrb[102].mxu1  ;;  %v2163_v3 = vadd.f32 %v2162_v6, %v5925_v1 }
 0x323   :  { %v3050_v24 = vpop.f32.mrb[71].mxu0  ;;  %v3162_v27 = vpop.f32.mrb[103].mxu1 }
 0x324   :  { %v5933_v8 = vadd.f32 %v3160_v28, %v3048_v54  ;;  %v3051_v12 = vadd.f32 %v3050_v24, %v3049_v43  ;;  %v3163_v15 = vadd.f32 %v3162_v27, %v3161_v59  ;;  %v2233_v28 = vadd.f32 %v2232_v56, %v2202_v57 }
 0x326   :  { %v5937_v33 = vadd.f32 %v3163_v15, %v3051_v12  ;;  %v2203_v35 = vmul.f32 %v5933_v8, %v5933_v8  ;;  %v2164_v43 = vadd.f32 %v2163_v3, %v5933_v8 }
 0x328   :  { %v3052_v17 = vpop.f32.mrb[72].mxu0  ;;  %v3164_v63 = vpop.f32.mrb[104].mxu1  ;;  %v2234_v37 = vadd.f32 %v2233_v28, %v2203_v35  ;;  %v2204_v24 = vmul.f32 %v5937_v33, %v5937_v33  ;;  %v2165_v26 = vadd.f32 %v2164_v43, %v5937_v33 }
 0x329   :  { %v3053_v30 = vpop.f32.mrb[73].mxu0  ;;  %v3165_v10 = vpop.f32.mrb[105].mxu1 }
 0x32a   :  { %v3054_v19 = vadd.f32 %v3053_v30, %v3052_v17  ;;  %v3166_v49 = vadd.f32 %v3165_v10, %v3164_v63  ;;  %v3055_v0 = vpop.f32.mrb[74].mxu0  ;;  %v3167_v14 = vpop.f32.mrb[106].mxu1  ;;  %v2235_v55 = vadd.f32 %v2234_v37, %v2204_v24 }
 0x32b   :  { %v3056_v53 = vpop.f32.mrb[75].mxu0  ;;  %v3168_v13 = vpop.f32.mrb[107].mxu1 }
 0x32c   :  { %v5945_v45 = vadd.f32 %v3166_v49, %v3054_v19  ;;  %v3057_v62 = vadd.f32 %v3056_v53, %v3055_v0  ;;  %v3169_v7 = vadd.f32 %v3168_v13, %v3167_v14 }
 0x32e   :  { %v5950_v18 = vadd.f32 %v3169_v7, %v3057_v62  ;;  %v2205_v12 = vmul.f32 %v5945_v45, %v5945_v45  ;;  %v2166_v38 = vadd.f32 %v2165_v26, %v5945_v45 }
 0x330   :  { %v3058_v2 = vpop.f32.mrb[76].mxu0  ;;  %v3170_v29 = vpop.f32.mrb[108].mxu1  ;;  %v2236_v14 = vadd.f32 %v2235_v55, %v2205_v12  ;;  %v2206_v42 = vmul.f32 %v5950_v18, %v5950_v18  ;;  %v2167_v13 = vadd.f32 %v2166_v38, %v5950_v18  ;;  %v3355_v55 = vld [vmem:[#allocation2 + $0x30] sm:$0xff]  }
 0x331   :  { %v3059_v48 = vpop.f32.mrb[77].mxu0  ;;  %v3171_v40 = vpop.f32.mrb[109].mxu1 }
 0x332   :  { %v3060_v50 = vadd.f32 %v3059_v48, %v3058_v2  ;;  %v3172_v51 = vadd.f32 %v3171_v40, %v3170_v29  ;;  %v3061_v20 = vpop.f32.mrb[78].mxu0  ;;  %v3173_v39 = vpop.f32.mrb[110].mxu1  ;;  %v2237_v22 = vadd.f32 %v2236_v14, %v2206_v42 }
 0x333   :  { %v3062_v61 = vpop.f32.mrb[79].mxu0  ;;  %v3174_v32 = vpop.f32.mrb[111].mxu1 }
 0x334   :  { %v5958_v4 = vadd.f32 %v3172_v51, %v3060_v50  ;;  %v3063_v41 = vadd.f32 %v3062_v61, %v3061_v20  ;;  %v3175_v54 = vadd.f32 %v3174_v32, %v3173_v39 }
 0x336   :  { %v5961_v59 = vadd.f32 %v3175_v54, %v3063_v41  ;;  %v2207_v53 = vmul.f32 %v5958_v4, %v5958_v4  ;;  %v2168_v6 = vadd.f32 %v2167_v13, %v5958_v4 }
 0x338   :  { %v3064_v27 = vpop.f32.mrb[80].mxu0  ;;  %v3176_v9 = vpop.f32.mrb[112].mxu1  ;;  %v2238_v48 = vadd.f32 %v2237_v22, %v2207_v53  ;;  %v2208_v40 = vmul.f32 %v5961_v59, %v5961_v59  ;;  %v2169_v32 = vadd.f32 %v2168_v6, %v5961_v59 }
 0x339   :  { %v3065_v15 = vpop.f32.mrb[81].mxu0  ;;  %v3177_v52 = vpop.f32.mrb[113].mxu1 }
 0x33a   :  { %v3066_v36 = vadd.f32 %v3065_v15, %v3064_v27  ;;  %v3178_v25 = vadd.f32 %v3177_v52, %v3176_v9  ;;  %v3067_v17 = vpop.f32.mrb[82].mxu0  ;;  %v3179_v63 = vpop.f32.mrb[114].mxu1  ;;  %v2239_v41 = vadd.f32 %v2238_v48, %v2208_v40 }
 0x33b   :  { %v3068_v30 = vpop.f32.mrb[83].mxu0  ;;  %v3180_v10 = vpop.f32.mrb[115].mxu1 }
 0x33c   :  { %v5969_v19 = vadd.f32 %v3178_v25, %v3066_v36  ;;  %v3069_v49 = vadd.f32 %v3068_v30, %v3067_v17  ;;  %v3181_v0 = vadd.f32 %v3180_v10, %v3179_v63  ;;  %v3354_v63 = vld [vmem:[#allocation2 + $0x28] sm:$0xff]  }
 0x33d   :  { %3258 = vmatprep.subr.bf16.mxu0 %v3354_v63 }
 0x33e   :  { %v5973_v23 = vadd.f32 %v3181_v0, %v3069_v49  ;;  %v2209_v61 = vmul.f32 %v5969_v19, %v5969_v19  ;;  %v2170_v54 = vadd.f32 %v2169_v32, %v5969_v19  ;;  %3259 = vmatpush3.bf16.msra.mxu0 %v3354_v63 }
 0x33f   :  { %3260 = vmatprep.subr.bf16.mxu0 %v3355_v55 }
 0x340   :  { %v3070_v62 = vpop.f32.mrb[84].mxu0  ;;  %v3182_v7 = vpop.f32.mrb[116].mxu1  ;;  %v2240_v37 = vadd.f32 %v2239_v41, %v2209_v61  ;;  %v2210_v24 = vmul.f32 %v5973_v23, %v5973_v23  ;;  %v2171_v30 = vadd.f32 %v2170_v54, %v5973_v23 }
 0x341   :  { %v3071_v34 = vpop.f32.mrb[85].mxu0  ;;  %v3183_v60 = vpop.f32.mrb[117].mxu1 }
 0x342   :  { %v3072_v2 = vadd.f32 %v3071_v34, %v3070_v62  ;;  %v3184_v29 = vadd.f32 %v3183_v60, %v3182_v7  ;;  %v3073_v56 = vpop.f32.mrb[86].mxu0  ;;  %v3185_v57 = vpop.f32.mrb[118].mxu1  ;;  %v2241_v0 = vadd.f32 %v2240_v37, %v2210_v24  ;;  %v3356_v62 = vld [vmem:[#allocation2 + $0x38] sm:$0xff]   ;;  %3261 = vmatpush3.bf16.msra.mxu0 %v3355_v55 }
 0x343   :  { %v3074_v50 = vpop.f32.mrb[87].mxu0  ;;  %v3186_v51 = vpop.f32.mrb[119].mxu1  ;;  %3262 = vmatprep.subr.bf16.mxu0 %v3356_v62 }
 0x344   :  { %v5981_v20 = vadd.f32 %v3184_v29, %v3072_v2  ;;  %v3075_v39 = vadd.f32 %v3074_v50, %v3073_v56  ;;  %v3187_v35 = vadd.f32 %v3186_v51, %v3185_v57 }
 0x346   :  { %v5986_v3 = vadd.f32 %v3187_v35, %v3075_v39  ;;  %v2211_v36 = vmul.f32 %v5981_v20, %v5981_v20  ;;  %v2172_v14 = vadd.f32 %v2171_v30, %v5981_v20  ;;  %3263 = vmatpush3.bf16.msra.mxu0 %v3356_v62 }
 0x348   :  { %v3076_v28 = vpop.f32.mrb[88].mxu0  ;;  %v3188_v43 = vpop.f32.mrb[120].mxu1  ;;  %v2242_v53 = vadd.f32 %v2241_v0, %v2211_v36  ;;  %v2212_v13 = vmul.f32 %v5986_v3, %v5986_v3  ;;  %v2173_v2 = vadd.f32 %v2172_v14, %v5986_v3 }
 0x349   :  { %v3077_v27 = vpop.f32.mrb[89].mxu0  ;;  %v3189_v9 = vpop.f32.mrb[121].mxu1 }
 0x34a   :  { %v3078_v12 = vadd.f32 %v3077_v27, %v3076_v28  ;;  %v3190_v15 = vadd.f32 %v3189_v9, %v3188_v43  ;;  %v3079_v52 = vpop.f32.mrb[90].mxu0  ;;  %v3191_v26 = vpop.f32.mrb[122].mxu1  ;;  %v2243_v40 = vadd.f32 %v2242_v53, %v2212_v13 }
 0x34b   :  { %v3080_v25 = vpop.f32.mrb[91].mxu0  ;;  %v3192_v17 = vpop.f32.mrb[123].mxu1 }
 0x34c   :  { %v5994_v10 = vadd.f32 %v3190_v15, %v3078_v12  ;;  %v3081_v38 = vadd.f32 %v3080_v25, %v3079_v52  ;;  %v3193_v49 = vadd.f32 %v3192_v17, %v3191_v26 }
 0x34e   :  { %v5997_v42 = vadd.f32 %v3193_v49, %v3081_v38  ;;  %v2213_v34 = vmul.f32 %v5994_v10, %v5994_v10  ;;  %v2174_v39 = vadd.f32 %v2173_v2, %v5994_v10 }
 0x350   :  { %v3082_v7 = vpop.f32.mrb[92].mxu0  ;;  %v3194_v22 = vpop.f32.mrb[124].mxu1  ;;  %v2244_v41 = vadd.f32 %v2243_v40, %v2213_v34  ;;  %v2214_v54 = vmul.f32 %v5997_v42, %v5997_v42  ;;  %v2175_v37 = vadd.f32 %v2174_v39, %v5997_v42 }
 0x351   :  { %v3083_v60 = vpop.f32.mrb[93].mxu0  ;;  %v3195_v6 = vpop.f32.mrb[125].mxu1 }
 0x352   :  { %v3084_v29 = vadd.f32 %v3083_v60, %v3082_v7  ;;  %v3196_v56 = vadd.f32 %v3195_v6, %v3194_v22  ;;  %v3085_v57 = vpop.f32.mrb[94].mxu0  ;;  %v3197_v48 = vpop.f32.mrb[126].mxu1  ;;  %v2245_v9 = vadd.f32 %v2244_v41, %v2214_v54 }
 0x353   :  { %v3086_v50 = vpop.f32.mrb[95].mxu0  ;;  %v3198_v51 = vpop.f32.mrb[127].mxu1 }
 0x354   :  { %v6005_v35 = vadd.f32 %v3196_v56, %v3084_v29  ;;  %v3087_v61 = vadd.f32 %v3086_v50, %v3085_v57  ;;  %v3199_v32 = vadd.f32 %v3198_v51, %v3197_v48 }
 0x356   :  { %v6009_v28 = vadd.f32 %v3199_v32, %v3087_v61  ;;  %v2215_v43 = vmul.f32 %v6005_v35, %v6005_v35  ;;  %v2176_v52 = vadd.f32 %v2175_v37, %v6005_v35 }
 0x358   :  { %v3088_v24 = vpop.f32.mrb[96].mxu0  ;;  %v3200_v27 = vpop.f32.mrb[128].mxu1  ;;  %v2246_v63 = vadd.f32 %v2245_v9, %v2215_v43  ;;  %v2216_v38 = vmul.f32 %v6009_v28, %v6009_v28  ;;  %v2177_v53 = vadd.f32 %v2176_v52, %v6009_v28 }
 0x359   :  { %v3089_v12 = vpop.f32.mrb[97].mxu0  ;;  %v3201_v15 = vpop.f32.mrb[129].mxu1 }
 0x35a   :  { %v3090_v26 = vadd.f32 %v3089_v12, %v3088_v24  ;;  %v3202_v36 = vadd.f32 %v3201_v15, %v3200_v27  ;;  %v3091_v25 = vpop.f32.mrb[98].mxu0  ;;  %v3203_v17 = vpop.f32.mrb[130].mxu1  ;;  %v2247_v7 = vadd.f32 %v2246_v63, %v2216_v38 }
 0x35b   :  { %v3092_v55 = vpop.f32.mrb[99].mxu0  ;;  %v3204_v30 = vpop.f32.mrb[131].mxu1 }
 0x35c   :  { %v6017_v49 = vadd.f32 %v3202_v36, %v3090_v26  ;;  %v3093_v0 = vadd.f32 %v3092_v55, %v3091_v25  ;;  %v3205_v14 = vadd.f32 %v3204_v30, %v3203_v17 }
 0x35e   :  { %v2217_v13 = vmul.f32 %v6017_v49, %v6017_v49  ;;  %v6022_v62 = vadd.f32 %v3205_v14, %v3093_v0  ;;  %v2178_v22 = vadd.f32 %v2177_v53, %v6017_v49 }
 0x360   :  { %v3094_v34 = vpop.f32.mrb[100].mxu0  ;;  %v3206_v60 = vpop.f32.mrb[132].mxu1  ;;  %v2248_v29 = vadd.f32 %v2247_v7, %v2217_v13  ;;  %v2218_v56 = vmul.f32 %v6022_v62, %v6022_v62  ;;  %v2179_v61 = vadd.f32 %v2178_v22, %v6022_v62 }
 0x361   :  { %v3095_v6 = vpop.f32.mrb[101].mxu0  ;;  %v3207_v2 = vpop.f32.mrb[133].mxu1 }
 0x362   :  { %v3096_v57 = vadd.f32 %v3095_v6, %v3094_v34  ;;  %v3208_v48 = vadd.f32 %v3207_v2, %v3206_v60  ;;  %v3097_v40 = vpop.f32.mrb[102].mxu0  ;;  %v3209_v50 = vpop.f32.mrb[134].mxu1  ;;  %v2249_v43 = vadd.f32 %v2248_v29, %v2218_v56 }
 0x363   :  { %v3098_v51 = vpop.f32.mrb[103].mxu0  ;;  %v3210_v39 = vpop.f32.mrb[135].mxu1 }
 0x364   :  { %v6028_v32 = vadd.f32 %v3208_v48, %v3096_v57  ;;  %v3099_v41 = vadd.f32 %v3098_v51, %v3097_v40  ;;  %v3211_v54 = vadd.f32 %v3210_v39, %v3209_v50 }
 0x366   :  { %v2180_v37 = vadd.f32 %v2179_v61, %v6028_v32  ;;  %v2219_v24 = vmul.f32 %v6028_v32, %v6028_v32  ;;  %v6033_v27 = vadd.f32 %v3211_v54, %v3099_v41 }
 0x368   :  { %v2250_v9 = vadd.f32 %v2249_v43, %v2219_v24  ;;  %v2181_v12 = vadd.f32 %v2180_v37, %v6033_v27  ;;  %v2220_v15 = vmul.f32 %v6033_v27, %v6033_v27  ;;  %v3100_v52 = vpop.f32.mrb[104].mxu0  ;;  %v3212_v26 = vpop.f32.mrb[136].mxu1 }
 0x369   :  { %v3101_v36 = vpop.f32.mrb[105].mxu0  ;;  %v3213_v25 = vpop.f32.mrb[137].mxu1 }
 0x36a   :  { %v2251_v17 = vadd.f32 %v2250_v9, %v2220_v15  ;;  %v3102_v63 = vadd.f32 %v3101_v36, %v3100_v52  ;;  %v3214_v55 = vadd.f32 %v3213_v25, %v3212_v26  ;;  %v3103_v30 = vpop.f32.mrb[106].mxu0  ;;  %v3215_v38 = vpop.f32.mrb[138].mxu1 }
 0x36b   :  { %v3104_v0 = vpop.f32.mrb[107].mxu0  ;;  %v3216_v14 = vpop.f32.mrb[139].mxu1 }
 0x36c   :  { %v6038_v53 = vadd.f32 %v3214_v55, %v3102_v63  ;;  %v3105_v13 = vadd.f32 %v3104_v0, %v3103_v30  ;;  %v3217_v7 = vadd.f32 %v3216_v14, %v3215_v38 }
 0x36e   :  { %v2182_v22 = vadd.f32 %v2181_v12, %v6038_v53  ;;  %v2221_v34 = vmul.f32 %v6038_v53, %v6038_v53  ;;  %v6043_v60 = vadd.f32 %v3217_v7, %v3105_v13 }
 0x370   :  { %v2252_v6 = vadd.f32 %v2251_v17, %v2221_v34  ;;  %v2183_v2 = vadd.f32 %v2182_v22, %v6043_v60  ;;  %v2222_v29 = vmul.f32 %v6043_v60, %v6043_v60  ;;  %v3106_v56 = vpop.f32.mrb[108].mxu0  ;;  %v3218_v57 = vpop.f32.mrb[140].mxu1 }
 0x371   :  { %v3107_v48 = vpop.f32.mrb[109].mxu0  ;;  %v3219_v40 = vpop.f32.mrb[141].mxu1 }
 0x372   :  { %v2253_v50 = vadd.f32 %v2252_v6, %v2222_v29  ;;  %v3108_v51 = vadd.f32 %v3107_v48, %v3106_v56  ;;  %v3220_v39 = vadd.f32 %v3219_v40, %v3218_v57  ;;  %v3109_v61 = vpop.f32.mrb[110].mxu0  ;;  %v3221_v41 = vpop.f32.mrb[142].mxu1 }
 0x373   :  { %v3110_v54 = vpop.f32.mrb[111].mxu0  ;;  %v3222_v43 = vpop.f32.mrb[143].mxu1 }
 0x374   :  { %v6048_v37 = vadd.f32 %v3220_v39, %v3108_v51  ;;  %v3111_v24 = vadd.f32 %v3110_v54, %v3109_v61  ;;  %v3223_v9 = vadd.f32 %v3222_v43, %v3221_v41  ;;  %v2269_v61 = vld [vmem:[%s6270_s4 + $0x1] sm:$0x1]  ;;  %v6869_v54 = vld [vmem:[#allocation100_spill] sm:$0xff] }
 0x376   :  { %v2184_v12 = vadd.f32 %v2183_v2, %v6048_v37  ;;  %v2223_v15 = vmul.f32 %v6048_v37, %v6048_v37  ;;  %v2152_v52 = vadd.f32 %v3223_v9, %v3111_v24 }
 0x378   :  { %v2254_v26 = vadd.f32 %v2253_v50, %v2223_v15  ;;  %v2185_v36 = vadd.f32 %v2184_v12, %v2152_v52  ;;  %v2224_v25 = vmul.f32 %v2152_v52, %v2152_v52  ;;  %v2265_v50 = vld [vmem:[%s6270_s4] sm:$0x1] }
 0x37a   :  { %v2186_v17 = vrot.slane %v2185_v36, 4  ;;  %v2255_v63 = vadd.f32 %v2254_v26, %v2224_v25 }
 0x37c   :  { %v2187_v55 = vadd.f32 %v2186_v17, %v2185_v36  ;;  %v2256_v30 = vrot.slane %v2255_v63, 4 }
 0x37e   :  { %v2188_v38 = vrot.slane %v2187_v55, 2  ;;  %v2257_v0 = vadd.f32 %v2256_v30, %v2255_v63 }
 0x380   :  { %v2189_v14 = vadd.f32 %v2188_v38, %v2187_v55  ;;  %v2258_v13 = vrot.slane %v2257_v0, 2 }
 0x382   :  { %v2190_v7 = vrot.slane %v2189_v14, 1  ;;  %v2259_v22 = vadd.f32 %v2258_v13, %v2257_v0 }
 0x384   :  { %v2191_v34 = vadd.f32 %v2190_v7, %v2189_v14  ;;  %v2260_v6 = vrot.slane %v2259_v22, 1 }
 0x386   :  { %v2192_v2 = vmul.f32 0.00390625, %v2191_v34  ;;  %v2261_v29 = vadd.f32 %v2260_v6, %v2259_v22 }
 0x388   :  { %v2262_v56 = vmul.f32 0.00390625, %v2261_v29  ;;  %v2263_v57 = vmul.f32 %v2192_v2, %v2192_v2 }
 0x38a   :  { %v2264_v48 = vsub.f32 %v2262_v56, %v2263_v57 }
 0x38c   :  { %v2266_v40 = vadd.f32 1e-05, %v2264_v48 }
 0x38e   :  { %3365 = vrsqrt.f32 %v2266_v40 }
 0x398   :  { %v3366_v51 = vpop.eup %3365 }
 0x399   :  { %v2268_v39 = vmul.f32 %v3366_v51, %v2265_v50 }
 0x39b   :  { %v2270_v41 = vmul.f32 %v2268_v39, %v2192_v2  ;;  %v2275_v43 = vrot.slane %v2268_v39, %v6869_v54 }
 0x39d   :  { %v2271_v24 = vsub.f32 %v2269_v61, %v2270_v41  ;;  %v2307_v9 = vmul.f32 %v2275_v43, %v2152_v52  ;;  %v2276_v12 = vmul.f32 %v2275_v43, %v5898_v47  ;;  %v2277_v15 = vmul.f32 %v2275_v43, %v5900_v58 }
 0x39e   :  { %v2278_v26 = vmul.f32 %v2275_v43, %v5902_v44  ;;  %v2279_v36 = vmul.f32 %v2275_v43, %v5904_v11  ;;  %v2280_v25 = vmul.f32 %v2275_v43, %v5906_v5  ;;  %v2281_v17 = vmul.f32 %v2275_v43, %v5908_v46 }
 0x39f   :  { %v2311_v63 = vrot.slane %v2271_v24, %v6869_v54  ;;  %v2282_v55 = vmul.f32 %v2275_v43, %v5910_v21  ;;  %v2283_v30 = vmul.f32 %v2275_v43, %v5912_v31  ;;  %v2284_v52 = vmul.f32 %v2275_v43, %v5922_v16 }
 0x3a0   :  { %v2285_v47 = vmul.f32 %v2275_v43, %v5925_v1  ;;  %v2286_v58 = vmul.f32 %v2275_v43, %v5933_v8  ;;  %v2287_v44 = vmul.f32 %v2275_v43, %v5937_v33  ;;  %v2288_v11 = vmul.f32 %v2275_v43, %v5945_v45 }
 0x3a1   :  { %v2343_v38 = vadd.f32 %v2311_v63, %v2307_v9  ;;  %v2289_v5 = vmul.f32 %v2275_v43, %v5950_v18  ;;  %v2290_v46 = vmul.f32 %v2275_v43, %v5958_v4  ;;  %v2291_v0 = vmul.f32 %v2275_v43, %v5961_v59 }
 0x3a2   :  { %v2292_v21 = vmul.f32 %v2275_v43, %v5969_v19  ;;  %v2293_v31 = vmul.f32 %v2275_v43, %v5973_v23  ;;  %v2294_v16 = vmul.f32 %v2275_v43, %v5981_v20  ;;  %v2295_v1 = vmul.f32 %v2275_v43, %v5986_v3 }
 0x3a3   :  { %3367 = vtanh.f32 %v2343_v38  ;;  %v2296_v8 = vmul.f32 %v2275_v43, %v5994_v10  ;;  %v2297_v33 = vmul.f32 %v2275_v43, %v5997_v42  ;;  %v2298_v45 = vmul.f32 %v2275_v43, %v6005_v35 }
 0x3a4   :  { %v2299_v18 = vmul.f32 %v2275_v43, %v6009_v28  ;;  %v2300_v4 = vmul.f32 %v2275_v43, %v6017_v49  ;;  %v2301_v59 = vmul.f32 %v2275_v43, %v6022_v62  ;;  %v2302_v19 = vmul.f32 %v2275_v43, %v6028_v32 }
 0x3a5   :  { %v2303_v23 = vmul.f32 %v2275_v43, %v6033_v27  ;;  %v2304_v20 = vmul.f32 %v2275_v43, %v6038_v53  ;;  %v2305_v3 = vmul.f32 %v2275_v43, %v6043_v60  ;;  %v2306_v10 = vmul.f32 %v2275_v43, %v6048_v37 }
 0x3a6   :  { %v2312_v14 = vadd.f32 %v2311_v63, %v2276_v12  ;;  %v2313_v42 = vadd.f32 %v2311_v63, %v2277_v15  ;;  %v2314_v13 = vadd.f32 %v2311_v63, %v2278_v26  ;;  %v2315_v35 = vadd.f32 %v2311_v63, %v2279_v36 }
 0x3a7   :  { %v2316_v7 = vadd.f32 %v2311_v63, %v2280_v25  ;;  %v2317_v28 = vadd.f32 %v2311_v63, %v2281_v17  ;;  %v2318_v22 = vadd.f32 %v2311_v63, %v2282_v55  ;;  %v2319_v49 = vadd.f32 %v2311_v63, %v2283_v30 }
 0x3a8   :  { %v2320_v34 = vadd.f32 %v2311_v63, %v2284_v52  ;;  %v2321_v62 = vadd.f32 %v2311_v63, %v2285_v47  ;;  %v2322_v6 = vadd.f32 %v2311_v63, %v2286_v58  ;;  %v2323_v32 = vadd.f32 %v2311_v63, %v2287_v44 }
 0x3a9   :  { %v2324_v2 = vadd.f32 %v2311_v63, %v2288_v11  ;;  %v2325_v27 = vadd.f32 %v2311_v63, %v2289_v5  ;;  %v2326_v29 = vadd.f32 %v2311_v63, %v2290_v46  ;;  %v2327_v53 = vadd.f32 %v2311_v63, %v2291_v0 }
 0x3aa   :  { %v2328_v56 = vadd.f32 %v2311_v63, %v2292_v21  ;;  %v2329_v60 = vadd.f32 %v2311_v63, %v2293_v31  ;;  %v2330_v57 = vadd.f32 %v2311_v63, %v2294_v16  ;;  %v2331_v37 = vadd.f32 %v2311_v63, %v2295_v1 }
 0x3ab   :  { %v2332_v48 = vadd.f32 %v2311_v63, %v2296_v8  ;;  %v2333_v40 = vadd.f32 %v2311_v63, %v2297_v33  ;;  %v2334_v50 = vadd.f32 %v2311_v63, %v2298_v45  ;;  %v2335_v51 = vadd.f32 %v2311_v63, %v2299_v18 }
 0x3ac   :  { %v2336_v39 = vadd.f32 %v2311_v63, %v2300_v4  ;;  %v2337_v61 = vadd.f32 %v2311_v63, %v2301_v59  ;;  %v2338_v41 = vadd.f32 %v2311_v63, %v2302_v19  ;;  %v2339_v54 = vadd.f32 %v2311_v63, %v2303_v23 }
 0x3ad   :  { %v6092_v43 = vpop.eup %3367  ;;  %v2340_v24 = vadd.f32 %v2311_v63, %v2304_v20  ;;  %v6094_v9 = vadd.f32 %v2311_v63, %v2305_v3  ;;  %v6096_v12 = vadd.f32 %v2311_v63, %v2306_v10  ;;  %3369 = vtanh.f32 %v2312_v14 }
 0x3ae   :  { %3371 = vtanh.f32 %v2313_v42 }
 0x3af   :  { %3373 = vtanh.f32 %v2314_v13 }
 0x3b0   :  { %3375 = vtanh.f32 %v2315_v35 }
 0x3b1   :  { %3377 = vtanh.f32 %v2316_v7 }
 0x3b2   :  { %3379 = vtanh.f32 %v2317_v28 }
 0x3b3   :  { %3381 = vtanh.f32 %v2318_v22 }
 0x3b4   :  { %3383 = vtanh.f32 %v2319_v49 }
 0x3b5   :  { %3385 = vtanh.f32 %v2320_v34 }
 0x3b6   :  { %3387 = vtanh.f32 %v2321_v62 }
 0x3b7   :  { %v3370_v15 = vpop.eup %3369  ;;  %3389 = vtanh.f32 %v2322_v6 }
 0x3b8   :  { %v3372_v26 = vpop.eup %3371  ;;  %3391 = vtanh.f32 %v2323_v32 }
 0x3b9   :  { %v3374_v36 = vpop.eup %3373  ;;  %3393 = vtanh.f32 %v2324_v2  ;;  %v2376_v25 = vpack.c.bf16 %v3372_v26, %v3370_v15 }
 0x3ba   :  { %v3376_v17 = vpop.eup %3375  ;;  %3395 = vtanh.f32 %v2325_v27 }
 0x3bb   :  { %v3378_v63 = vpop.eup %3377  ;;  %3397 = vtanh.f32 %v2326_v29  ;;  %3264 = vmatprep.mubr.bf16.mxu0 %v2376_v25  ;;  %v2377_v55 = vpack.c.bf16 %v3376_v17, %v3374_v36 }
 0x3bc   :  { %v3380_v30 = vpop.eup %3379  ;;  %3399 = vtanh.f32 %v2327_v53  ;;  %v6104_v53 = vld [vmem:[%s6272_s6] ss:$0 sm:$0xff] }
 0x3bd   :  { %v3382_v52 = vpop.eup %3381  ;;  %3401 = vtanh.f32 %v2328_v56  ;;  %3265 = vmatmul.mubr.bf16.vlgmr.msra.gmra.mrb[112].mxu0 %v2377_v55  ;;  %v2378_v47 = vpack.c.bf16 %v3380_v30, %v3378_v63 }
 0x3be   :  { %v3384_v58 = vpop.eup %3383  ;;  %3403 = vtanh.f32 %v2329_v60 }
 0x3bf   :  { %v3386_v44 = vpop.eup %3385  ;;  %3405 = vtanh.f32 %v2330_v57  ;;  %3268 = vmatprep.mubr.bf16.mxu0 %v2378_v47  ;;  %v2379_v11 = vpack.c.bf16 %v3384_v58, %v3382_v52 }
 0x3c0   :  { %v3388_v38 = vpop.eup %3387  ;;  %3407 = vtanh.f32 %v2331_v37 }
 0x3c1   :  { %v3390_v5 = vpop.eup %3389  ;;  %3409 = vtanh.f32 %v2332_v48  ;;  %v2380_v46 = vpack.c.bf16 %v3388_v38, %v3386_v44 }
 0x3c2   :  { %v3392_v0 = vpop.eup %3391  ;;  %3411 = vtanh.f32 %v2333_v40 }
 0x3c3   :  { %v3394_v21 = vpop.eup %3393  ;;  %3413 = vtanh.f32 %v2334_v50  ;;  %v2381_v31 = vpack.c.bf16 %v3392_v0, %v3390_v5 }
 0x3c4   :  { %v3396_v16 = vpop.eup %3395  ;;  %3415 = vtanh.f32 %v2335_v51 }
 0x3c5   :  { %v3398_v1 = vpop.eup %3397  ;;  %3417 = vtanh.f32 %v2336_v39  ;;  %3269 = vmatmul.mubr.bf16.gmra.mrb[116].mxu0 %v2379_v11  ;;  %v2382_v8 = vpack.c.bf16 %v3396_v16, %v3394_v21 }
 0x3c6   :  { %v3400_v33 = vpop.eup %3399  ;;  %3419 = vtanh.f32 %v2337_v61  ;;  %3272 = vmatprep.mubr.bf16.mxu0 %v2380_v46 }
 0x3c7   :  { %v3402_v45 = vpop.eup %3401  ;;  %3421 = vtanh.f32 %v2338_v41  ;;  %v2383_v18 = vpack.c.bf16 %v3400_v33, %v3398_v1 }
 0x3c8   :  { %v3404_v4 = vpop.eup %3403  ;;  %3423 = vtanh.f32 %v2339_v54 }
 0x3c9   :  { %v3406_v59 = vpop.eup %3405  ;;  %3425 = vtanh.f32 %v2340_v24  ;;  %v2384_v19 = vpack.c.bf16 %v3404_v4, %v3402_v45 }
 0x3ca   :  { %v3408_v23 = vpop.eup %3407  ;;  %3427 = vtanh.f32 %v6094_v9 }
 0x3cb   :  { %v3410_v20 = vpop.eup %3409  ;;  %3429 = vtanh.f32 %v6096_v12  ;;  %v2385_v3 = vpack.c.bf16 %v3408_v23, %v3406_v59 }
 0x3cc   :  { %v3412_v10 = vpop.eup %3411 }
 0x3cd   :  { %v3414_v14 = vpop.eup %3413  ;;  %3273 = vmatmul.mubr.bf16.gmra.mrb[120].mxu0 %v2381_v31  ;;  %v2386_v42 = vpack.c.bf16 %v3412_v10, %v3410_v20 }
 0x3ce   :  { %v3416_v13 = vpop.eup %3415  ;;  %3276 = vmatprep.mubr.bf16.mxu0 %v2382_v8 }
 0x3cf   :  { %v3418_v35 = vpop.eup %3417  ;;  %v2387_v7 = vpack.c.bf16 %v3416_v13, %v3414_v14 }
 0x3d0   :  { %v3420_v28 = vpop.eup %3419 }
 0x3d1   :  { %v3422_v22 = vpop.eup %3421  ;;  %v2388_v49 = vpack.c.bf16 %v3420_v28, %v3418_v35 }
 0x3d2   :  { %v3424_v34 = vpop.eup %3423 }
 0x3d3   :  { %v3426_v62 = vpop.eup %3425  ;;  %v2389_v6 = vpack.c.bf16 %v3424_v34, %v3422_v22 }
 0x3d4   :  { %v3428_v32 = vpop.eup %3427 }
 0x3d5   :  { %v3430_v2 = vpop.eup %3429  ;;  %3277 = vmatmul.mubr.bf16.gmra.mrb[124].mxu0 %v2383_v18  ;;  %v2390_v27 = vpack.c.bf16 %v3428_v32, %v3426_v62 }
 0x3d6   :  { %3280 = vmatprep.mubr.bf16.mxu0 %v2384_v19  ;;  %v2391_v29 = vpack.c.bf16 %v6092_v43, %v3430_v2 }
 0x3dd   :  { %3281 = vmatmul.mubr.bf16.gmra.mrb[128].mxu0 %v2385_v3 }
 0x3de   :  { %3284 = vmatprep.mubr.bf16.mxu0 %v2386_v42 }
 0x3e5   :  { %3285 = vmatmul.mubr.bf16.gmra.mrb[132].mxu0 %v2387_v7 }
 0x3e6   :  { %3288 = vmatprep.mubr.bf16.mxu0 %v2388_v49 }
 0x3ed   :  { %3289 = vmatmul.mubr.bf16.gmra.mrb[136].mxu0 %v2389_v6 }
 0x3ee   :  { %3292 = vmatprep.mubr.bf16.mxu0 %v2390_v27 }
 0x3f5   :  { %3293 = vmatmul.mubr.bf16.gmra.mrb[140].mxu0 %v2391_v29 }
 0x490   :  { %v3266_v56 = vpop.f32.mrb[112].mxu0 }
 0x491   :  { %v2626_v60 = vadd.f32 %v3266_v56, %v6104_v53  ;;  %v2490_v57 = vpop.f32.mrb[113].mxu0 }
 0x492   :  { %v2624_v37 = vadd.f32 %v6104_v53, %v2490_v57  ;;  %v3267_v48 = vpop.f32.mrb[114].mxu0 }
 0x493   :  { %v2970_v40 = vmul.f32 -1.442695, %v2626_v60  ;;  %v2627_v50 = vadd.f32 %v3267_v48, %v6104_v53  ;;  %v2493_v51 = vpop.f32.mrb[115].mxu0 }
 0x494   :  { %v2968_v39 = vmul.f32 -1.442695, %v2624_v37  ;;  %v2625_v61 = vadd.f32 %v6104_v53, %v2493_v51 }
 0x495   :  { %3431 = vpow2.f32 %v2970_v40  ;;  %v2971_v41 = vmul.f32 -1.442695, %v2627_v50 }
 0x496   :  { %3433 = vpow2.f32 %v2968_v39  ;;  %v2969_v54 = vmul.f32 -1.442695, %v2625_v61 }
 0x497   :  { %3435 = vpow2.f32 %v2971_v41 }
 0x498   :  { %3437 = vpow2.f32 %v2969_v54  ;;  %v3270_v43 = vpop.f32.mrb[116].mxu0 }
 0x499   :  { %v2630_v24 = vadd.f32 %v3270_v43, %v6104_v53  ;;  %v2506_v9 = vpop.f32.mrb[117].mxu0 }
 0x49a   :  { %v2628_v12 = vadd.f32 %v6104_v53, %v2506_v9  ;;  %v3271_v15 = vpop.f32.mrb[118].mxu0 }
 0x49b   :  { %v2974_v26 = vmul.f32 -1.442695, %v2630_v24  ;;  %v2631_v36 = vadd.f32 %v3271_v15, %v6104_v53  ;;  %v2509_v25 = vpop.f32.mrb[119].mxu0 }
 0x49c   :  { %v2972_v17 = vmul.f32 -1.442695, %v2628_v12  ;;  %v2629_v63 = vadd.f32 %v6104_v53, %v2509_v25 }
 0x49d   :  { %3439 = vpow2.f32 %v2974_v26  ;;  %v2975_v55 = vmul.f32 -1.442695, %v2631_v36 }
 0x49e   :  { %3441 = vpow2.f32 %v2972_v17  ;;  %v2973_v30 = vmul.f32 -1.442695, %v2629_v63 }
 0x49f   :  { %v3432_v52 = vpop.eup %3431  ;;  %3443 = vpow2.f32 %v2975_v55 }
 0x4a0   :  { %v3434_v47 = vpop.eup %3433  ;;  %v2754_v58 = vadd.f32 1.0, %v3432_v52  ;;  %3445 = vpow2.f32 %v2973_v30  ;;  %v3274_v44 = vpop.f32.mrb[120].mxu0 }
 0x4a1   :  { %v3436_v11 = vpop.eup %3435  ;;  %v2752_v38 = vadd.f32 1.0, %v3434_v47  ;;  %v2634_v5 = vadd.f32 %v3274_v44, %v6104_v53  ;;  %v2522_v46 = vpop.f32.mrb[121].mxu0 }
 0x4a2   :  { %v3438_v0 = vpop.eup %3437  ;;  %3447 = vrcp.f32 %v2754_v58  ;;  %v2755_v21 = vadd.f32 1.0, %v3436_v11  ;;  %v2632_v31 = vadd.f32 %v6104_v53, %v2522_v46  ;;  %v3275_v16 = vpop.f32.mrb[122].mxu0 }
 0x4a3   :  { %3449 = vrcp.f32 %v2752_v38  ;;  %v2753_v1 = vadd.f32 1.0, %v3438_v0  ;;  %v2978_v8 = vmul.f32 -1.442695, %v2634_v5  ;;  %v2635_v33 = vadd.f32 %v3275_v16, %v6104_v53  ;;  %v2525_v45 = vpop.f32.mrb[123].mxu0 }
 0x4a4   :  { %3451 = vrcp.f32 %v2755_v21  ;;  %v2976_v18 = vmul.f32 -1.442695, %v2632_v31  ;;  %v2633_v4 = vadd.f32 %v6104_v53, %v2525_v45 }
 0x4a5   :  { %3453 = vrcp.f32 %v2753_v1  ;;  %v2979_v59 = vmul.f32 -1.442695, %v2635_v33 }
 0x4a6   :  { %3455 = vpow2.f32 %v2978_v8  ;;  %v2977_v19 = vmul.f32 -1.442695, %v2633_v4 }
 0x4a7   :  { %v3440_v23 = vpop.eup %3439  ;;  %3457 = vpow2.f32 %v2976_v18 }
 0x4a8   :  { %v3442_v20 = vpop.eup %3441  ;;  %v2758_v3 = vadd.f32 1.0, %v3440_v23  ;;  %3459 = vpow2.f32 %v2979_v59  ;;  %v3278_v10 = vpop.f32.mrb[124].mxu0 }
 0x4a9   :  { %v3444_v14 = vpop.eup %3443  ;;  %v2756_v42 = vadd.f32 1.0, %v3442_v20  ;;  %3461 = vpow2.f32 %v2977_v19  ;;  %v2638_v13 = vadd.f32 %v3278_v10, %v6104_v53  ;;  %v2538_v35 = vpop.f32.mrb[125].mxu0 }
 0x4aa   :  { %v3446_v7 = vpop.eup %3445  ;;  %3463 = vrcp.f32 %v2758_v3  ;;  %v2759_v28 = vadd.f32 1.0, %v3444_v14  ;;  %v2636_v22 = vadd.f32 %v6104_v53, %v2538_v35  ;;  %v3279_v49 = vpop.f32.mrb[126].mxu0 }
 0x4ab   :  { %3465 = vrcp.f32 %v2756_v42  ;;  %v2757_v34 = vadd.f32 1.0, %v3446_v7  ;;  %v2982_v62 = vmul.f32 -1.442695, %v2638_v13  ;;  %v2639_v6 = vadd.f32 %v3279_v49, %v6104_v53  ;;  %v2541_v32 = vpop.f32.mrb[127].mxu0 }
 0x4ac   :  { %v3448_v2 = vpop.eup %3447  ;;  %3467 = vrcp.f32 %v2759_v28  ;;  %v2980_v27 = vmul.f32 -1.442695, %v2636_v22  ;;  %v2637_v29 = vadd.f32 %v6104_v53, %v2541_v32 }
 0x4ad   :  { %v3450_v56 = vpop.eup %3449  ;;  %2851 = vst.msk [vmem:[%s6273_s7 + $0x10] sm:$0xff] %vm2848_vm1, %v3448_v2  ;;  %3469 = vrcp.f32 %v2757_v34  ;;  %v2983_v60 = vmul.f32 -1.442695, %v2639_v6 }
 0x4ae   :  { %v3452_v57 = vpop.eup %3451  ;;  %2849 = vst.msk [vmem:[%s6273_s7] sm:$0xff] %vm2848_vm1, %v3450_v56  ;;  %3471 = vpow2.f32 %v2982_v62  ;;  %v2981_v37 = vmul.f32 -1.442695, %v2637_v29 }
 0x4af   :  { %v3454_v48 = vpop.eup %3453  ;;  %2852 = vst.msk [vmem:[%s6273_s7 + $0x18] sm:$0xff] %vm2848_vm1, %v3452_v57  ;;  %3473 = vpow2.f32 %v2980_v27 }
 0x4b0   :  { %v3456_v40 = vpop.eup %3455  ;;  %2850 = vst.msk [vmem:[%s6273_s7 + $0x8] sm:$0xff] %vm2848_vm1, %v3454_v48  ;;  %3475 = vpow2.f32 %v2983_v60  ;;  %v3282_v50 = vpop.f32.mrb[128].mxu0 }
 0x4b1   :  { %v3458_v51 = vpop.eup %3457  ;;  %v2762_v39 = vadd.f32 1.0, %v3456_v40  ;;  %3477 = vpow2.f32 %v2981_v37  ;;  %v2642_v61 = vadd.f32 %v3282_v50, %v6104_v53  ;;  %v2554_v41 = vpop.f32.mrb[129].mxu0 }
 0x4b2   :  { %v3460_v54 = vpop.eup %3459  ;;  %v2760_v43 = vadd.f32 1.0, %v3458_v51  ;;  %v2640_v24 = vadd.f32 %v6104_v53, %v2554_v41  ;;  %v3283_v9 = vpop.f32.mrb[130].mxu0 }
 0x4b3   :  { %v3462_v12 = vpop.eup %3461  ;;  %3479 = vrcp.f32 %v2762_v39  ;;  %v2763_v15 = vadd.f32 1.0, %v3460_v54  ;;  %v2986_v26 = vmul.f32 -1.442695, %v2642_v61  ;;  %v2643_v36 = vadd.f32 %v3283_v9, %v6104_v53  ;;  %v2557_v25 = vpop.f32.mrb[131].mxu0 }
 0x4b4   :  { %v3464_v17 = vpop.eup %3463  ;;  %3481 = vrcp.f32 %v2760_v43  ;;  %v2761_v63 = vadd.f32 1.0, %v3462_v12  ;;  %v2984_v55 = vmul.f32 -1.442695, %v2640_v24  ;;  %v2641_v30 = vadd.f32 %v6104_v53, %v2557_v25 }
 0x4b5   :  { %v3466_v52 = vpop.eup %3465  ;;  %2855 = vst.msk [vmem:[%s6273_s7 + $0x30] sm:$0xff] %vm2848_vm1, %v3464_v17  ;;  %3483 = vrcp.f32 %v2763_v15  ;;  %v2987_v47 = vmul.f32 -1.442695, %v2643_v36 }
 0x4b6   :  { %v3468_v58 = vpop.eup %3467  ;;  %2853 = vst.msk [vmem:[%s6273_s7 + $0x20] sm:$0xff] %vm2848_vm1, %v3466_v52  ;;  %3485 = vrcp.f32 %v2761_v63  ;;  %v2985_v44 = vmul.f32 -1.442695, %v2641_v30 }
 0x4b7   :  { %v3470_v11 = vpop.eup %3469  ;;  %2856 = vst.msk [vmem:[%s6273_s7 + $0x38] sm:$0xff] %vm2848_vm1, %v3468_v58  ;;  %3487 = vpow2.f32 %v2986_v26 }
 0x4b8   :  { %v3472_v38 = vpop.eup %3471  ;;  %2854 = vst.msk [vmem:[%s6273_s7 + $0x28] sm:$0xff] %vm2848_vm1, %v3470_v11  ;;  %3489 = vpow2.f32 %v2984_v55  ;;  %v3286_v5 = vpop.f32.mrb[132].mxu0 }
 0x4b9   :  { %v3474_v46 = vpop.eup %3473  ;;  %v2766_v0 = vadd.f32 1.0, %v3472_v38  ;;  %3491 = vpow2.f32 %v2987_v47  ;;  %v2646_v21 = vadd.f32 %v3286_v5, %v6104_v53  ;;  %v2570_v31 = vpop.f32.mrb[133].mxu0 }
 0x4ba   :  { %v3476_v16 = vpop.eup %3475  ;;  %v2764_v1 = vadd.f32 1.0, %v3474_v46  ;;  %3493 = vpow2.f32 %v2985_v44  ;;  %v2644_v8 = vadd.f32 %v6104_v53, %v2570_v31  ;;  %v3287_v33 = vpop.f32.mrb[134].mxu0 }
 0x4bb   :  { %v3478_v45 = vpop.eup %3477  ;;  %3495 = vrcp.f32 %v2766_v0  ;;  %v2767_v18 = vadd.f32 1.0, %v3476_v16  ;;  %v2990_v4 = vmul.f32 -1.442695, %v2646_v21  ;;  %v2647_v59 = vadd.f32 %v3287_v33, %v6104_v53  ;;  %v2573_v19 = vpop.f32.mrb[135].mxu0 }
 0x4bc   :  { %3497 = vrcp.f32 %v2764_v1  ;;  %v2765_v23 = vadd.f32 1.0, %v3478_v45  ;;  %v2988_v20 = vmul.f32 -1.442695, %v2644_v8  ;;  %v2645_v3 = vadd.f32 %v6104_v53, %v2573_v19 }
 0x4bd   :  { %v3480_v10 = vpop.eup %3479  ;;  %3499 = vrcp.f32 %v2767_v18  ;;  %v2991_v14 = vmul.f32 -1.442695, %v2647_v59 }
 0x4be   :  { %v3482_v42 = vpop.eup %3481  ;;  %2859 = vst.msk [vmem:[%s6273_s7 + $0x50] sm:$0xff] %vm2848_vm1, %v3480_v10  ;;  %3501 = vrcp.f32 %v2765_v23  ;;  %v2989_v13 = vmul.f32 -1.442695, %v2645_v3 }
 0x4bf   :  { %v3484_v35 = vpop.eup %3483  ;;  %2857 = vst.msk [vmem:[%s6273_s7 + $0x40] sm:$0xff] %vm2848_vm1, %v3482_v42  ;;  %3503 = vpow2.f32 %v2990_v4 }
 0x4c0   :  { %v3486_v7 = vpop.eup %3485  ;;  %2860 = vst.msk [vmem:[%s6273_s7 + $0x58] sm:$0xff] %vm2848_vm1, %v3484_v35  ;;  %3505 = vpow2.f32 %v2988_v20  ;;  %v3290_v28 = vpop.f32.mrb[136].mxu0 }
 0x4c1   :  { %v3488_v22 = vpop.eup %3487  ;;  %2858 = vst.msk [vmem:[%s6273_s7 + $0x48] sm:$0xff] %vm2848_vm1, %v3486_v7  ;;  %3507 = vpow2.f32 %v2991_v14  ;;  %v2650_v49 = vadd.f32 %v3290_v28, %v6104_v53  ;;  %v2586_v34 = vpop.f32.mrb[137].mxu0 }
 0x4c2   :  { %v3490_v62 = vpop.eup %3489  ;;  %v2770_v6 = vadd.f32 1.0, %v3488_v22  ;;  %3509 = vpow2.f32 %v2989_v13  ;;  %v2648_v32 = vadd.f32 %v6104_v53, %v2586_v34  ;;  %v3291_v2 = vpop.f32.mrb[138].mxu0 }
 0x4c3   :  { %v3492_v27 = vpop.eup %3491  ;;  %v2768_v29 = vadd.f32 1.0, %v3490_v62  ;;  %v2651_v56 = vadd.f32 %v3291_v2, %v6104_v53  ;;  %v2589_v60 = vpop.f32.mrb[139].mxu0  ;;  %v2994_v48 = vmul.f32 -1.442695, %v2650_v49 }
 0x4c4   :  { %v3494_v57 = vpop.eup %3493  ;;  %3511 = vrcp.f32 %v2770_v6  ;;  %v2771_v37 = vadd.f32 1.0, %v3492_v27  ;;  %v2649_v40 = vadd.f32 %v6104_v53, %v2589_v60  ;;  %v2992_v39 = vmul.f32 -1.442695, %v2648_v32 }
 0x4c5   :  { %v3496_v50 = vpop.eup %3495  ;;  %3513 = vrcp.f32 %v2768_v29  ;;  %v2769_v51 = vadd.f32 1.0, %v3494_v57  ;;  %v2995_v41 = vmul.f32 -1.442695, %v2651_v56 }
 0x4c6   :  { %v3498_v61 = vpop.eup %3497  ;;  %2863 = vst.msk [vmem:[%s6273_s7 + $0x70] sm:$0xff] %vm2848_vm1, %v3496_v50  ;;  %3515 = vrcp.f32 %v2771_v37  ;;  %v2993_v43 = vmul.f32 -1.442695, %v2649_v40 }
 0x4c7   :  { %v3500_v54 = vpop.eup %3499  ;;  %2861 = vst.msk [vmem:[%s6273_s7 + $0x60] sm:$0xff] %vm2848_vm1, %v3498_v61  ;;  %3517 = vrcp.f32 %v2769_v51 }
 0x4c8   :  { %v3502_v24 = vpop.eup %3501  ;;  %2864 = vst.msk [vmem:[%s6273_s7 + $0x78] sm:$0xff] %vm2848_vm1, %v3500_v54  ;;  %3519 = vpow2.f32 %v2994_v48  ;;  %v3294_v9 = vpop.f32.mrb[140].mxu0 }
 0x4c9   :  { %v3504_v12 = vpop.eup %3503  ;;  %2862 = vst.msk [vmem:[%s6273_s7 + $0x68] sm:$0xff] %vm2848_vm1, %v3502_v24  ;;  %3521 = vpow2.f32 %v2992_v39  ;;  %v2654_v15 = vadd.f32 %v3294_v9, %v6104_v53  ;;  %v2602_v26 = vpop.f32.mrb[141].mxu0 }
 0x4ca   :  { %v3506_v36 = vpop.eup %3505  ;;  %v2774_v25 = vadd.f32 1.0, %v3504_v12  ;;  %3523 = vpow2.f32 %v2995_v41  ;;  %v2652_v17 = vadd.f32 %v6104_v53, %v2602_v26  ;;  %v3295_v63 = vpop.f32.mrb[142].mxu0 }
 0x4cb   :  { %v3508_v55 = vpop.eup %3507  ;;  %v2772_v30 = vadd.f32 1.0, %v3506_v36  ;;  %3525 = vpow2.f32 %v2993_v43  ;;  %v2655_v52 = vadd.f32 %v3295_v63, %v6104_v53  ;;  %v2605_v47 = vpop.f32.mrb[143].mxu0  ;;  %v2998_v11 = vmul.f32 -1.442695, %v2654_v15 }
 0x4cc   :  { %v3510_v58 = vpop.eup %3509  ;;  %3527 = vrcp.f32 %v2774_v25  ;;  %v2775_v44 = vadd.f32 1.0, %v3508_v55  ;;  %v2653_v38 = vadd.f32 %v6104_v53, %v2605_v47  ;;  %v2996_v46 = vmul.f32 -1.442695, %v2652_v17 }
 0x4cd   :  { %3529 = vrcp.f32 %v2772_v30  ;;  %v2773_v5 = vadd.f32 1.0, %v3510_v58  ;;  %v2999_v21 = vmul.f32 -1.442695, %v2655_v52 }
 0x4ce   :  { %v3512_v0 = vpop.eup %3511  ;;  %3531 = vrcp.f32 %v2775_v44  ;;  %v2997_v16 = vmul.f32 -1.442695, %v2653_v38 }
 0x4cf   :  { %v3514_v31 = vpop.eup %3513  ;;  %2867 = vst.msk [vmem:[%s6273_s7 + $0x90] sm:$0xff] %vm2848_vm1, %v3512_v0  ;;  %3533 = vrcp.f32 %v2773_v5 }
 0x4d0   :  { %v3516_v1 = vpop.eup %3515  ;;  %2865 = vst.msk [vmem:[%s6273_s7 + $0x80] sm:$0xff] %vm2848_vm1, %v3514_v31  ;;  %3535 = vpow2.f32 %v2998_v11 }
 0x4d1   :  { %v3518_v53 = vpop.eup %3517  ;;  %2868 = vst.msk [vmem:[%s6273_s7 + $0x98] sm:$0xff] %vm2848_vm1, %v3516_v1  ;;  %3537 = vpow2.f32 %v2996_v46 }
 0x4d2   :  { %v3520_v8 = vpop.eup %3519  ;;  %2866 = vst.msk [vmem:[%s6273_s7 + $0x88] sm:$0xff] %vm2848_vm1, %v3518_v53  ;;  %3539 = vpow2.f32 %v2999_v21 }
 0x4d3   :  { %v3522_v33 = vpop.eup %3521  ;;  %v2778_v45 = vadd.f32 1.0, %v3520_v8  ;;  %3541 = vpow2.f32 %v2997_v16 }
 0x4d4   :  { %v3524_v18 = vpop.eup %3523  ;;  %v2776_v4 = vadd.f32 1.0, %v3522_v33 }
 0x4d5   :  { %v3526_v59 = vpop.eup %3525  ;;  %3543 = vrcp.f32 %v2778_v45  ;;  %v2779_v19 = vadd.f32 1.0, %v3524_v18 }
 0x4d6   :  { %v3528_v23 = vpop.eup %3527  ;;  %3545 = vrcp.f32 %v2776_v4  ;;  %v2777_v20 = vadd.f32 1.0, %v3526_v59 }
 0x4d7   :  { %v3530_v3 = vpop.eup %3529  ;;  %2871 = vst.msk [vmem:[%s6273_s7 + $0xb0] sm:$0xff] %vm2848_vm1, %v3528_v23  ;;  %3547 = vrcp.f32 %v2779_v19 }
 0x4d8   :  { %v3532_v10 = vpop.eup %3531  ;;  %2869 = vst.msk [vmem:[%s6273_s7 + $0xa0] sm:$0xff] %vm2848_vm1, %v3530_v3  ;;  %3549 = vrcp.f32 %v2777_v20 }
 0x4d9   :  { %v3534_v14 = vpop.eup %3533  ;;  %2872 = vst.msk [vmem:[%s6273_s7 + $0xb8] sm:$0xff] %vm2848_vm1, %v3532_v10 }
 0x4da   :  { %v3536_v42 = vpop.eup %3535  ;;  %2870 = vst.msk [vmem:[%s6273_s7 + $0xa8] sm:$0xff] %vm2848_vm1, %v3534_v14 }
 0x4db   :  { %v3538_v13 = vpop.eup %3537  ;;  %v2782_v35 = vadd.f32 1.0, %v3536_v42 }
 0x4dc   :  { %v3540_v7 = vpop.eup %3539  ;;  %v2780_v28 = vadd.f32 1.0, %v3538_v13 }
 0x4dd   :  { %v3542_v22 = vpop.eup %3541  ;;  %3551 = vrcp.f32 %v2782_v35  ;;  %v2783_v49 = vadd.f32 1.0, %v3540_v7 }
 0x4de   :  { %3553 = vrcp.f32 %v2780_v28  ;;  %v2781_v34 = vadd.f32 1.0, %v3542_v22 }
 0x4df   :  { %v3544_v62 = vpop.eup %3543  ;;  %3555 = vrcp.f32 %v2783_v49 }
 0x4e0   :  { %v3546_v6 = vpop.eup %3545  ;;  %2875 = vst.msk [vmem:[%s6273_s7 + $0xd0] sm:$0xff] %vm2848_vm1, %v3544_v62  ;;  %3557 = vrcp.f32 %v2781_v34 }
 0x4e1   :  { %v3548_v32 = vpop.eup %3547  ;;  %2873 = vst.msk [vmem:[%s6273_s7 + $0xc0] sm:$0xff] %vm2848_vm1, %v3546_v6 }
 0x4e2   :  { %v3550_v2 = vpop.eup %3549  ;;  %2876 = vst.msk [vmem:[%s6273_s7 + $0xd8] sm:$0xff] %vm2848_vm1, %v3548_v32 }
 0x4e3   :  { %2874 = vst.msk [vmem:[%s6273_s7 + $0xc8] sm:$0xff] %vm2848_vm1, %v3550_v2 }
 0x4e7   :  { %v3552_v27 = vpop.eup %3551 }
 0x4e8   :  { %v3554_v29 = vpop.eup %3553  ;;  %2879 = vst.msk [vmem:[%s6273_s7 + $0xf0] sm:$0xff] %vm2848_vm1, %v3552_v27 }
 0x4e9   :  { %v3556_v56 = vpop.eup %3555  ;;  %2877 = vst.msk [vmem:[%s6273_s7 + $0xe0] sm:$0xff] %vm2848_vm1, %v3554_v29 }
 0x4ea   :  { %v3558_v60 = vpop.eup %3557  ;;  %2880 = vst.msk [vmem:[%s6273_s7 + $0xf8] sm:$0xff] %vm2848_vm1, %v3556_v56 }
 0x4eb   :  { %2878 = vst.msk [vmem:[%s6273_s7 + $0xe8] sm:$0xff] %vm2848_vm1, %v3558_v60 }
 0x4ec   :  { %2885 = vsyncpa [#allocation3], 1 }

</bundles_post_ra>
